<compile_context>
chip_gen: v6e
topology: v6e:2x2x1
jax: 0.10.0
libtpu: 0.0.40
codegen_flags: <defaults>
</compile_context>

<pallas_src>
import functools

import jax
import jax.numpy as jnp
import numpy as np
from jax import lax
from jax.experimental import pallas as pl
from jax.experimental.pallas import tpu as pltpu

KERNEL_SIZES = (3, 5)
MIN_SCALE = 0.2
MAX_SCALE = 1.0
RESIDUAL_WEIGHT = 0.7


def _msa_kernel(params_ref, x_ref, out_ref, pad_ref, *, height, width,
                kernel_sizes):
    """One grid step = TB images; x/out blocks are (TB, C, H*W), lane-dense."""
    tb, n_chan, hw = x_ref.shape
    pad = max(k // 2 for k in kernel_sizes)
    hp = height + 2 * pad
    wp = width + 2 * pad

    # ---- channel mean / max, accumulated in f32 (no full-block f32 copy) ---
    x0 = x_ref[:, pl.ds(0, 1), :].astype(jnp.float32)           # (TB, 1, HW)
    csum = x0
    cmax = x0
    for c in range(1, n_chan):
        xc = x_ref[:, pl.ds(c, 1), :].astype(jnp.float32)
        csum = csum + xc
        cmax = jnp.maximum(cmax, xc)
    cavg = csum * (1.0 / n_chan)                                 # (TB, 1, HW)

    # ---- refresh only the zero border of the padded (avg,max) scratch ------
    # (interior is fully overwritten below; gating this on program_id==0 would
    #  be wrong if the "parallel" batch axis is split across TensorCores)
    pad_ref[:, pl.ds(0, pad), :] = jnp.zeros((2 * tb, pad, wp), jnp.float32)
    pad_ref[:, pl.ds(pad + height, pad), :] = jnp.zeros((2 * tb, pad, wp),
                                                        jnp.float32)
    pad_ref[:, :, pl.ds(0, pad)] = jnp.zeros((2 * tb, hp, pad), jnp.float32)
    pad_ref[:, :, pl.ds(pad + width, pad)] = jnp.zeros((2 * tb, hp, pad),
                                                       jnp.float32)

    # ---- scatter the flat (TB,1,HW) maps into (H, W) rows of the scratch ---
    # scratch rows [0, TB) hold the avg map, rows [TB, 2*TB) the max map.
    for src, c in ((cavg, 0), (cmax, 1)):
        for y in range(height):
            pad_ref[pl.ds(c * tb, tb), pl.ds(pad + y, 1), pl.ds(pad, width)] = (
                src[:, :, y * width:(y + 1) * width])

    # ---- hoist lane-shifted slabs: one per (in-channel, kx offset) ---------
    need_ox = sorted({(pad - k // 2) + kx
                      for k in kernel_sizes for kx in range(k)})
    slabs = {}
    for c in range(2):
        for ox in need_ox:
            slabs[(c, ox)] = pad_ref[pl.ds(c * tb, tb), :, pl.ds(ox, width)]

    # ---- multi-scale convs (+bias), sigmoid, pre-folded 1x1 fusion ---------
    off = 0
    conv_out = []
    for k in kernel_sizes:
        base = pad - k // 2
        acc = jnp.zeros((tb, height, width), jnp.float32)
        for c in range(2):
            for kx in range(k):
                slab = slabs[(c, base + kx)]                     # (TB, Hp, W)
                for ky in range(k):
                    w = params_ref[off + (c * k + ky) * k + kx]
                    oy = base + ky
                    acc = acc + w * slab[:, oy:oy + height, :]
        conv_out.append(acc + params_ref[off + 2 * k * k])
        off += 2 * k * k + 1

    # fusion weight/bias were folded host-side with (max_scale - min_scale),
    # min_scale and residual_weight, so `scale` is the total multiplier of x.
    scale = jnp.zeros((tb, height, width), jnp.float32)
    for i, co in enumerate(conv_out):
        scale = scale + params_ref[off + i] * jax.nn.sigmoid(co)
    scale = scale + params_ref[off + len(kernel_sizes)]

    # ---- flatten the scale back to (TB, 1, HW) and apply lane-dense --------
    scale_flat = jnp.concatenate(
        [scale[:, y:y + 1, :] for y in range(height)], axis=-1)
    scale_flat = scale_flat.astype(out_ref.dtype)
    out_ref[...] = (x_ref[...] * scale_flat).astype(out_ref.dtype)


def _choose_batch_tile(batch, per_image_bytes, target_bytes=1 << 20):
    """~1 MiB blocks, but keep >=2 grid steps when possible (v7x: 2 TCs) and
    make the tile divide the batch exactly (no partial blocks)."""
    tb = max(1, min(batch, target_bytes // max(per_image_bytes, 1)))
    if batch >= 2:
        tb = max(1, min(tb, batch // 2))
    while batch % tb:
        tb -= 1
    return tb


def multi_scale_attention(x, conv_weights, conv_biases, fusion_weight,
                          fusion_bias, *, kernel_sizes=KERNEL_SIZES):
    """x: (B, C, H, W); conv_weights[i]: (1, 2, k_i, k_i); conv_biases[i]: (1,);
    fusion_weight: (1, len(kernel_sizes), 1, 1); fusion_bias: (1,)."""
    B, C, H, W = x.shape
    pad = max(k // 2 for k in kernel_sizes)
    HW = H * W

    # lane-dense layout for the kernel: minor dim is H*W instead of W.
    x_flat = x.reshape(B, C, HW)

    # pack all conv params into one flat f32 SMEM operand:
    #   [w_k flat (2*k*k), b_k] per kernel size, then [fusion w's, fusion b],
    # with the fusion conv pre-folded so the kernel emits the total multiplier
    #   scale_total = (min + residual) + (max - min) * (fb + sum_i fw_i*att_i).
    pieces = []
    for w, b in zip(conv_weights, conv_biases):
        pieces.append(w.reshape(-1).astype(jnp.float32))
        pieces.append(b.reshape(-1).astype(jnp.float32))
    fw = fusion_weight.reshape(-1).astype(jnp.float32) * (MAX_SCALE - MIN_SCALE)
    fb = (fusion_bias.reshape(-1).astype(jnp.float32) * (MAX_SCALE - MIN_SCALE)
          + (MIN_SCALE + RESIDUAL_WEIGHT))
    pieces.extend([fw, fb])
    params = jnp.concatenate(pieces)

    itemsize = jnp.dtype(x.dtype).itemsize
    per_image_bytes = C * HW * itemsize
    tb = _choose_batch_tile(B, per_image_bytes)
    grid = (B // tb,)

    block_bytes = tb * per_image_bytes
    pad_scratch_bytes = 2 * tb * (H + 2 * pad) * (W + 2 * pad) * 4
    # double-buffered in + out blocks, the pad scratch, plus working headroom;
    # stays well under v7x's 64 MiB VMEM for the ~1 MiB target blocks.
    vmem_limit = int(min(96 << 20,
                         max(32 << 20,
                             8 * block_bytes + pad_scratch_bytes + (4 << 20))))

    n_maps = len(kernel_sizes)
    taps = sum(2 * k * k for k in kernel_sizes)
    cost = pl.CostEstimate(
        flops=int(B * HW * (4 * C + 2 * taps + 2 * n_maps)),
        transcendentals=int(B * HW * n_maps),
        bytes_accessed=int(2 * B * C * HW * itemsize + params.size * 4),
    )

    kernel = functools.partial(_msa_kernel, height=H, width=W,
                               kernel_sizes=tuple(kernel_sizes))

    out_flat = pl.pallas_call(
        kernel,
        out_shape=jax.ShapeDtypeStruct((B, C, HW), x.dtype),
        grid_spec=pltpu.PrefetchScalarGridSpec(
            num_scalar_prefetch=0,
            grid=grid,
            in_specs=[
                pl.BlockSpec(memory_space=pltpu.MemorySpace.SMEM),   # params
                pl.BlockSpec((tb, C, HW), lambda b: (b, 0, 0)),      # x tile
            ],
            out_specs=pl.BlockSpec((tb, C, HW), lambda b: (b, 0, 0)),
            scratch_shapes=[
                pltpu.VMEM((2 * tb, H + 2 * pad, W + 2 * pad), jnp.float32),
            ],
        ),
        compiler_params=pltpu.CompilerParams(
            dimension_semantics=("parallel",),
            vmem_limit_bytes=vmem_limit),
        cost_estimate=cost,
    )(params, x_flat)
    return out_flat.reshape(B, C, H, W)


def _reference(x, conv_weights, conv_biases, fusion_weight, fusion_bias, *,
               kernel_sizes=KERNEL_SIZES):
    dn = ('NCHW', 'OIHW', 'NCHW')
    avg = jnp.mean(x, axis=1, keepdims=True)
    mx = jnp.max(x, axis=1, keepdims=True)
    xc = jnp.concatenate([avg, mx], axis=1)
    atts = []
    for k, w, b in zip(kernel_sizes, conv_weights, conv_biases):
        p = k // 2
        y = lax.conv_general_dilated(xc, w, (1, 1), [(p, p), (p, p)],
                                     dimension_numbers=dn)
        atts.append(jax.nn.sigmoid(y + b.reshape(1, -1, 1, 1)))
    cat = jnp.concatenate(atts, axis=1)
    fused = lax.conv_general_dilated(cat, fusion_weight, (1, 1),
                                     [(0, 0), (0, 0)], dimension_numbers=dn)
    fused = fused + fusion_bias.reshape(1, -1, 1, 1)
    scale = MIN_SCALE + (MAX_SCALE - MIN_SCALE) * fused
    return x * scale + RESIDUAL_WEIGHT * x


if __name__ == "__main__":
    key = jax.random.PRNGKey(0)
    kx, k1, k2, k3, k4, k5, k6 = jax.random.split(key, 7)

    B, C, H, W = 2, 4, 16, 16
    x = jax.random.normal(kx, (B, C, H, W), dtype=jnp.float32)

    # deterministic "module parameters"
    w3 = jax.random.normal(k1, (1, 2, 3, 3), dtype=jnp.float32) * 0.2
    b3 = jax.random.normal(k2, (1,), dtype=jnp.float32) * 0.1
    w5 = jax.random.normal(k3, (1, 2, 5, 5), dtype=jnp.float32) * 0.1
    b5 = jax.random.normal(k4, (1,), dtype=jnp.float32) * 0.1
    wf = jax.random.normal(k5, (1, 2, 1, 1), dtype=jnp.float32) * 0.5
    bf = jax.random.normal(k6, (1,), dtype=jnp.float32) * 0.1

    out = multi_scale_attention(x, [w3, w5], [b3, b5], wf, bf)
    jax.block_until_ready(out)

    ref = _reference(x, [w3, w5], [b3, b5], wf, bf)
    np.testing.assert_allclose(np.asarray(out), np.asarray(ref),
                               rtol=1e-4, atol=1e-5)
    print("KERNEL_OK")
</pallas_src>

<mosaic_0001>
module attributes {stable_mosaic.version = 11 : i64} {
  func.func @_msa_kernel(%arg0: i32, %arg1: memref<73xf32, #tpu.memory_space<smem>>, %arg2: memref<1x4x256xf32, #tpu.memory_space<vmem>>, %arg3: memref<1x4x256xf32, #tpu.memory_space<vmem>>, %arg4: memref<2x20x20xf32, #tpu.memory_space<vmem>>) attributes {dimension_semantics = [#tpu.dimension_semantics<parallel>], iteration_bounds = array<i64: 2>, scalar_prefetch = 0 : i64, scratch_operands = 1 : i64, tpu.core_type = #tpu.core_type<tc>, window_params = [{transform_indices = @transform_0, window_bounds = array<i64: 73>}, {transform_indices = @transform_1, window_bounds = array<i64: 1, 4, 256>}, {transform_indices = @transform_2, window_bounds = array<i64: 1, 4, 256>}]} {
    %c0 = arith.constant 0 : index
    %c0_0 = arith.constant 0 : index
    %c0_1 = arith.constant 0 : index
    %0 = vector.load %arg2[%c0, %c0_0, %c0_1] : memref<1x4x256xf32, #tpu.memory_space<vmem>>, vector<1x1x256xf32>
    %c0_2 = arith.constant 0 : index
    %c1 = arith.constant 1 : index
    %c0_3 = arith.constant 0 : index
    %1 = vector.load %arg2[%c0_2, %c1, %c0_3] : memref<1x4x256xf32, #tpu.memory_space<vmem>>, vector<1x1x256xf32>
    %2 = arith.addf %0, %1 : vector<1x1x256xf32>
    %3 = arith.maximumf %0, %1 : vector<1x1x256xf32>
    %c0_4 = arith.constant 0 : index
    %c2 = arith.constant 2 : index
    %c0_5 = arith.constant 0 : index
    %4 = vector.load %arg2[%c0_4, %c2, %c0_5] : memref<1x4x256xf32, #tpu.memory_space<vmem>>, vector<1x1x256xf32>
    %5 = arith.addf %2, %4 : vector<1x1x256xf32>
    %6 = arith.maximumf %3, %4 : vector<1x1x256xf32>
    %c0_6 = arith.constant 0 : index
    %c3 = arith.constant 3 : index
    %c0_7 = arith.constant 0 : index
    %7 = vector.load %arg2[%c0_6, %c3, %c0_7] : memref<1x4x256xf32, #tpu.memory_space<vmem>>, vector<1x1x256xf32>
    %8 = arith.addf %5, %7 : vector<1x1x256xf32>
    %9 = arith.maximumf %6, %7 : vector<1x1x256xf32>
    %cst = arith.constant 2.500000e-01 : f32
    %10 = vector.broadcast %cst : f32 to vector<1x1x256xf32>
    %11 = arith.mulf %8, %10 : vector<1x1x256xf32>
    %cst_8 = arith.constant 0.000000e+00 : f32
    %12 = vector.broadcast %cst_8 : f32 to vector<2x2x20xf32>
    %c0_9 = arith.constant 0 : index
    %c0_10 = arith.constant 0 : index
    %c0_11 = arith.constant 0 : index
    %13 = vector.load %arg4[%c0_9, %c0_10, %c0_11] : memref<2x20x20xf32, #tpu.memory_space<vmem>>, vector<2x2x20xf32>
    tpu.vector_store %arg4[%c0_9, %c0_10, %c0_11], %12 {strides = array<i32>} : memref<2x20x20xf32, #tpu.memory_space<vmem>>, vector<2x2x20xf32>,
    %cst_12 = arith.constant 0.000000e+00 : f32
    %14 = vector.broadcast %cst_12 : f32 to vector<2x2x20xf32>
    %c0_13 = arith.constant 0 : index
    %c18 = arith.constant 18 : index
    %c0_14 = arith.constant 0 : index
    %15 = vector.load %arg4[%c0_13, %c18, %c0_14] : memref<2x20x20xf32, #tpu.memory_space<vmem>>, vector<2x2x20xf32>
    tpu.vector_store %arg4[%c0_13, %c18, %c0_14], %14 {strides = array<i32>} : memref<2x20x20xf32, #tpu.memory_space<vmem>>, vector<2x2x20xf32>,
    %cst_15 = arith.constant 0.000000e+00 : f32
    %16 = vector.broadcast %cst_15 : f32 to vector<2x20x2xf32>
    %c0_16 = arith.constant 0 : index
    %c0_17 = arith.constant 0 : index
    %c0_18 = arith.constant 0 : index
    %17 = vector.load %arg4[%c0_16, %c0_17, %c0_18] : memref<2x20x20xf32, #tpu.memory_space<vmem>>, vector<2x20x2xf32>
    tpu.vector_store %arg4[%c0_16, %c0_17, %c0_18], %16 {strides = array<i32>} : memref<2x20x20xf32, #tpu.memory_space<vmem>>, vector<2x20x2xf32>,
    %cst_19 = arith.constant 0.000000e+00 : f32
    %18 = vector.broadcast %cst_19 : f32 to vector<2x20x2xf32>
    %c0_20 = arith.constant 0 : index
    %c0_21 = arith.constant 0 : index
    %c18_22 = arith.constant 18 : index
    %19 = vector.load %arg4[%c0_20, %c0_21, %c18_22] : memref<2x20x20xf32, #tpu.memory_space<vmem>>, vector<2x20x2xf32>
    tpu.vector_store %arg4[%c0_20, %c0_21, %c18_22], %18 {strides = array<i32>} : memref<2x20x20xf32, #tpu.memory_space<vmem>>, vector<2x20x2xf32>,
    %20 = vector.extract_strided_slice %11 {offsets = [0, 0, 0], sizes = [1, 1, 16], strides = [1, 1, 1]} : vector<1x1x256xf32> to vector<1x1x16xf32>
    %c0_23 = arith.constant 0 : index
    %c2_24 = arith.constant 2 : index
    %c2_25 = arith.constant 2 : index
    %21 = vector.load %arg4[%c0_23, %c2_24, %c2_25] : memref<2x20x20xf32, #tpu.memory_space<vmem>>, vector<1x1x16xf32>
    tpu.vector_store %arg4[%c0_23, %c2_24, %c2_25], %20 {strides = array<i32>} : memref<2x20x20xf32, #tpu.memory_space<vmem>>, vector<1x1x16xf32>,
    %22 = vector.extract_strided_slice %11 {offsets = [0, 0, 16], sizes = [1, 1, 16], strides = [1, 1, 1]} : vector<1x1x256xf32> to vector<1x1x16xf32>
    %c0_26 = arith.constant 0 : index
    %c3_27 = arith.constant 3 : index
    %c2_28 = arith.constant 2 : index
    %23 = vector.load %arg4[%c0_26, %c3_27, %c2_28] : memref<2x20x20xf32, #tpu.memory_space<vmem>>, vector<1x1x16xf32>
    tpu.vector_store %arg4[%c0_26, %c3_27, %c2_28], %22 {strides = array<i32>} : memref<2x20x20xf32, #tpu.memory_space<vmem>>, vector<1x1x16xf32>,
    %24 = vector.extract_strided_slice %11 {offsets = [0, 0, 32], sizes = [1, 1, 16], strides = [1, 1, 1]} : vector<1x1x256xf32> to vector<1x1x16xf32>
    %c0_29 = arith.constant 0 : index
    %c4 = arith.constant 4 : index
    %c2_30 = arith.constant 2 : index
    %25 = vector.load %arg4[%c0_29, %c4, %c2_30] : memref<2x20x20xf32, #tpu.memory_space<vmem>>, vector<1x1x16xf32>
    tpu.vector_store %arg4[%c0_29, %c4, %c2_30], %24 {strides = array<i32>} : memref<2x20x20xf32, #tpu.memory_space<vmem>>, vector<1x1x16xf32>,
    %26 = vector.extract_strided_slice %11 {offsets = [0, 0, 48], sizes = [1, 1, 16], strides = [1, 1, 1]} : vector<1x1x256xf32> to vector<1x1x16xf32>
    %c0_31 = arith.constant 0 : index
    %c5 = arith.constant 5 : index
    %c2_32 = arith.constant 2 : index
    %27 = vector.load %arg4[%c0_31, %c5, %c2_32] : memref<2x20x20xf32, #tpu.memory_space<vmem>>, vector<1x1x16xf32>
    tpu.vector_store %arg4[%c0_31, %c5, %c2_32], %26 {strides = array<i32>} : memref<2x20x20xf32, #tpu.memory_space<vmem>>, vector<1x1x16xf32>,
    %28 = vector.extract_strided_slice %11 {offsets = [0, 0, 64], sizes = [1, 1, 16], strides = [1, 1, 1]} : vector<1x1x256xf32> to vector<1x1x16xf32>
    %c0_33 = arith.constant 0 : index
    %c6 = arith.constant 6 : index
    %c2_34 = arith.constant 2 : index
    %29 = vector.load %arg4[%c0_33, %c6, %c2_34] : memref<2x20x20xf32, #tpu.memory_space<vmem>>, vector<1x1x16xf32>
    tpu.vector_store %arg4[%c0_33, %c6, %c2_34], %28 {strides = array<i32>} : memref<2x20x20xf32, #tpu.memory_space<vmem>>, vector<1x1x16xf32>,
    %30 = vector.extract_strided_slice %11 {offsets = [0, 0, 80], sizes = [1, 1, 16], strides = [1, 1, 1]} : vector<1x1x256xf32> to vector<1x1x16xf32>
    %c0_35 = arith.constant 0 : index
    %c7 = arith.constant 7 : index
    %c2_36 = arith.constant 2 : index
    %31 = vector.load %arg4[%c0_35, %c7, %c2_36] : memref<2x20x20xf32, #tpu.memory_space<vmem>>, vector<1x1x16xf32>
    tpu.vector_store %arg4[%c0_35, %c7, %c2_36], %30 {strides = array<i32>} : memref<2x20x20xf32, #tpu.memory_space<vmem>>, vector<1x1x16xf32>,
    %32 = vector.extract_strided_slice %11 {offsets = [0, 0, 96], sizes = [1, 1, 16], strides = [1, 1, 1]} : vector<1x1x256xf32> to vector<1x1x16xf32>
    %c0_37 = arith.constant 0 : index
    %c8 = arith.constant 8 : index
    %c2_38 = arith.constant 2 : index
    %33 = vector.load %arg4[%c0_37, %c8, %c2_38] : memref<2x20x20xf32, #tpu.memory_space<vmem>>, vector<1x1x16xf32>
    tpu.vector_store %arg4[%c0_37, %c8, %c2_38], %32 {strides = array<i32>} : memref<2x20x20xf32, #tpu.memory_space<vmem>>, vector<1x1x16xf32>,
    %34 = vector.extract_strided_slice %11 {offsets = [0, 0, 112], sizes = [1, 1, 16], strides = [1, 1, 1]} : vector<1x1x256xf32> to vector<1x1x16xf32>
    %c0_39 = arith.constant 0 : index
    %c9 = arith.constant 9 : index
    %c2_40 = arith.constant 2 : index
    %35 = vector.load %arg4[%c0_39, %c9, %c2_40] : memref<2x20x20xf32, #tpu.memory_space<vmem>>, vector<1x1x16xf32>
    tpu.vector_store %arg4[%c0_39, %c9, %c2_40], %34 {strides = array<i32>} : memref<2x20x20xf32, #tpu.memory_space<vmem>>, vector<1x1x16xf32>,
    %36 = vector.extract_strided_slice %11 {offsets = [0, 0, 128], sizes = [1, 1, 16], strides = [1, 1, 1]} : vector<1x1x256xf32> to vector<1x1x16xf32>
    %c0_41 = arith.constant 0 : index
    %c10 = arith.constant 10 : index
    %c2_42 = arith.constant 2 : index
    %37 = vector.load %arg4[%c0_41, %c10, %c2_42] : memref<2x20x20xf32, #tpu.memory_space<vmem>>, vector<1x1x16xf32>
    tpu.vector_store %arg4[%c0_41, %c10, %c2_42], %36 {strides = array<i32>} : memref<2x20x20xf32, #tpu.memory_space<vmem>>, vector<1x1x16xf32>,
    %38 = vector.extract_strided_slice %11 {offsets = [0, 0, 144], sizes = [1, 1, 16], strides = [1, 1, 1]} : vector<1x1x256xf32> to vector<1x1x16xf32>
    %c0_43 = arith.constant 0 : index
    %c11 = arith.constant 11 : index
    %c2_44 = arith.constant 2 : index
    %39 = vector.load %arg4[%c0_43, %c11, %c2_44] : memref<2x20x20xf32, #tpu.memory_space<vmem>>, vector<1x1x16xf32>
    tpu.vector_store %arg4[%c0_43, %c11, %c2_44], %38 {strides = array<i32>} : memref<2x20x20xf32, #tpu.memory_space<vmem>>, vector<1x1x16xf32>,
    %40 = vector.extract_strided_slice %11 {offsets = [0, 0, 160], sizes = [1, 1, 16], strides = [1, 1, 1]} : vector<1x1x256xf32> to vector<1x1x16xf32>
    %c0_45 = arith.constant 0 : index
    %c12 = arith.constant 12 : index
    %c2_46 = arith.constant 2 : index
    %41 = vector.load %arg4[%c0_45, %c12, %c2_46] : memref<2x20x20xf32, #tpu.memory_space<vmem>>, vector<1x1x16xf32>
    tpu.vector_store %arg4[%c0_45, %c12, %c2_46], %40 {strides = array<i32>} : memref<2x20x20xf32, #tpu.memory_space<vmem>>, vector<1x1x16xf32>,
    %42 = vector.extract_strided_slice %11 {offsets = [0, 0, 176], sizes = [1, 1, 16], strides = [1, 1, 1]} : vector<1x1x256xf32> to vector<1x1x16xf32>
    %c0_47 = arith.constant 0 : index
    %c13 = arith.constant 13 : index
    %c2_48 = arith.constant 2 : index
    %43 = vector.load %arg4[%c0_47, %c13, %c2_48] : memref<2x20x20xf32, #tpu.memory_space<vmem>>, vector<1x1x16xf32>
    tpu.vector_store %arg4[%c0_47, %c13, %c2_48], %42 {strides = array<i32>} : memref<2x20x20xf32, #tpu.memory_space<vmem>>, vector<1x1x16xf32>,
    %44 = vector.extract_strided_slice %11 {offsets = [0, 0, 192], sizes = [1, 1, 16], strides = [1, 1, 1]} : vector<1x1x256xf32> to vector<1x1x16xf32>
    %c0_49 = arith.constant 0 : index
    %c14 = arith.constant 14 : index
    %c2_50 = arith.constant 2 : index
    %45 = vector.load %arg4[%c0_49, %c14, %c2_50] : memref<2x20x20xf32, #tpu.memory_space<vmem>>, vector<1x1x16xf32>
    tpu.vector_store %arg4[%c0_49, %c14, %c2_50], %44 {strides = array<i32>} : memref<2x20x20xf32, #tpu.memory_space<vmem>>, vector<1x1x16xf32>,
    %46 = vector.extract_strided_slice %11 {offsets = [0, 0, 208], sizes = [1, 1, 16], strides = [1, 1, 1]} : vector<1x1x256xf32> to vector<1x1x16xf32>
    %c0_51 = arith.constant 0 : index
    %c15 = arith.constant 15 : index
    %c2_52 = arith.constant 2 : index
    %47 = vector.load %arg4[%c0_51, %c15, %c2_52] : memref<2x20x20xf32, #tpu.memory_space<vmem>>, vector<1x1x16xf32>
    tpu.vector_store %arg4[%c0_51, %c15, %c2_52], %46 {strides = array<i32>} : memref<2x20x20xf32, #tpu.memory_space<vmem>>, vector<1x1x16xf32>,
    %48 = vector.extract_strided_slice %11 {offsets = [0, 0, 224], sizes = [1, 1, 16], strides = [1, 1, 1]} : vector<1x1x256xf32> to vector<1x1x16xf32>
    %c0_53 = arith.constant 0 : index
    %c16 = arith.constant 16 : index
    %c2_54 = arith.constant 2 : index
    %49 = vector.load %arg4[%c0_53, %c16, %c2_54] : memref<2x20x20xf32, #tpu.memory_space<vmem>>, vector<1x1x16xf32>
    tpu.vector_store %arg4[%c0_53, %c16, %c2_54], %48 {strides = array<i32>} : memref<2x20x20xf32, #tpu.memory_space<vmem>>, vector<1x1x16xf32>,
    %50 = vector.extract_strided_slice %11 {offsets = [0, 0, 240], sizes = [1, 1, 16], strides = [1, 1, 1]} : vector<1x1x256xf32> to vector<1x1x16xf32>
    %c0_55 = arith.constant 0 : index
    %c17 = arith.constant 17 : index
    %c2_56 = arith.constant 2 : index
    %51 = vector.load %arg4[%c0_55, %c17, %c2_56] : memref<2x20x20xf32, #tpu.memory_space<vmem>>, vector<1x1x16xf32>
    tpu.vector_store %arg4[%c0_55, %c17, %c2_56], %50 {strides = array<i32>} : memref<2x20x20xf32, #tpu.memory_space<vmem>>, vector<1x1x16xf32>,
    %52 = vector.extract_strided_slice %9 {offsets = [0, 0, 0], sizes = [1, 1, 16], strides = [1, 1, 1]} : vector<1x1x256xf32> to vector<1x1x16xf32>
    %c1_57 = arith.constant 1 : index
    %c2_58 = arith.constant 2 : index
    %c2_59 = arith.constant 2 : index
    %53 = vector.load %arg4[%c1_57, %c2_58, %c2_59] : memref<2x20x20xf32, #tpu.memory_space<vmem>>, vector<1x1x16xf32>
    tpu.vector_store %arg4[%c1_57, %c2_58, %c2_59], %52 {strides = array<i32>} : memref<2x20x20xf32, #tpu.memory_space<vmem>>, vector<1x1x16xf32>,
    %54 = vector.extract_strided_slice %9 {offsets = [0, 0, 16], sizes = [1, 1, 16], strides = [1, 1, 1]} : vector<1x1x256xf32> to vector<1x1x16xf32>
    %c1_60 = arith.constant 1 : index
    %c3_61 = arith.constant 3 : index
    %c2_62 = arith.constant 2 : index
    %55 = vector.load %arg4[%c1_60, %c3_61, %c2_62] : memref<2x20x20xf32, #tpu.memory_space<vmem>>, vector<1x1x16xf32>
    tpu.vector_store %arg4[%c1_60, %c3_61, %c2_62], %54 {strides = array<i32>} : memref<2x20x20xf32, #tpu.memory_space<vmem>>, vector<1x1x16xf32>,
    %56 = vector.extract_strided_slice %9 {offsets = [0, 0, 32], sizes = [1, 1, 16], strides = [1, 1, 1]} : vector<1x1x256xf32> to vector<1x1x16xf32>
    %c1_63 = arith.constant 1 : index
    %c4_64 = arith.constant 4 : index
    %c2_65 = arith.constant 2 : index
    %57 = vector.load %arg4[%c1_63, %c4_64, %c2_65] : memref<2x20x20xf32, #tpu.memory_space<vmem>>, vector<1x1x16xf32>
    tpu.vector_store %arg4[%c1_63, %c4_64, %c2_65], %56 {strides = array<i32>} : memref<2x20x20xf32, #tpu.memory_space<vmem>>, vector<1x1x16xf32>,
    %58 = vector.extract_strided_slice %9 {offsets = [0, 0, 48], sizes = [1, 1, 16], strides = [1, 1, 1]} : vector<1x1x256xf32> to vector<1x1x16xf32>
    %c1_66 = arith.constant 1 : index
    %c5_67 = arith.constant 5 : index
    %c2_68 = arith.constant 2 : index
    %59 = vector.load %arg4[%c1_66, %c5_67, %c2_68] : memref<2x20x20xf32, #tpu.memory_space<vmem>>, vector<1x1x16xf32>
    tpu.vector_store %arg4[%c1_66, %c5_67, %c2_68], %58 {strides = array<i32>} : memref<2x20x20xf32, #tpu.memory_space<vmem>>, vector<1x1x16xf32>,
    %60 = vector.extract_strided_slice %9 {offsets = [0, 0, 64], sizes = [1, 1, 16], strides = [1, 1, 1]} : vector<1x1x256xf32> to vector<1x1x16xf32>
    %c1_69 = arith.constant 1 : index
    %c6_70 = arith.constant 6 : index
    %c2_71 = arith.constant 2 : index
    %61 = vector.load %arg4[%c1_69, %c6_70, %c2_71] : memref<2x20x20xf32, #tpu.memory_space<vmem>>, vector<1x1x16xf32>
    tpu.vector_store %arg4[%c1_69, %c6_70, %c2_71], %60 {strides = array<i32>} : memref<2x20x20xf32, #tpu.memory_space<vmem>>, vector<1x1x16xf32>,
    %62 = vector.extract_strided_slice %9 {offsets = [0, 0, 80], sizes = [1, 1, 16], strides = [1, 1, 1]} : vector<1x1x256xf32> to vector<1x1x16xf32>
    %c1_72 = arith.constant 1 : index
    %c7_73 = arith.constant 7 : index
    %c2_74 = arith.constant 2 : index
    %63 = vector.load %arg4[%c1_72, %c7_73, %c2_74] : memref<2x20x20xf32, #tpu.memory_space<vmem>>, vector<1x1x16xf32>
    tpu.vector_store %arg4[%c1_72, %c7_73, %c2_74], %62 {strides = array<i32>} : memref<2x20x20xf32, #tpu.memory_space<vmem>>, vector<1x1x16xf32>,
    %64 = vector.extract_strided_slice %9 {offsets = [0, 0, 96], sizes = [1, 1, 16], strides = [1, 1, 1]} : vector<1x1x256xf32> to vector<1x1x16xf32>
    %c1_75 = arith.constant 1 : index
    %c8_76 = arith.constant 8 : index
    %c2_77 = arith.constant 2 : index
    %65 = vector.load %arg4[%c1_75, %c8_76, %c2_77] : memref<2x20x20xf32, #tpu.memory_space<vmem>>, vector<1x1x16xf32>
    tpu.vector_store %arg4[%c1_75, %c8_76, %c2_77], %64 {strides = array<i32>} : memref<2x20x20xf32, #tpu.memory_space<vmem>>, vector<1x1x16xf32>,
    %66 = vector.extract_strided_slice %9 {offsets = [0, 0, 112], sizes = [1, 1, 16], strides = [1, 1, 1]} : vector<1x1x256xf32> to vector<1x1x16xf32>
    %c1_78 = arith.constant 1 : index
    %c9_79 = arith.constant 9 : index
    %c2_80 = arith.constant 2 : index
    %67 = vector.load %arg4[%c1_78, %c9_79, %c2_80] : memref<2x20x20xf32, #tpu.memory_space<vmem>>, vector<1x1x16xf32>
    tpu.vector_store %arg4[%c1_78, %c9_79, %c2_80], %66 {strides = array<i32>} : memref<2x20x20xf32, #tpu.memory_space<vmem>>, vector<1x1x16xf32>,
    %68 = vector.extract_strided_slice %9 {offsets = [0, 0, 128], sizes = [1, 1, 16], strides = [1, 1, 1]} : vector<1x1x256xf32> to vector<1x1x16xf32>
    %c1_81 = arith.constant 1 : index
    %c10_82 = arith.constant 10 : index
    %c2_83 = arith.constant 2 : index
    %69 = vector.load %arg4[%c1_81, %c10_82, %c2_83] : memref<2x20x20xf32, #tpu.memory_space<vmem>>, vector<1x1x16xf32>
    tpu.vector_store %arg4[%c1_81, %c10_82, %c2_83], %68 {strides = array<i32>} : memref<2x20x20xf32, #tpu.memory_space<vmem>>, vector<1x1x16xf32>,
    %70 = vector.extract_strided_slice %9 {offsets = [0, 0, 144], sizes = [1, 1, 16], strides = [1, 1, 1]} : vector<1x1x256xf32> to vector<1x1x16xf32>
    %c1_84 = arith.constant 1 : index
    %c11_85 = arith.constant 11 : index
    %c2_86 = arith.constant 2 : index
    %71 = vector.load %arg4[%c1_84, %c11_85, %c2_86] : memref<2x20x20xf32, #tpu.memory_space<vmem>>, vector<1x1x16xf32>
    tpu.vector_store %arg4[%c1_84, %c11_85, %c2_86], %70 {strides = array<i32>} : memref<2x20x20xf32, #tpu.memory_space<vmem>>, vector<1x1x16xf32>,
    %72 = vector.extract_strided_slice %9 {offsets = [0, 0, 160], sizes = [1, 1, 16], strides = [1, 1, 1]} : vector<1x1x256xf32> to vector<1x1x16xf32>
    %c1_87 = arith.constant 1 : index
    %c12_88 = arith.constant 12 : index
    %c2_89 = arith.constant 2 : index
    %73 = vector.load %arg4[%c1_87, %c12_88, %c2_89] : memref<2x20x20xf32, #tpu.memory_space<vmem>>, vector<1x1x16xf32>
    tpu.vector_store %arg4[%c1_87, %c12_88, %c2_89], %72 {strides = array<i32>} : memref<2x20x20xf32, #tpu.memory_space<vmem>>, vector<1x1x16xf32>,
    %74 = vector.extract_strided_slice %9 {offsets = [0, 0, 176], sizes = [1, 1, 16], strides = [1, 1, 1]} : vector<1x1x256xf32> to vector<1x1x16xf32>
    %c1_90 = arith.constant 1 : index
    %c13_91 = arith.constant 13 : index
    %c2_92 = arith.constant 2 : index
    %75 = vector.load %arg4[%c1_90, %c13_91, %c2_92] : memref<2x20x20xf32, #tpu.memory_space<vmem>>, vector<1x1x16xf32>
    tpu.vector_store %arg4[%c1_90, %c13_91, %c2_92], %74 {strides = array<i32>} : memref<2x20x20xf32, #tpu.memory_space<vmem>>, vector<1x1x16xf32>,
    %76 = vector.extract_strided_slice %9 {offsets = [0, 0, 192], sizes = [1, 1, 16], strides = [1, 1, 1]} : vector<1x1x256xf32> to vector<1x1x16xf32>
    %c1_93 = arith.constant 1 : index
    %c14_94 = arith.constant 14 : index
    %c2_95 = arith.constant 2 : index
    %77 = vector.load %arg4[%c1_93, %c14_94, %c2_95] : memref<2x20x20xf32, #tpu.memory_space<vmem>>, vector<1x1x16xf32>
    tpu.vector_store %arg4[%c1_93, %c14_94, %c2_95], %76 {strides = array<i32>} : memref<2x20x20xf32, #tpu.memory_space<vmem>>, vector<1x1x16xf32>,
    %78 = vector.extract_strided_slice %9 {offsets = [0, 0, 208], sizes = [1, 1, 16], strides = [1, 1, 1]} : vector<1x1x256xf32> to vector<1x1x16xf32>
    %c1_96 = arith.constant 1 : index
    %c15_97 = arith.constant 15 : index
    %c2_98 = arith.constant 2 : index
    %79 = vector.load %arg4[%c1_96, %c15_97, %c2_98] : memref<2x20x20xf32, #tpu.memory_space<vmem>>, vector<1x1x16xf32>
    tpu.vector_store %arg4[%c1_96, %c15_97, %c2_98], %78 {strides = array<i32>} : memref<2x20x20xf32, #tpu.memory_space<vmem>>, vector<1x1x16xf32>,
    %80 = vector.extract_strided_slice %9 {offsets = [0, 0, 224], sizes = [1, 1, 16], strides = [1, 1, 1]} : vector<1x1x256xf32> to vector<1x1x16xf32>
    %c1_99 = arith.constant 1 : index
    %c16_100 = arith.constant 16 : index
    %c2_101 = arith.constant 2 : index
    %81 = vector.load %arg4[%c1_99, %c16_100, %c2_101] : memref<2x20x20xf32, #tpu.memory_space<vmem>>, vector<1x1x16xf32>
    tpu.vector_store %arg4[%c1_99, %c16_100, %c2_101], %80 {strides = array<i32>} : memref<2x20x20xf32, #tpu.memory_space<vmem>>, vector<1x1x16xf32>,
    %82 = vector.extract_strided_slice %9 {offsets = [0, 0, 240], sizes = [1, 1, 16], strides = [1, 1, 1]} : vector<1x1x256xf32> to vector<1x1x16xf32>
    %c1_102 = arith.constant 1 : index
    %c17_103 = arith.constant 17 : index
    %c2_104 = arith.constant 2 : index
    %83 = vector.load %arg4[%c1_102, %c17_103, %c2_104] : memref<2x20x20xf32, #tpu.memory_space<vmem>>, vector<1x1x16xf32>
    tpu.vector_store %arg4[%c1_102, %c17_103, %c2_104], %82 {strides = array<i32>} : memref<2x20x20xf32, #tpu.memory_space<vmem>>, vector<1x1x16xf32>,
    %c0_105 = arith.constant 0 : index
    %c0_106 = arith.constant 0 : index
    %c0_107 = arith.constant 0 : index
    %84 = vector.load %arg4[%c0_105, %c0_106, %c0_107] : memref<2x20x20xf32, #tpu.memory_space<vmem>>, vector<1x20x16xf32>
    %c0_108 = arith.constant 0 : index
    %c0_109 = arith.constant 0 : index
    %c1_110 = arith.constant 1 : index
    %85 = vector.load %arg4[%c0_108, %c0_109, %c1_110] : memref<2x20x20xf32, #tpu.memory_space<vmem>>, vector<1x20x16xf32>
    %c0_111 = arith.constant 0 : index
    %c0_112 = arith.constant 0 : index
    %c2_113 = arith.constant 2 : index
    %86 = vector.load %arg4[%c0_111, %c0_112, %c2_113] : memref<2x20x20xf32, #tpu.memory_space<vmem>>, vector<1x20x16xf32>
    %c0_114 = arith.constant 0 : index
    %c0_115 = arith.constant 0 : index
    %c3_116 = arith.constant 3 : index
    %87 = vector.load %arg4[%c0_114, %c0_115, %c3_116] : memref<2x20x20xf32, #tpu.memory_space<vmem>>, vector<1x20x16xf32>
    %c0_117 = arith.constant 0 : index
    %c0_118 = arith.constant 0 : index
    %c4_119 = arith.constant 4 : index
    %88 = vector.load %arg4[%c0_117, %c0_118, %c4_119] : memref<2x20x20xf32, #tpu.memory_space<vmem>>, vector<1x20x16xf32>
    %c1_120 = arith.constant 1 : index
    %c0_121 = arith.constant 0 : index
    %c0_122 = arith.constant 0 : index
    %89 = vector.load %arg4[%c1_120, %c0_121, %c0_122] : memref<2x20x20xf32, #tpu.memory_space<vmem>>, vector<1x20x16xf32>
    %c1_123 = arith.constant 1 : index
    %c0_124 = arith.constant 0 : index
    %c1_125 = arith.constant 1 : index
    %90 = vector.load %arg4[%c1_123, %c0_124, %c1_125] : memref<2x20x20xf32, #tpu.memory_space<vmem>>, vector<1x20x16xf32>
    %c1_126 = arith.constant 1 : index
    %c0_127 = arith.constant 0 : index
    %c2_128 = arith.constant 2 : index
    %91 = vector.load %arg4[%c1_126, %c0_127, %c2_128] : memref<2x20x20xf32, #tpu.memory_space<vmem>>, vector<1x20x16xf32>
    %c1_129 = arith.constant 1 : index
    %c0_130 = arith.constant 0 : index
    %c3_131 = arith.constant 3 : index
    %92 = vector.load %arg4[%c1_129, %c0_130, %c3_131] : memref<2x20x20xf32, #tpu.memory_space<vmem>>, vector<1x20x16xf32>
    %c1_132 = arith.constant 1 : index
    %c0_133 = arith.constant 0 : index
    %c4_134 = arith.constant 4 : index
    %93 = vector.load %arg4[%c1_132, %c0_133, %c4_134] : memref<2x20x20xf32, #tpu.memory_space<vmem>>, vector<1x20x16xf32>
    %cst_135 = arith.constant 0.000000e+00 : f32
    %94 = vector.broadcast %cst_135 : f32 to vector<1x16x16xf32>
    %c0_136 = arith.constant 0 : index
    %95 = memref.load %arg1[%c0_136] : memref<73xf32, #tpu.memory_space<smem>>
    %96 = vector.extract_strided_slice %85 {offsets = [0, 1, 0], sizes = [1, 16, 16], strides = [1, 1, 1]} : vector<1x20x16xf32> to vector<1x16x16xf32>
    %97 = vector.broadcast %95 : f32 to vector<1x16x16xf32>
    %98 = arith.mulf %97, %96 : vector<1x16x16xf32>
    %99 = arith.addf %94, %98 : vector<1x16x16xf32>
    %c3_137 = arith.constant 3 : index
    %100 = memref.load %arg1[%c3_137] : memref<73xf32, #tpu.memory_space<smem>>
    %101 = vector.extract_strided_slice %85 {offsets = [0, 2, 0], sizes = [1, 16, 16], strides = [1, 1, 1]} : vector<1x20x16xf32> to vector<1x16x16xf32>
    %102 = vector.broadcast %100 : f32 to vector<1x16x16xf32>
    %103 = arith.mulf %102, %101 : vector<1x16x16xf32>
    %104 = arith.addf %99, %103 : vector<1x16x16xf32>
    %c6_138 = arith.constant 6 : index
    %105 = memref.load %arg1[%c6_138] : memref<73xf32, #tpu.memory_space<smem>>
    %106 = vector.extract_strided_slice %85 {offsets = [0, 3, 0], sizes = [1, 16, 16], strides = [1, 1, 1]} : vector<1x20x16xf32> to vector<1x16x16xf32>
    %107 = vector.broadcast %105 : f32 to vector<1x16x16xf32>
    %108 = arith.mulf %107, %106 : vector<1x16x16xf32>
    %109 = arith.addf %104, %108 : vector<1x16x16xf32>
    %c1_139 = arith.constant 1 : index
    %110 = memref.load %arg1[%c1_139] : memref<73xf32, #tpu.memory_space<smem>>
    %111 = vector.extract_strided_slice %86 {offsets = [0, 1, 0], sizes = [1, 16, 16], strides = [1, 1, 1]} : vector<1x20x16xf32> to vector<1x16x16xf32>
    %112 = vector.broadcast %110 : f32 to vector<1x16x16xf32>
    %113 = arith.mulf %112, %111 : vector<1x16x16xf32>
    %114 = arith.addf %109, %113 : vector<1x16x16xf32>
    %c4_140 = arith.constant 4 : index
    %115 = memref.load %arg1[%c4_140] : memref<73xf32, #tpu.memory_space<smem>>
    %116 = vector.extract_strided_slice %86 {offsets = [0, 2, 0], sizes = [1, 16, 16], strides = [1, 1, 1]} : vector<1x20x16xf32> to vector<1x16x16xf32>
    %117 = vector.broadcast %115 : f32 to vector<1x16x16xf32>
    %118 = arith.mulf %117, %116 : vector<1x16x16xf32>
    %119 = arith.addf %114, %118 : vector<1x16x16xf32>
    %c7_141 = arith.constant 7 : index
    %120 = memref.load %arg1[%c7_141] : memref<73xf32, #tpu.memory_space<smem>>
    %121 = vector.extract_strided_slice %86 {offsets = [0, 3, 0], sizes = [1, 16, 16], strides = [1, 1, 1]} : vector<1x20x16xf32> to vector<1x16x16xf32>
    %122 = vector.broadcast %120 : f32 to vector<1x16x16xf32>
    %123 = arith.mulf %122, %121 : vector<1x16x16xf32>
    %124 = arith.addf %119, %123 : vector<1x16x16xf32>
    %c2_142 = arith.constant 2 : index
    %125 = memref.load %arg1[%c2_142] : memref<73xf32, #tpu.memory_space<smem>>
    %126 = vector.extract_strided_slice %87 {offsets = [0, 1, 0], sizes = [1, 16, 16], strides = [1, 1, 1]} : vector<1x20x16xf32> to vector<1x16x16xf32>
    %127 = vector.broadcast %125 : f32 to vector<1x16x16xf32>
    %128 = arith.mulf %127, %126 : vector<1x16x16xf32>
    %129 = arith.addf %124, %128 : vector<1x16x16xf32>
    %c5_143 = arith.constant 5 : index
    %130 = memref.load %arg1[%c5_143] : memref<73xf32, #tpu.memory_space<smem>>
    %131 = vector.extract_strided_slice %87 {offsets = [0, 2, 0], sizes = [1, 16, 16], strides = [1, 1, 1]} : vector<1x20x16xf32> to vector<1x16x16xf32>
    %132 = vector.broadcast %130 : f32 to vector<1x16x16xf32>
    %133 = arith.mulf %132, %131 : vector<1x16x16xf32>
    %134 = arith.addf %129, %133 : vector<1x16x16xf32>
    %c8_144 = arith.constant 8 : index
    %135 = memref.load %arg1[%c8_144] : memref<73xf32, #tpu.memory_space<smem>>
    %136 = vector.extract_strided_slice %87 {offsets = [0, 3, 0], sizes = [1, 16, 16], strides = [1, 1, 1]} : vector<1x20x16xf32> to vector<1x16x16xf32>
    %137 = vector.broadcast %135 : f32 to vector<1x16x16xf32>
    %138 = arith.mulf %137, %136 : vector<1x16x16xf32>
    %139 = arith.addf %134, %138 : vector<1x16x16xf32>
    %c9_145 = arith.constant 9 : index
    %140 = memref.load %arg1[%c9_145] : memref<73xf32, #tpu.memory_space<smem>>
    %141 = vector.extract_strided_slice %90 {offsets = [0, 1, 0], sizes = [1, 16, 16], strides = [1, 1, 1]} : vector<1x20x16xf32> to vector<1x16x16xf32>
    %142 = vector.broadcast %140 : f32 to vector<1x16x16xf32>
    %143 = arith.mulf %142, %141 : vector<1x16x16xf32>
    %144 = arith.addf %139, %143 : vector<1x16x16xf32>
    %c12_146 = arith.constant 12 : index
    %145 = memref.load %arg1[%c12_146] : memref<73xf32, #tpu.memory_space<smem>>
    %146 = vector.extract_strided_slice %90 {offsets = [0, 2, 0], sizes = [1, 16, 16], strides = [1, 1, 1]} : vector<1x20x16xf32> to vector<1x16x16xf32>
    %147 = vector.broadcast %145 : f32 to vector<1x16x16xf32>
    %148 = arith.mulf %147, %146 : vector<1x16x16xf32>
    %149 = arith.addf %144, %148 : vector<1x16x16xf32>
    %c15_147 = arith.constant 15 : index
    %150 = memref.load %arg1[%c15_147] : memref<73xf32, #tpu.memory_space<smem>>
    %151 = vector.extract_strided_slice %90 {offsets = [0, 3, 0], sizes = [1, 16, 16], strides = [1, 1, 1]} : vector<1x20x16xf32> to vector<1x16x16xf32>
    %152 = vector.broadcast %150 : f32 to vector<1x16x16xf32>
    %153 = arith.mulf %152, %151 : vector<1x16x16xf32>
    %154 = arith.addf %149, %153 : vector<1x16x16xf32>
    %c10_148 = arith.constant 10 : index
    %155 = memref.load %arg1[%c10_148] : memref<73xf32, #tpu.memory_space<smem>>
    %156 = vector.extract_strided_slice %91 {offsets = [0, 1, 0], sizes = [1, 16, 16], strides = [1, 1, 1]} : vector<1x20x16xf32> to vector<1x16x16xf32>
    %157 = vector.broadcast %155 : f32 to vector<1x16x16xf32>
    %158 = arith.mulf %157, %156 : vector<1x16x16xf32>
    %159 = arith.addf %154, %158 : vector<1x16x16xf32>
    %c13_149 = arith.constant 13 : index
    %160 = memref.load %arg1[%c13_149] : memref<73xf32, #tpu.memory_space<smem>>
    %161 = vector.extract_strided_slice %91 {offsets = [0, 2, 0], sizes = [1, 16, 16], strides = [1, 1, 1]} : vector<1x20x16xf32> to vector<1x16x16xf32>
    %162 = vector.broadcast %160 : f32 to vector<1x16x16xf32>
    %163 = arith.mulf %162, %161 : vector<1x16x16xf32>
    %164 = arith.addf %159, %163 : vector<1x16x16xf32>
    %c16_150 = arith.constant 16 : index
    %165 = memref.load %arg1[%c16_150] : memref<73xf32, #tpu.memory_space<smem>>
    %166 = vector.extract_strided_slice %91 {offsets = [0, 3, 0], sizes = [1, 16, 16], strides = [1, 1, 1]} : vector<1x20x16xf32> to vector<1x16x16xf32>
    %167 = vector.broadcast %165 : f32 to vector<1x16x16xf32>
    %168 = arith.mulf %167, %166 : vector<1x16x16xf32>
    %169 = arith.addf %164, %168 : vector<1x16x16xf32>
    %c11_151 = arith.constant 11 : index
    %170 = memref.load %arg1[%c11_151] : memref<73xf32, #tpu.memory_space<smem>>
    %171 = vector.extract_strided_slice %92 {offsets = [0, 1, 0], sizes = [1, 16, 16], strides = [1, 1, 1]} : vector<1x20x16xf32> to vector<1x16x16xf32>
    %172 = vector.broadcast %170 : f32 to vector<1x16x16xf32>
    %173 = arith.mulf %172, %171 : vector<1x16x16xf32>
    %174 = arith.addf %169, %173 : vector<1x16x16xf32>
    %c14_152 = arith.constant 14 : index
    %175 = memref.load %arg1[%c14_152] : memref<73xf32, #tpu.memory_space<smem>>
    %176 = vector.extract_strided_slice %92 {offsets = [0, 2, 0], sizes = [1, 16, 16], strides = [1, 1, 1]} : vector<1x20x16xf32> to vector<1x16x16xf32>
    %177 = vector.broadcast %175 : f32 to vector<1x16x16xf32>
    %178 = arith.mulf %177, %176 : vector<1x16x16xf32>
    %179 = arith.addf %174, %178 : vector<1x16x16xf32>
    %c17_153 = arith.constant 17 : index
    %180 = memref.load %arg1[%c17_153] : memref<73xf32, #tpu.memory_space<smem>>
    %181 = vector.extract_strided_slice %92 {offsets = [0, 3, 0], sizes = [1, 16, 16], strides = [1, 1, 1]} : vector<1x20x16xf32> to vector<1x16x16xf32>
    %182 = vector.broadcast %180 : f32 to vector<1x16x16xf32>
    %183 = arith.mulf %182, %181 : vector<1x16x16xf32>
    %184 = arith.addf %179, %183 : vector<1x16x16xf32>
    %c18_154 = arith.constant 18 : index
    %185 = memref.load %arg1[%c18_154] : memref<73xf32, #tpu.memory_space<smem>>
    %186 = vector.broadcast %185 : f32 to vector<1x16x16xf32>
    %187 = arith.addf %184, %186 : vector<1x16x16xf32>
    %cst_155 = arith.constant 0.000000e+00 : f32
    %188 = vector.broadcast %cst_155 : f32 to vector<1x16x16xf32>
    %c19 = arith.constant 19 : index
    %189 = memref.load %arg1[%c19] : memref<73xf32, #tpu.memory_space<smem>>
    %190 = vector.extract_strided_slice %84 {offsets = [0, 0, 0], sizes = [1, 16, 16], strides = [1, 1, 1]} : vector<1x20x16xf32> to vector<1x16x16xf32>
    %191 = vector.broadcast %189 : f32 to vector<1x16x16xf32>
    %192 = arith.mulf %191, %190 : vector<1x16x16xf32>
    %193 = arith.addf %188, %192 : vector<1x16x16xf32>
    %c24 = arith.constant 24 : index
    %194 = memref.load %arg1[%c24] : memref<73xf32, #tpu.memory_space<smem>>
    %195 = vector.extract_strided_slice %84 {offsets = [0, 1, 0], sizes = [1, 16, 16], strides = [1, 1, 1]} : vector<1x20x16xf32> to vector<1x16x16xf32>
    %196 = vector.broadcast %194 : f32 to vector<1x16x16xf32>
    %197 = arith.mulf %196, %195 : vector<1x16x16xf32>
    %198 = arith.addf %193, %197 : vector<1x16x16xf32>
    %c29 = arith.constant 29 : index
    %199 = memref.load %arg1[%c29] : memref<73xf32, #tpu.memory_space<smem>>
    %200 = vector.extract_strided_slice %84 {offsets = [0, 2, 0], sizes = [1, 16, 16], strides = [1, 1, 1]} : vector<1x20x16xf32> to vector<1x16x16xf32>
    %201 = vector.broadcast %199 : f32 to vector<1x16x16xf32>
    %202 = arith.mulf %201, %200 : vector<1x16x16xf32>
    %203 = arith.addf %198, %202 : vector<1x16x16xf32>
    %c34 = arith.constant 34 : index
    %204 = memref.load %arg1[%c34] : memref<73xf32, #tpu.memory_space<smem>>
    %205 = vector.extract_strided_slice %84 {offsets = [0, 3, 0], sizes = [1, 16, 16], strides = [1, 1, 1]} : vector<1x20x16xf32> to vector<1x16x16xf32>
    %206 = vector.broadcast %204 : f32 to vector<1x16x16xf32>
    %207 = arith.mulf %206, %205 : vector<1x16x16xf32>
    %208 = arith.addf %203, %207 : vector<1x16x16xf32>
    %c39 = arith.constant 39 : index
    %209 = memref.load %arg1[%c39] : memref<73xf32, #tpu.memory_space<smem>>
    %210 = vector.extract_strided_slice %84 {offsets = [0, 4, 0], sizes = [1, 16, 16], strides = [1, 1, 1]} : vector<1x20x16xf32> to vector<1x16x16xf32>
    %211 = vector.broadcast %209 : f32 to vector<1x16x16xf32>
    %212 = arith.mulf %211, %210 : vector<1x16x16xf32>
    %213 = arith.addf %208, %212 : vector<1x16x16xf32>
    %c20 = arith.constant 20 : index
    %214 = memref.load %arg1[%c20] : memref<73xf32, #tpu.memory_space<smem>>
    %215 = vector.extract_strided_slice %85 {offsets = [0, 0, 0], sizes = [1, 16, 16], strides = [1, 1, 1]} : vector<1x20x16xf32> to vector<1x16x16xf32>
    %216 = vector.broadcast %214 : f32 to vector<1x16x16xf32>
    %217 = arith.mulf %216, %215 : vector<1x16x16xf32>
    %218 = arith.addf %213, %217 : vector<1x16x16xf32>
    %c25 = arith.constant 25 : index
    %219 = memref.load %arg1[%c25] : memref<73xf32, #tpu.memory_space<smem>>
    %220 = vector.extract_strided_slice %85 {offsets = [0, 1, 0], sizes = [1, 16, 16], strides = [1, 1, 1]} : vector<1x20x16xf32> to vector<1x16x16xf32>
    %221 = vector.broadcast %219 : f32 to vector<1x16x16xf32>
    %222 = arith.mulf %221, %220 : vector<1x16x16xf32>
    %223 = arith.addf %218, %222 : vector<1x16x16xf32>
    %c30 = arith.constant 30 : index
    %224 = memref.load %arg1[%c30] : memref<73xf32, #tpu.memory_space<smem>>
    %225 = vector.extract_strided_slice %85 {offsets = [0, 2, 0], sizes = [1, 16, 16], strides = [1, 1, 1]} : vector<1x20x16xf32> to vector<1x16x16xf32>
    %226 = vector.broadcast %224 : f32 to vector<1x16x16xf32>
    %227 = arith.mulf %226, %225 : vector<1x16x16xf32>
    %228 = arith.addf %223, %227 : vector<1x16x16xf32>
    %c35 = arith.constant 35 : index
    %229 = memref.load %arg1[%c35] : memref<73xf32, #tpu.memory_space<smem>>
    %230 = vector.extract_strided_slice %85 {offsets = [0, 3, 0], sizes = [1, 16, 16], strides = [1, 1, 1]} : vector<1x20x16xf32> to vector<1x16x16xf32>
    %231 = vector.broadcast %229 : f32 to vector<1x16x16xf32>
    %232 = arith.mulf %231, %230 : vector<1x16x16xf32>
    %233 = arith.addf %228, %232 : vector<1x16x16xf32>
    %c40 = arith.constant 40 : index
    %234 = memref.load %arg1[%c40] : memref<73xf32, #tpu.memory_space<smem>>
    %235 = vector.extract_strided_slice %85 {offsets = [0, 4, 0], sizes = [1, 16, 16], strides = [1, 1, 1]} : vector<1x20x16xf32> to vector<1x16x16xf32>
    %236 = vector.broadcast %234 : f32 to vector<1x16x16xf32>
    %237 = arith.mulf %236, %235 : vector<1x16x16xf32>
    %238 = arith.addf %233, %237 : vector<1x16x16xf32>
    %c21 = arith.constant 21 : index
    %239 = memref.load %arg1[%c21] : memref<73xf32, #tpu.memory_space<smem>>
    %240 = vector.extract_strided_slice %86 {offsets = [0, 0, 0], sizes = [1, 16, 16], strides = [1, 1, 1]} : vector<1x20x16xf32> to vector<1x16x16xf32>
    %241 = vector.broadcast %239 : f32 to vector<1x16x16xf32>
    %242 = arith.mulf %241, %240 : vector<1x16x16xf32>
    %243 = arith.addf %238, %242 : vector<1x16x16xf32>
    %c26 = arith.constant 26 : index
    %244 = memref.load %arg1[%c26] : memref<73xf32, #tpu.memory_space<smem>>
    %245 = vector.extract_strided_slice %86 {offsets = [0, 1, 0], sizes = [1, 16, 16], strides = [1, 1, 1]} : vector<1x20x16xf32> to vector<1x16x16xf32>
    %246 = vector.broadcast %244 : f32 to vector<1x16x16xf32>
    %247 = arith.mulf %246, %245 : vector<1x16x16xf32>
    %248 = arith.addf %243, %247 : vector<1x16x16xf32>
    %c31 = arith.constant 31 : index
    %249 = memref.load %arg1[%c31] : memref<73xf32, #tpu.memory_space<smem>>
    %250 = vector.extract_strided_slice %86 {offsets = [0, 2, 0], sizes = [1, 16, 16], strides = [1, 1, 1]} : vector<1x20x16xf32> to vector<1x16x16xf32>
    %251 = vector.broadcast %249 : f32 to vector<1x16x16xf32>
    %252 = arith.mulf %251, %250 : vector<1x16x16xf32>
    %253 = arith.addf %248, %252 : vector<1x16x16xf32>
    %c36 = arith.constant 36 : index
    %254 = memref.load %arg1[%c36] : memref<73xf32, #tpu.memory_space<smem>>
    %255 = vector.extract_strided_slice %86 {offsets = [0, 3, 0], sizes = [1, 16, 16], strides = [1, 1, 1]} : vector<1x20x16xf32> to vector<1x16x16xf32>
    %256 = vector.broadcast %254 : f32 to vector<1x16x16xf32>
    %257 = arith.mulf %256, %255 : vector<1x16x16xf32>
    %258 = arith.addf %253, %257 : vector<1x16x16xf32>
    %c41 = arith.constant 41 : index
    %259 = memref.load %arg1[%c41] : memref<73xf32, #tpu.memory_space<smem>>
    %260 = vector.extract_strided_slice %86 {offsets = [0, 4, 0], sizes = [1, 16, 16], strides = [1, 1, 1]} : vector<1x20x16xf32> to vector<1x16x16xf32>
    %261 = vector.broadcast %259 : f32 to vector<1x16x16xf32>
    %262 = arith.mulf %261, %260 : vector<1x16x16xf32>
    %263 = arith.addf %258, %262 : vector<1x16x16xf32>
    %c22 = arith.constant 22 : index
    %264 = memref.load %arg1[%c22] : memref<73xf32, #tpu.memory_space<smem>>
    %265 = vector.extract_strided_slice %87 {offsets = [0, 0, 0], sizes = [1, 16, 16], strides = [1, 1, 1]} : vector<1x20x16xf32> to vector<1x16x16xf32>
    %266 = vector.broadcast %264 : f32 to vector<1x16x16xf32>
    %267 = arith.mulf %266, %265 : vector<1x16x16xf32>
    %268 = arith.addf %263, %267 : vector<1x16x16xf32>
    %c27 = arith.constant 27 : index
    %269 = memref.load %arg1[%c27] : memref<73xf32, #tpu.memory_space<smem>>
    %270 = vector.extract_strided_slice %87 {offsets = [0, 1, 0], sizes = [1, 16, 16], strides = [1, 1, 1]} : vector<1x20x16xf32> to vector<1x16x16xf32>
    %271 = vector.broadcast %269 : f32 to vector<1x16x16xf32>
    %272 = arith.mulf %271, %270 : vector<1x16x16xf32>
    %273 = arith.addf %268, %272 : vector<1x16x16xf32>
    %c32 = arith.constant 32 : index
    %274 = memref.load %arg1[%c32] : memref<73xf32, #tpu.memory_space<smem>>
    %275 = vector.extract_strided_slice %87 {offsets = [0, 2, 0], sizes = [1, 16, 16], strides = [1, 1, 1]} : vector<1x20x16xf32> to vector<1x16x16xf32>
    %276 = vector.broadcast %274 : f32 to vector<1x16x16xf32>
    %277 = arith.mulf %276, %275 : vector<1x16x16xf32>
    %278 = arith.addf %273, %277 : vector<1x16x16xf32>
    %c37 = arith.constant 37 : index
    %279 = memref.load %arg1[%c37] : memref<73xf32, #tpu.memory_space<smem>>
    %280 = vector.extract_strided_slice %87 {offsets = [0, 3, 0], sizes = [1, 16, 16], strides = [1, 1, 1]} : vector<1x20x16xf32> to vector<1x16x16xf32>
    %281 = vector.broadcast %279 : f32 to vector<1x16x16xf32>
    %282 = arith.mulf %281, %280 : vector<1x16x16xf32>
    %283 = arith.addf %278, %282 : vector<1x16x16xf32>
    %c42 = arith.constant 42 : index
    %284 = memref.load %arg1[%c42] : memref<73xf32, #tpu.memory_space<smem>>
    %285 = vector.extract_strided_slice %87 {offsets = [0, 4, 0], sizes = [1, 16, 16], strides = [1, 1, 1]} : vector<1x20x16xf32> to vector<1x16x16xf32>
    %286 = vector.broadcast %284 : f32 to vector<1x16x16xf32>
    %287 = arith.mulf %286, %285 : vector<1x16x16xf32>
    %288 = arith.addf %283, %287 : vector<1x16x16xf32>
    %c23 = arith.constant 23 : index
    %289 = memref.load %arg1[%c23] : memref<73xf32, #tpu.memory_space<smem>>
    %290 = vector.extract_strided_slice %88 {offsets = [0, 0, 0], sizes = [1, 16, 16], strides = [1, 1, 1]} : vector<1x20x16xf32> to vector<1x16x16xf32>
    %291 = vector.broadcast %289 : f32 to vector<1x16x16xf32>
    %292 = arith.mulf %291, %290 : vector<1x16x16xf32>
    %293 = arith.addf %288, %292 : vector<1x16x16xf32>
    %c28 = arith.constant 28 : index
    %294 = memref.load %arg1[%c28] : memref<73xf32, #tpu.memory_space<smem>>
    %295 = vector.extract_strided_slice %88 {offsets = [0, 1, 0], sizes = [1, 16, 16], strides = [1, 1, 1]} : vector<1x20x16xf32> to vector<1x16x16xf32>
    %296 = vector.broadcast %294 : f32 to vector<1x16x16xf32>
    %297 = arith.mulf %296, %295 : vector<1x16x16xf32>
    %298 = arith.addf %293, %297 : vector<1x16x16xf32>
    %c33 = arith.constant 33 : index
    %299 = memref.load %arg1[%c33] : memref<73xf32, #tpu.memory_space<smem>>
    %300 = vector.extract_strided_slice %88 {offsets = [0, 2, 0], sizes = [1, 16, 16], strides = [1, 1, 1]} : vector<1x20x16xf32> to vector<1x16x16xf32>
    %301 = vector.broadcast %299 : f32 to vector<1x16x16xf32>
    %302 = arith.mulf %301, %300 : vector<1x16x16xf32>
    %303 = arith.addf %298, %302 : vector<1x16x16xf32>
    %c38 = arith.constant 38 : index
    %304 = memref.load %arg1[%c38] : memref<73xf32, #tpu.memory_space<smem>>
    %305 = vector.extract_strided_slice %88 {offsets = [0, 3, 0], sizes = [1, 16, 16], strides = [1, 1, 1]} : vector<1x20x16xf32> to vector<1x16x16xf32>
    %306 = vector.broadcast %304 : f32 to vector<1x16x16xf32>
    %307 = arith.mulf %306, %305 : vector<1x16x16xf32>
    %308 = arith.addf %303, %307 : vector<1x16x16xf32>
    %c43 = arith.constant 43 : index
    %309 = memref.load %arg1[%c43] : memref<73xf32, #tpu.memory_space<smem>>
    %310 = vector.extract_strided_slice %88 {offsets = [0, 4, 0], sizes = [1, 16, 16], strides = [1, 1, 1]} : vector<1x20x16xf32> to vector<1x16x16xf32>
    %311 = vector.broadcast %309 : f32 to vector<1x16x16xf32>
    %312 = arith.mulf %311, %310 : vector<1x16x16xf32>
    %313 = arith.addf %308, %312 : vector<1x16x16xf32>
    %c44 = arith.constant 44 : index
    %314 = memref.load %arg1[%c44] : memref<73xf32, #tpu.memory_space<smem>>
    %315 = vector.extract_strided_slice %89 {offsets = [0, 0, 0], sizes = [1, 16, 16], strides = [1, 1, 1]} : vector<1x20x16xf32> to vector<1x16x16xf32>
    %316 = vector.broadcast %314 : f32 to vector<1x16x16xf32>
    %317 = arith.mulf %316, %315 : vector<1x16x16xf32>
    %318 = arith.addf %313, %317 : vector<1x16x16xf32>
    %c49 = arith.constant 49 : index
    %319 = memref.load %arg1[%c49] : memref<73xf32, #tpu.memory_space<smem>>
    %320 = vector.extract_strided_slice %89 {offsets = [0, 1, 0], sizes = [1, 16, 16], strides = [1, 1, 1]} : vector<1x20x16xf32> to vector<1x16x16xf32>
    %321 = vector.broadcast %319 : f32 to vector<1x16x16xf32>
    %322 = arith.mulf %321, %320 : vector<1x16x16xf32>
    %323 = arith.addf %318, %322 : vector<1x16x16xf32>
    %c54 = arith.constant 54 : index
    %324 = memref.load %arg1[%c54] : memref<73xf32, #tpu.memory_space<smem>>
    %325 = vector.extract_strided_slice %89 {offsets = [0, 2, 0], sizes = [1, 16, 16], strides = [1, 1, 1]} : vector<1x20x16xf32> to vector<1x16x16xf32>
    %326 = vector.broadcast %324 : f32 to vector<1x16x16xf32>
    %327 = arith.mulf %326, %325 : vector<1x16x16xf32>
    %328 = arith.addf %323, %327 : vector<1x16x16xf32>
    %c59 = arith.constant 59 : index
    %329 = memref.load %arg1[%c59] : memref<73xf32, #tpu.memory_space<smem>>
    %330 = vector.extract_strided_slice %89 {offsets = [0, 3, 0], sizes = [1, 16, 16], strides = [1, 1, 1]} : vector<1x20x16xf32> to vector<1x16x16xf32>
    %331 = vector.broadcast %329 : f32 to vector<1x16x16xf32>
    %332 = arith.mulf %331, %330 : vector<1x16x16xf32>
    %333 = arith.addf %328, %332 : vector<1x16x16xf32>
    %c64 = arith.constant 64 : index
    %334 = memref.load %arg1[%c64] : memref<73xf32, #tpu.memory_space<smem>>
    %335 = vector.extract_strided_slice %89 {offsets = [0, 4, 0], sizes = [1, 16, 16], strides = [1, 1, 1]} : vector<1x20x16xf32> to vector<1x16x16xf32>
    %336 = vector.broadcast %334 : f32 to vector<1x16x16xf32>
    %337 = arith.mulf %336, %335 : vector<1x16x16xf32>
    %338 = arith.addf %333, %337 : vector<1x16x16xf32>
    %c45 = arith.constant 45 : index
    %339 = memref.load %arg1[%c45] : memref<73xf32, #tpu.memory_space<smem>>
    %340 = vector.extract_strided_slice %90 {offsets = [0, 0, 0], sizes = [1, 16, 16], strides = [1, 1, 1]} : vector<1x20x16xf32> to vector<1x16x16xf32>
    %341 = vector.broadcast %339 : f32 to vector<1x16x16xf32>
    %342 = arith.mulf %341, %340 : vector<1x16x16xf32>
    %343 = arith.addf %338, %342 : vector<1x16x16xf32>
    %c50 = arith.constant 50 : index
    %344 = memref.load %arg1[%c50] : memref<73xf32, #tpu.memory_space<smem>>
    %345 = vector.extract_strided_slice %90 {offsets = [0, 1, 0], sizes = [1, 16, 16], strides = [1, 1, 1]} : vector<1x20x16xf32> to vector<1x16x16xf32>
    %346 = vector.broadcast %344 : f32 to vector<1x16x16xf32>
    %347 = arith.mulf %346, %345 : vector<1x16x16xf32>
    %348 = arith.addf %343, %347 : vector<1x16x16xf32>
    %c55 = arith.constant 55 : index
    %349 = memref.load %arg1[%c55] : memref<73xf32, #tpu.memory_space<smem>>
    %350 = vector.extract_strided_slice %90 {offsets = [0, 2, 0], sizes = [1, 16, 16], strides = [1, 1, 1]} : vector<1x20x16xf32> to vector<1x16x16xf32>
    %351 = vector.broadcast %349 : f32 to vector<1x16x16xf32>
    %352 = arith.mulf %351, %350 : vector<1x16x16xf32>
    %353 = arith.addf %348, %352 : vector<1x16x16xf32>
    %c60 = arith.constant 60 : index
    %354 = memref.load %arg1[%c60] : memref<73xf32, #tpu.memory_space<smem>>
    %355 = vector.extract_strided_slice %90 {offsets = [0, 3, 0], sizes = [1, 16, 16], strides = [1, 1, 1]} : vector<1x20x16xf32> to vector<1x16x16xf32>
    %356 = vector.broadcast %354 : f32 to vector<1x16x16xf32>
    %357 = arith.mulf %356, %355 : vector<1x16x16xf32>
    %358 = arith.addf %353, %357 : vector<1x16x16xf32>
    %c65 = arith.constant 65 : index
    %359 = memref.load %arg1[%c65] : memref<73xf32, #tpu.memory_space<smem>>
    %360 = vector.extract_strided_slice %90 {offsets = [0, 4, 0], sizes = [1, 16, 16], strides = [1, 1, 1]} : vector<1x20x16xf32> to vector<1x16x16xf32>
    %361 = vector.broadcast %359 : f32 to vector<1x16x16xf32>
    %362 = arith.mulf %361, %360 : vector<1x16x16xf32>
    %363 = arith.addf %358, %362 : vector<1x16x16xf32>
    %c46 = arith.constant 46 : index
    %364 = memref.load %arg1[%c46] : memref<73xf32, #tpu.memory_space<smem>>
    %365 = vector.extract_strided_slice %91 {offsets = [0, 0, 0], sizes = [1, 16, 16], strides = [1, 1, 1]} : vector<1x20x16xf32> to vector<1x16x16xf32>
    %366 = vector.broadcast %364 : f32 to vector<1x16x16xf32>
    %367 = arith.mulf %366, %365 : vector<1x16x16xf32>
    %368 = arith.addf %363, %367 : vector<1x16x16xf32>
    %c51 = arith.constant 51 : index
    %369 = memref.load %arg1[%c51] : memref<73xf32, #tpu.memory_space<smem>>
    %370 = vector.extract_strided_slice %91 {offsets = [0, 1, 0], sizes = [1, 16, 16], strides = [1, 1, 1]} : vector<1x20x16xf32> to vector<1x16x16xf32>
    %371 = vector.broadcast %369 : f32 to vector<1x16x16xf32>
    %372 = arith.mulf %371, %370 : vector<1x16x16xf32>
    %373 = arith.addf %368, %372 : vector<1x16x16xf32>
    %c56 = arith.constant 56 : index
    %374 = memref.load %arg1[%c56] : memref<73xf32, #tpu.memory_space<smem>>
    %375 = vector.extract_strided_slice %91 {offsets = [0, 2, 0], sizes = [1, 16, 16], strides = [1, 1, 1]} : vector<1x20x16xf32> to vector<1x16x16xf32>
    %376 = vector.broadcast %374 : f32 to vector<1x16x16xf32>
    %377 = arith.mulf %376, %375 : vector<1x16x16xf32>
    %378 = arith.addf %373, %377 : vector<1x16x16xf32>
    %c61 = arith.constant 61 : index
    %379 = memref.load %arg1[%c61] : memref<73xf32, #tpu.memory_space<smem>>
    %380 = vector.extract_strided_slice %91 {offsets = [0, 3, 0], sizes = [1, 16, 16], strides = [1, 1, 1]} : vector<1x20x16xf32> to vector<1x16x16xf32>
    %381 = vector.broadcast %379 : f32 to vector<1x16x16xf32>
    %382 = arith.mulf %381, %380 : vector<1x16x16xf32>
    %383 = arith.addf %378, %382 : vector<1x16x16xf32>
    %c66 = arith.constant 66 : index
    %384 = memref.load %arg1[%c66] : memref<73xf32, #tpu.memory_space<smem>>
    %385 = vector.extract_strided_slice %91 {offsets = [0, 4, 0], sizes = [1, 16, 16], strides = [1, 1, 1]} : vector<1x20x16xf32> to vector<1x16x16xf32>
    %386 = vector.broadcast %384 : f32 to vector<1x16x16xf32>
    %387 = arith.mulf %386, %385 : vector<1x16x16xf32>
    %388 = arith.addf %383, %387 : vector<1x16x16xf32>
    %c47 = arith.constant 47 : index
    %389 = memref.load %arg1[%c47] : memref<73xf32, #tpu.memory_space<smem>>
    %390 = vector.extract_strided_slice %92 {offsets = [0, 0, 0], sizes = [1, 16, 16], strides = [1, 1, 1]} : vector<1x20x16xf32> to vector<1x16x16xf32>
    %391 = vector.broadcast %389 : f32 to vector<1x16x16xf32>
    %392 = arith.mulf %391, %390 : vector<1x16x16xf32>
    %393 = arith.addf %388, %392 : vector<1x16x16xf32>
    %c52 = arith.constant 52 : index
    %394 = memref.load %arg1[%c52] : memref<73xf32, #tpu.memory_space<smem>>
    %395 = vector.extract_strided_slice %92 {offsets = [0, 1, 0], sizes = [1, 16, 16], strides = [1, 1, 1]} : vector<1x20x16xf32> to vector<1x16x16xf32>
    %396 = vector.broadcast %394 : f32 to vector<1x16x16xf32>
    %397 = arith.mulf %396, %395 : vector<1x16x16xf32>
    %398 = arith.addf %393, %397 : vector<1x16x16xf32>
    %c57 = arith.constant 57 : index
    %399 = memref.load %arg1[%c57] : memref<73xf32, #tpu.memory_space<smem>>
    %400 = vector.extract_strided_slice %92 {offsets = [0, 2, 0], sizes = [1, 16, 16], strides = [1, 1, 1]} : vector<1x20x16xf32> to vector<1x16x16xf32>
    %401 = vector.broadcast %399 : f32 to vector<1x16x16xf32>
    %402 = arith.mulf %401, %400 : vector<1x16x16xf32>
    %403 = arith.addf %398, %402 : vector<1x16x16xf32>
    %c62 = arith.constant 62 : index
    %404 = memref.load %arg1[%c62] : memref<73xf32, #tpu.memory_space<smem>>
    %405 = vector.extract_strided_slice %92 {offsets = [0, 3, 0], sizes = [1, 16, 16], strides = [1, 1, 1]} : vector<1x20x16xf32> to vector<1x16x16xf32>
    %406 = vector.broadcast %404 : f32 to vector<1x16x16xf32>
    %407 = arith.mulf %406, %405 : vector<1x16x16xf32>
    %408 = arith.addf %403, %407 : vector<1x16x16xf32>
    %c67 = arith.constant 67 : index
    %409 = memref.load %arg1[%c67] : memref<73xf32, #tpu.memory_space<smem>>
    %410 = vector.extract_strided_slice %92 {offsets = [0, 4, 0], sizes = [1, 16, 16], strides = [1, 1, 1]} : vector<1x20x16xf32> to vector<1x16x16xf32>
    %411 = vector.broadcast %409 : f32 to vector<1x16x16xf32>
    %412 = arith.mulf %411, %410 : vector<1x16x16xf32>
    %413 = arith.addf %408, %412 : vector<1x16x16xf32>
    %c48 = arith.constant 48 : index
    %414 = memref.load %arg1[%c48] : memref<73xf32, #tpu.memory_space<smem>>
    %415 = vector.extract_strided_slice %93 {offsets = [0, 0, 0], sizes = [1, 16, 16], strides = [1, 1, 1]} : vector<1x20x16xf32> to vector<1x16x16xf32>
    %416 = vector.broadcast %414 : f32 to vector<1x16x16xf32>
    %417 = arith.mulf %416, %415 : vector<1x16x16xf32>
    %418 = arith.addf %413, %417 : vector<1x16x16xf32>
    %c53 = arith.constant 53 : index
    %419 = memref.load %arg1[%c53] : memref<73xf32, #tpu.memory_space<smem>>
    %420 = vector.extract_strided_slice %93 {offsets = [0, 1, 0], sizes = [1, 16, 16], strides = [1, 1, 1]} : vector<1x20x16xf32> to vector<1x16x16xf32>
    %421 = vector.broadcast %419 : f32 to vector<1x16x16xf32>
    %422 = arith.mulf %421, %420 : vector<1x16x16xf32>
    %423 = arith.addf %418, %422 : vector<1x16x16xf32>
    %c58 = arith.constant 58 : index
    %424 = memref.load %arg1[%c58] : memref<73xf32, #tpu.memory_space<smem>>
    %425 = vector.extract_strided_slice %93 {offsets = [0, 2, 0], sizes = [1, 16, 16], strides = [1, 1, 1]} : vector<1x20x16xf32> to vector<1x16x16xf32>
    %426 = vector.broadcast %424 : f32 to vector<1x16x16xf32>
    %427 = arith.mulf %426, %425 : vector<1x16x16xf32>
    %428 = arith.addf %423, %427 : vector<1x16x16xf32>
    %c63 = arith.constant 63 : index
    %429 = memref.load %arg1[%c63] : memref<73xf32, #tpu.memory_space<smem>>
    %430 = vector.extract_strided_slice %93 {offsets = [0, 3, 0], sizes = [1, 16, 16], strides = [1, 1, 1]} : vector<1x20x16xf32> to vector<1x16x16xf32>
    %431 = vector.broadcast %429 : f32 to vector<1x16x16xf32>
    %432 = arith.mulf %431, %430 : vector<1x16x16xf32>
    %433 = arith.addf %428, %432 : vector<1x16x16xf32>
    %c68 = arith.constant 68 : index
    %434 = memref.load %arg1[%c68] : memref<73xf32, #tpu.memory_space<smem>>
    %435 = vector.extract_strided_slice %93 {offsets = [0, 4, 0], sizes = [1, 16, 16], strides = [1, 1, 1]} : vector<1x20x16xf32> to vector<1x16x16xf32>
    %436 = vector.broadcast %434 : f32 to vector<1x16x16xf32>
    %437 = arith.mulf %436, %435 : vector<1x16x16xf32>
    %438 = arith.addf %433, %437 : vector<1x16x16xf32>
    %c69 = arith.constant 69 : index
    %439 = memref.load %arg1[%c69] : memref<73xf32, #tpu.memory_space<smem>>
    %440 = vector.broadcast %439 : f32 to vector<1x16x16xf32>
    %441 = arith.addf %438, %440 : vector<1x16x16xf32>
    %cst_156 = arith.constant 0.000000e+00 : f32
    %442 = vector.broadcast %cst_156 : f32 to vector<1x16x16xf32>
    %c70 = arith.constant 70 : index
    %443 = memref.load %arg1[%c70] : memref<73xf32, #tpu.memory_space<smem>>
    %444 = arith.negf %187 : vector<1x16x16xf32>
    %445 = math.exp %444 : vector<1x16x16xf32>
    %cst_157 = arith.constant 1.000000e+00 : f32
    %446 = vector.broadcast %cst_157 : f32 to vector<1x16x16xf32>
    %447 = arith.addf %446, %445 : vector<1x16x16xf32>
    %448 = arith.divf %446, %447 : vector<1x16x16xf32>
    %449 = vector.broadcast %443 : f32 to vector<1x16x16xf32>
    %450 = arith.mulf %449, %448 : vector<1x16x16xf32>
    %451 = arith.addf %442, %450 : vector<1x16x16xf32>
    %c71 = arith.constant 71 : index
    %452 = memref.load %arg1[%c71] : memref<73xf32, #tpu.memory_space<smem>>
    %453 = arith.negf %441 : vector<1x16x16xf32>
    %454 = math.exp %453 : vector<1x16x16xf32>
    %cst_158 = arith.constant 1.000000e+00 : f32
    %455 = vector.broadcast %cst_158 : f32 to vector<1x16x16xf32>
    %456 = arith.addf %455, %454 : vector<1x16x16xf32>
    %457 = arith.divf %455, %456 : vector<1x16x16xf32>
    %458 = vector.broadcast %452 : f32 to vector<1x16x16xf32>
    %459 = arith.mulf %458, %457 : vector<1x16x16xf32>
    %460 = arith.addf %451, %459 : vector<1x16x16xf32>
    %c72 = arith.constant 72 : index
    %461 = memref.load %arg1[%c72] : memref<73xf32, #tpu.memory_space<smem>>
    %462 = vector.broadcast %461 : f32 to vector<1x16x16xf32>
    %463 = arith.addf %460, %462 : vector<1x16x16xf32>
    %464 = vector.extract_strided_slice %463 {offsets = [0, 0, 0], sizes = [1, 1, 16], strides = [1, 1, 1]} : vector<1x16x16xf32> to vector<1x1x16xf32>
    %465 = vector.extract_strided_slice %463 {offsets = [0, 1, 0], sizes = [1, 1, 16], strides = [1, 1, 1]} : vector<1x16x16xf32> to vector<1x1x16xf32>
    %466 = vector.extract_strided_slice %463 {offsets = [0, 2, 0], sizes = [1, 1, 16], strides = [1, 1, 1]} : vector<1x16x16xf32> to vector<1x1x16xf32>
    %467 = vector.extract_strided_slice %463 {offsets = [0, 3, 0], sizes = [1, 1, 16], strides = [1, 1, 1]} : vector<1x16x16xf32> to vector<1x1x16xf32>
    %468 = vector.extract_strided_slice %463 {offsets = [0, 4, 0], sizes = [1, 1, 16], strides = [1, 1, 1]} : vector<1x16x16xf32> to vector<1x1x16xf32>
    %469 = vector.extract_strided_slice %463 {offsets = [0, 5, 0], sizes = [1, 1, 16], strides = [1, 1, 1]} : vector<1x16x16xf32> to vector<1x1x16xf32>
    %470 = vector.extract_strided_slice %463 {offsets = [0, 6, 0], sizes = [1, 1, 16], strides = [1, 1, 1]} : vector<1x16x16xf32> to vector<1x1x16xf32>
    %471 = vector.extract_strided_slice %463 {offsets = [0, 7, 0], sizes = [1, 1, 16], strides = [1, 1, 1]} : vector<1x16x16xf32> to vector<1x1x16xf32>
    %472 = vector.extract_strided_slice %463 {offsets = [0, 8, 0], sizes = [1, 1, 16], strides = [1, 1, 1]} : vector<1x16x16xf32> to vector<1x1x16xf32>
    %473 = vector.extract_strided_slice %463 {offsets = [0, 9, 0], sizes = [1, 1, 16], strides = [1, 1, 1]} : vector<1x16x16xf32> to vector<1x1x16xf32>
    %474 = vector.extract_strided_slice %463 {offsets = [0, 10, 0], sizes = [1, 1, 16], strides = [1, 1, 1]} : vector<1x16x16xf32> to vector<1x1x16xf32>
    %475 = vector.extract_strided_slice %463 {offsets = [0, 11, 0], sizes = [1, 1, 16], strides = [1, 1, 1]} : vector<1x16x16xf32> to vector<1x1x16xf32>
    %476 = vector.extract_strided_slice %463 {offsets = [0, 12, 0], sizes = [1, 1, 16], strides = [1, 1, 1]} : vector<1x16x16xf32> to vector<1x1x16xf32>
    %477 = vector.extract_strided_slice %463 {offsets = [0, 13, 0], sizes = [1, 1, 16], strides = [1, 1, 1]} : vector<1x16x16xf32> to vector<1x1x16xf32>
    %478 = vector.extract_strided_slice %463 {offsets = [0, 14, 0], sizes = [1, 1, 16], strides = [1, 1, 1]} : vector<1x16x16xf32> to vector<1x1x16xf32>
    %479 = vector.extract_strided_slice %463 {offsets = [0, 15, 0], sizes = [1, 1, 16], strides = [1, 1, 1]} : vector<1x16x16xf32> to vector<1x1x16xf32>
    %480 = tpu.concatenate %464, %465, %466, %467, %468, %469, %470, %471, %472, %473, %474, %475, %476, %477, %478, %479 in 2 : vector<1x1x16xf32>, vector<1x1x16xf32>, vector<1x1x16xf32>, vector<1x1x16xf32>, vector<1x1x16xf32>, vector<1x1x16xf32>, vector<1x1x16xf32>, vector<1x1x16xf32>, vector<1x1x16xf32>, vector<1x1x16xf32>, vector<1x1x16xf32>, vector<1x1x16xf32>, vector<1x1x16xf32>, vector<1x1x16xf32>, vector<1x1x16xf32>, vector<1x1x16xf32> -> vector<1x1x256xf32>
    %c0_159 = arith.constant 0 : index
    %c0_160 = arith.constant 0 : index
    %c0_161 = arith.constant 0 : index
    %481 = vector.load %arg2[%c0_159, %c0_160, %c0_161] : memref<1x4x256xf32, #tpu.memory_space<vmem>>, vector<1x4x256xf32>
    %482 = vector.broadcast %480 : vector<1x1x256xf32> to vector<1x4x256xf32>
    %483 = arith.mulf %481, %482 : vector<1x4x256xf32>
    %c0_162 = arith.constant 0 : index
    %c0_163 = arith.constant 0 : index
    %c0_164 = arith.constant 0 : index
    %484 = vector.load %arg3[%c0_162, %c0_163, %c0_164] : memref<1x4x256xf32, #tpu.memory_space<vmem>>, vector<1x4x256xf32>
    tpu.vector_store %arg3[%c0_162, %c0_163, %c0_164], %483 {strides = array<i32>} : memref<1x4x256xf32, #tpu.memory_space<vmem>>, vector<1x4x256xf32>,
    return
  }
  func.func @transform_0(%arg0: i32) -> i32 {
    %c0_i32 = arith.constant 0 : i32
    %c0_i32_0 = arith.constant 0 : i32
    return %c0_i32 : i32
  }
  func.func @transform_1(%arg0: i32) -> (i32, i32, i32) {
    %c0_i32 = arith.constant 0 : i32
    %c0_i32_0 = arith.constant 0 : i32
    %c0_i32_1 = arith.constant 0 : i32
    return %arg0, %c0_i32, %c0_i32_0 : i32, i32, i32
  }
  func.func @transform_2(%arg0: i32) -> (i32, i32, i32) {
    %c0_i32 = arith.constant 0 : i32
    %c0_i32_0 = arith.constant 0 : i32
    %c0_i32_1 = arith.constant 0 : i32
    return %arg0, %c0_i32, %c0_i32_0 : i32, i32, i32
  }
}

</mosaic_0001>

<bundles_post_ra>
// kernel: tpu_custom_call.1
= control target key start
LH: loop header
LB: loop body
LE: loop exit
PB: predicated region body
PF: predicated region fallthrough
CT: control target
= control target key end

     0   :  { %7 = vsyncpa [#allocation6], 0  ;;  %s3537_s0 = inlined_call_operand.hbm [shape: f32[73], index: 0, kind: input, shape index: {}]   ;;  %s3538_s1 = inlined_call_operand.hbm [shape: f32[2,4,256], index: 1, kind: input, shape index: {}]   ;;  %s3539_s2 = inlined_call_operand.hbm [shape: f32[2,4,256], index: 2, kind: output, shape index: {}]  }
   0x1   :  { %8 = vsyncpa [#allocation4], 0 }
   0x2   :  { %10 = vsyncpa [#allocation4 + $0x1], 0 }
   0x3   :  { %11 = vsyncpa [#allocation5], 0 }
   0x4   :  { %13 = vsyncpa [#allocation5 + $0x1], 0  ;;  %s2291_s9 = smov 0   ;;  %s2293_s10 = smov 0  }
   0x5   :  { %s2295_s11 = smov 0   ;;  %s2297_s12 = smov 0  }
   0x6 LB: > { %s2312_s13 = sadd.s32 4294967295, %s2250_s12   ;;  %s1941_s14 = sadd.s32 4294967294, %s2250_s12   ;;  %s2250_s12 = sphi %s2297_s12, %s3559_s12   ;;  %s2246_s11 = sphi %s2295_s11, %s3558_s11   ;;  %s2242_s10 = sphi %s2293_s10, %s3557_s10   ;;  %s2238_s9 = sphi %s2291_s9, %s3556_s9  }
   0x7   : > { %p60_p0 = scmp.ne.s32.totalorder %s2242_s10, %s2238_s9  ;;  %p3540_p1 = scmp.eq.s32.totalorder %s2312_s13, 0 }
   0x8   : > { %p84_p2 = scmp.eq.s32.totalorder %s2312_s13, 1  ;;  %p90_p3 = scmp.eq.s32.totalorder %s1941_s14, 1 }
   0x9   : > { %p2321_p4 = por %p3540_p1, %p60_p0  ;;  %p1942_p5 = scmp.ge.s32.totalorder %s2250_s12, 1 }
   0xa   : > { %p2326_p6 = por %p90_p3, %p60_p0  ;;  %p97_p7 = scmp.lt.s32.totalorder %s2250_s12, 3 }
   0xb   : > { %s3544_s15 = scalar_select %p2321_p4, 1, 0 }
   0xc   : > { %s3545_s16 = scalar_select %p2326_p6, 1, 0 }
   0xd   : > { %p2331_p8 = pnand %p1942_p5, %p97_p7  ;;  %s2337_s18 = sadd.s32 1, %s2250_s12  }
   0xe   : > { %s44_s19 = ssub.s32 %s2250_s12, %s2337_s18  ;;  %s47_s20 = sadd.s32 1, %s2246_s11 }
   0xf   : > { %s3546_s17 = scalar_select %p2331_p8, 1, 0 }
  0x10   : > { %p2047_p10 = pneg %p2331_p8  ;;  %p45_p12 = scmp.eq.s32.totalorder %s44_s19, 0 }
  0x11   : > { %p54_p13 = scmp.ne.s32.totalorder %s2246_s11, %s2242_s10  ;;  %p55_p0 = scmp.eq.s32.totalorder %s2250_s12, 0 }
  0x12   : > { %p2048_p11 = pnand %p2047_p10, %p3540_p1  ;;  %p2060_p3 = scmp.lt.s32.totalorder %s2250_s12, 2 }
  0x13   : > { %s2252_s21 = smov [#allocation3]   ;;  %p56_p5 = por %p55_p0, %p54_p13 }
  0x14   : > { %2050 = dma.hbm_to_smem (!%p2048_p11), %s3537_s0, 16, %s2252_s21, [#allocation6]  }
  0x15   : > { %s2354_s24 = scalar_select %p45_p12, %s2246_s11, %s47_s20  }
  0x16   : > { %p2358_p7 = por %p84_p2, %p54_p13  ;;  %s119_s26 = sand.u32 1, %s2246_s11  }
  0x17   : > { %s2037_s27 = sshll.u32 %s2250_s12, 7  ;;  %s1945_s28 = sshll.u32 %s119_s26, 3 }
  0x18   : > { %s3547_s25 = scalar_select %p2358_p7, 1, 0 }
  0x19   : > { %s2367_s3 = scalar_lea.hbm %s3538_s1, %s2037_s27  ;;  %s123_s4 = scalar_lea.vmem [#allocation7], %s1945_s28 }
  0x1a   : > { %s131_s5 = sshll.u32 %s123_s4, 4  ;;  %p2369_p10 = pnand %p2060_p3, %p56_p5  ;;  %s132_s5 = int_to_ptr.vmem [resolvable:$true] %s131_s5 }
  0x1b   : > { %s120_s7 = scalar_lea.sflag [#allocation4], %s119_s26  ;;  %s2154_s8 = scalar_lea.hbm %s2367_s3, 128 }
  0x1c   : > { %p2155_p2 = scmp.ne.s32.totalorder %s2367_s3, %s2154_s8  ;;  %p2156_p11 = pneg %p2369_p10 }
  0x1d   : > { %s2159_s20 = scalar_lea.hbm %s3538_s1, 256  ;;  %p2160_p0 = scmp.lt.s32.totalorder %s2367_s3, %s3538_s1 }
  0x1e   : > { %p2157_p12 = pnand %p2156_p11, %p2155_p2  ;;  %p2161_p3 = scmp.lt.s32.totalorder %s2159_s20, %s2154_s8 }
  0x20   : > { %p2158_p13 = pneg %p2157_p12  ;;  %p2162_p5 = por %p2161_p3, %p2160_p0 }
  0x22   : > { %p2163_p9 = pnand %p2162_p5, %p2158_p13 }
  0x24   : > { %2166 = shalt.err (!%p2163_p9)
}
  0x25   : > { %s2167_s23 = scalar_lea.vmem %s132_s5, 128  ;;  %s2253_s26 = smov [#allocation7]  }
  0x26   : > { %p2168_p1 = scmp.ne.s32.totalorder %s132_s5, %s2167_s23  ;;  %s2172_s27 = sshll.u32 %s2253_s26, 4  ;;  %s2173_s27 = int_to_ptr.vmem [resolvable:$false] %s2172_s27 }
  0x27   : > { %s2174_s28 = scalar_lea.vmem %s2173_s27, 256  ;;  %p2175_p2 = scmp.lt.s32.totalorder %s132_s5, %s2173_s27 }
  0x28   : > { %p2170_p6 = pnand %p2168_p1, %p2156_p11  ;;  %p2176_p12 = scmp.lt.s32.totalorder %s2174_s28, %s2167_s23 }
  0x2a   : > { %p2171_p7 = pneg %p2170_p6  ;;  %p2177_p4 = por %p2176_p12, %p2175_p2 }
  0x2c   : > { %p2178_p8 = pnand %p2177_p4, %p2171_p7 }
  0x2e   : > { %2181 = shalt.err (!%p2178_p8)
}
  0x2f   : > { %2054 = dma.hbm_to_vmem [thread:$0]  (!%p2369_p10), %s2367_s3, 128, %s132_s5, %s120_s7  }
  0x30   : > { %p3549_p13 = scmp.ne.s32.totalorder %s3546_s17, 0 }
  0x31   : > { %p3550_p9 = scmp.eq.s32.totalorder (!%p3549_p13), %s2312_s13, 0 }
  0x32   : > { %140 = sbr.rel (%p3549_p13) target bundleno = 814 (0x32e), region = 28 }
  0x37   : > { %2225 = dma.done.wait (%p3550_p9), [#allocation6], 16   ;;  %p3551_p1 = pmov %p3550_p9 }
  0x38   : > { %s2394_s29 = sand.u32 1, %s2242_s10   ;;  %p3552_p4 = scmp.ne.s32.totalorder %s3544_s15, 0 }
  0x39   : > { %2227 = vsyncadd (%p3551_p1), [#allocation6], 4294967280  ;;  %s1950_s30 = sshll.u32 %s2394_s29, 3  ;;  %s147_s4 = scalar_lea.sflag [#allocation4], %s2394_s29 }
  0x3a   : > { %s2400_s3 = scalar_lea.vmem [#allocation7], %s1950_s30 }
  0x3b   : > { %2229 = dma.done.wait (%p3552_p4), %s147_s4, 128  }
  0x3c   : > { %2231 = vsyncadd (%p3552_p4), %s147_s4, 4294967168 }
  0x3d   : > { %155 = sfence }
  0x3e   : > { %v172_v0 = vld [vmem:[%s2400_s3] ss:$4 sm:$0x3]  ;;  %v1952_v1 = vld [vmem:[%s2400_s3 + $0x1] ss:$4 sm:$0x3]  ;;  %v208_v2 = vlaneseq }
  0x3f   : > { %v175_v3 = vadd.f32 %v1952_v1, %v172_v0  ;;  %v1953_v4 = vld [vmem:[%s2400_s3 + $0x2] ss:$4 sm:$0x3]  ;;  %v1954_v5 = vld [vmem:[%s2400_s3 + $0x3] ss:$4 sm:$0x3]  ;;  %v176_v15 = vmax.f32 %v172_v0, %v1952_v1 }
  0x40   : > { %v209_v6 = vshrl.u32 %v208_v2, 7  ;;  %vm186_vm0 = vcmask 156672   ;;  %vm191_vm1 = vcmask 15360   ;;  %v2254_v8 = vmov 0.0   ;;  %s2255_s15 = smov 98   ;;  %s2256_s17 = smov 2  }
  0x41   : > { %v179_v7 = vadd.f32 %v1953_v4, %v175_v3  ;;  %187 = vst.msk [vmem:[#allocation2] sm:$0x3] %vm186_vm0, %v2254_v8  ;;  %vm199_vm2 = vcmask 162960   ;;  %188 = vst.msk [vmem:[#allocation2 + $0x18] sm:$0x3] %vm186_vm0, %v2254_v8  ;;  %s2257_s5 = smov 82   ;;  %v180_v16 = vmax.f32 %v176_v15, %v1953_v4 }
  0x42   : > { %189 = vst.msk [vmem:[#allocation2 + $0x12] sm:$0x3] %vm186_vm0, %v2254_v8  ;;  %190 = vst.msk [vmem:[#allocation2 + $0x2a] sm:$0x3] %vm186_vm0, %v2254_v8  ;;  %v210_v10 = vsub.s32 0, %v209_v6  ;;  %s2258_s6 = smov 114  }
  0x43   : > { %193 = vst.msk [vmem:[#allocation2 + $0x8] sm:$0xff] %vm191_vm1, %v2254_v8  ;;  %197 = vst.msk [vmem:[#allocation2 + $0x20] sm:$0xff] %vm191_vm1, %v2254_v8  ;;  %v183_v9 = vadd.f32 %v1954_v5, %v179_v7  ;;  %v2414_v13 = vsub.s32 1, %v209_v6  ;;  %s2259_s7 = smov 50   ;;  %s2260_s8 = smov 66   ;;  %vm194_vm3 = vcmask 11264   ;;  %v184_v17 = vmax.f32 %v180_v16, %v1954_v5 }
  0x44   : > { %192 = vst.msk [vmem:[#allocation2] sm:$0xff] %vm191_vm1, %v2254_v8  ;;  %196 = vst.msk [vmem:[#allocation2 + $0x18] sm:$0xff] %vm191_vm1, %v2254_v8  ;;  %s2261_s14 = smov 18   ;;  %s2262_s19 = smov 34   ;;  %vm202_vm4 = vcmask 158864   ;;  %vm215_vm5 = vcmask 139280  }
  0x45   : > { %201 = vst.msk [vmem:[#allocation2 + $0x8] sm:$0xff] %vm199_vm2, %v2254_v8  ;;  %205 = vst.msk [vmem:[#allocation2 + $0x20] sm:$0xff] %vm199_vm2, %v2254_v8  ;;  %v185_v11 = vmul.f32 0.25, %v183_v9  ;;  %v285_v18 = vrot.slane %v184_v17, %v210_v10  ;;  %v322_v19 = vrot.slane %v184_v17, %v2414_v13  ;;  %s2450_s20 = sld [smem:[#allocation3 + $0x14]]  ;;  %s2263_s26 = smov 127   ;;  %vm377_vm6 = vcmask 1046528  }
  0x46   : > { %200 = vst.msk [vmem:[#allocation2] sm:$0xff] %vm199_vm2, %v2254_v8  ;;  %204 = vst.msk [vmem:[#allocation2 + $0x18] sm:$0xff] %vm199_vm2, %v2254_v8  ;;  %s2454_s21 = sld [smem:[#allocation3 + $0x15]]  ;;  %s2264_s28 = smov 126   ;;  %vm397_vm7 = vcmask 1045504   ;;  %vm788_vm8 = vcmask 1044480  }
  0x47   : > { %v211_v12 = vrot.slane %v185_v11, %v210_v10  ;;  %v248_v14 = vrot.slane %v185_v11, %v2414_v13  ;;  %195 = vst.msk [vmem:[#allocation2 + $0x10] sm:$0xf] %vm194_vm3, %v2254_v8  ;;  %198 = vst.msk [vmem:[#allocation2 + $0x28] sm:$0xf] %vm194_vm3, %v2254_v8  ;;  %s2459_s22 = sld [smem:[#allocation3 + $0x16]]  ;;  %vm806_vm9 = vcmask 1043456  }
  0x48   : > { %203 = vst.msk [vmem:[#allocation2 + $0x10] sm:$0xf] %vm202_vm4, %v2254_v8  ;;  %206 = vst.msk [vmem:[#allocation2 + $0x28] sm:$0xf] %vm202_vm4, %v2254_v8  ;;  %s2467_s23 = sld [smem:[#allocation3 + $0x17]]  ;;  %vm1722_vm10 = vcmask 1040384  }
  0x49   : > { %221 = vrot.lane.b32.xlu1 %v211_v12, %s2255_s15  ;;  %212 = vrot.lane.b32.xlu0 %v211_v12, %s2256_s17  ;;  %s1979_s27 = sld [smem:[#allocation3 + $0x19]]  ;;  %vm1808_vm11 = vcmask 130048   ;;  %vm1810_vm12 = vcmask 261120   ;;  %vm1812_vm13 = vcmask 392192   ;;  %vm1814_vm14 = vcmask 523264   ;;  %p3553_p8 = scmp.ne.s32.totalorder %s3547_s25, 0 }
  0x4a   : > { %s1980_s4 = sld [smem:[#allocation3 + $0x1e]]  ;;  %vm1816_vm15 = vcmask 654336   ;;  %vm1818_vm0 = vcmask 785408   ;;  %vm1820_vm1 = vcmask 916480  }
  0x4b   : > { %v817_v28 = vstv %s2450_s20  ;;  %s2569_s20 = sld [smem:[#allocation3 + $0x1b]] }
  0x4c   : > { %v915_v33 = vstv %s2454_s21  ;;  %s2588_s21 = sld [smem:[#allocation3 + $0x20]] }
  0x4d   : > { %225 = vrot.lane.b32.xlu1 %v211_v12, %s2257_s5  ;;  %217 = vrot.lane.b32.xlu0 %v211_v12, %s2258_s6  ;;  %v1013_v37 = vstv %s2459_s22  ;;  %s1991_s22 = sld [smem:[#allocation3 + $0x25]] }
  0x4e   : > { %v1111_v41 = vstv %s2467_s23  ;;  %s1992_s23 = sld [smem:[#allocation3 + $0x2a]] }
  0x4f   : > { %v831_v44 = vstv %s1979_s27  ;;  %s1994_s27 = sld [smem:[#allocation3 + $0x1c]] }
  0x50   : > { %v852_v48 = vstv %s1980_s4  ;;  %s1995_s4 = sld [smem:[#allocation3 + $0x21]] }
  0x51   : > { %233 = vrot.lane.b32.xlu1 %v211_v12, %s2259_s7  ;;  %229 = vrot.lane.b32.xlu0 %v211_v12, %s2260_s8 }
  0x55   : > { %241 = vrot.lane.b32.xlu1 %v211_v12, %s2261_s14  ;;  %237 = vrot.lane.b32.xlu0 %v211_v12, %s2262_s19 }
  0x59   : > { %253 = vrot.lane.b32.xlu1 %v248_v14, %s2258_s6  ;;  %249 = vrot.lane.b32.xlu0 %v248_v14, %s2256_s17 }
  0x5d   : > { %261 = vrot.lane.b32.xlu1 %v248_v14, %s2257_s5  ;;  %257 = vrot.lane.b32.xlu0 %v248_v14, %s2255_s15 }
  0x61   : > { %269 = vrot.lane.b32.xlu1 %v248_v14, %s2259_s7  ;;  %265 = vrot.lane.b32.xlu0 %v248_v14, %s2260_s8 }
  0x65   : > { %277 = vrot.lane.b32.xlu1 %v248_v14, %s2261_s14  ;;  %273 = vrot.lane.b32.xlu0 %v248_v14, %s2262_s19 }
  0x69   : > { %291 = vrot.lane.b32.xlu1 %v285_v18, %s2258_s6  ;;  %286 = vrot.lane.b32.xlu0 %v285_v18, %s2256_s17 }
  0x6d   : > { %299 = vrot.lane.b32.xlu1 %v285_v18, %s2257_s5  ;;  %295 = vrot.lane.b32.xlu0 %v285_v18, %s2255_s15 }
  0x71   : > { %307 = vrot.lane.b32.xlu1 %v285_v18, %s2259_s7  ;;  %303 = vrot.lane.b32.xlu0 %v285_v18, %s2260_s8 }
  0x75   : > { %315 = vrot.lane.b32.xlu1 %v285_v18, %s2261_s14  ;;  %311 = vrot.lane.b32.xlu0 %v285_v18, %s2262_s19 }
  0x79   : > { %327 = vrot.lane.b32.xlu1 %v322_v19, %s2258_s6  ;;  %323 = vrot.lane.b32.xlu0 %v322_v19, %s2256_s17  ;;  %s1981_s17 = sld [smem:[#allocation3 + $0x23]] }
  0x7a   : > { %s1982_s6 = sld [smem:[#allocation3 + $0x28]] }
  0x7d   : > { %335 = vrot.lane.b32.xlu1 %v322_v19, %s2257_s5  ;;  %331 = vrot.lane.b32.xlu0 %v322_v19, %s2255_s15  ;;  %s2265_s15 = smov 125   ;;  %s2266_s5 = smov 124  }
  0x7f   : > { %v873_v57 = vstv %s1981_s17  ;;  %s1996_s17 = sld [smem:[#allocation3 + $0x26]] }
  0x80   : > { %v894_v3 = vstv %s1982_s6  ;;  %s1997_s6 = sld [smem:[#allocation3 + $0x2b]] }
  0x81   : > { %343 = vrot.lane.b32.xlu1 %v322_v19, %s2259_s7  ;;  %339 = vrot.lane.b32.xlu0 %v322_v19, %s2260_s8  ;;  %s2501_s7 = sld [smem:[#allocation3 + $0x1a]] }
  0x82   : > { %s2516_s8 = sld [smem:[#allocation3 + $0x1f]] }
  0x85   : > { %351 = vrot.lane.b32.xlu1 %v322_v19, %s2261_s14  ;;  %347 = vrot.lane.b32.xlu0 %v322_v19, %s2262_s19  ;;  %s2533_s14 = sld [smem:[#allocation3 + $0x24]] }
  0x86   : > { %s2552_s19 = sld [smem:[#allocation3 + $0x29]] }
  0x87   : > { %v929_v14 = vstv %s2501_s7  ;;  %s2004_s7 = sld [smem:[#allocation3 + $0x32]] }
  0xbb   : > { %v222_v20 = vpop.permute.xlu1 %221  ;;  %v213_v21 = vpop.permute.xlu0 %212 }
  0xbc   : > { %224 = vst.msk [vmem:[#allocation2 + $0x4] sm:$0x1] %vm215_vm5, %v222_v20  ;;  %216 = vst.msk [vmem:[#allocation2 + $0x2] sm:$0x1] %vm215_vm5, %v213_v21 }
  0xbf   : > { %v226_v22 = vpop.permute.xlu1 %225  ;;  %v218_v23 = vpop.permute.xlu0 %217 }
  0xc0   : > { %228 = vst.msk [vmem:[#allocation2 + $0x5] sm:$0x1] %vm215_vm5, %v226_v22  ;;  %220 = vst.msk [vmem:[#allocation2 + $0x3] sm:$0x1] %vm215_vm5, %v218_v23 }
  0xc3   : > { %v234_v24 = vpop.permute.xlu1 %233  ;;  %v230_v25 = vpop.permute.xlu0 %229 }
  0xc4   : > { %236 = vst.msk [vmem:[#allocation2 + $0x7] sm:$0x1] %vm215_vm5, %v234_v24  ;;  %232 = vst.msk [vmem:[#allocation2 + $0x6] sm:$0x1] %vm215_vm5, %v230_v25  ;;  %v950_v25 = vstv %s2516_s8  ;;  %s2687_s8 = sld [smem:[#allocation3 + $0x2d]] }
  0xc7   : > { %v242_v26 = vpop.permute.xlu1 %241  ;;  %v238_v27 = vpop.permute.xlu0 %237 }
  0xc8   : > { %244 = vst.msk [vmem:[#allocation2 + $0x9] sm:$0x1] %vm215_vm5, %v242_v26  ;;  %240 = vst.msk [vmem:[#allocation2 + $0x8] sm:$0x1] %vm215_vm5, %v238_v27 }
  0xcb   : > { %v2461_v29 = vld [vmem:[#allocation2] sm:$0xff]  ;;  %v254_v30 = vpop.permute.xlu1 %253  ;;  %v250_v31 = vpop.permute.xlu0 %249 }
  0xcc   : > { %256 = vst.msk [vmem:[#allocation2 + $0xb] sm:$0x1] %vm215_vm5, %v254_v30  ;;  %252 = vst.msk [vmem:[#allocation2 + $0xa] sm:$0x1] %vm215_vm5, %v250_v31  ;;  %v818_v32 = vmul.f32 %v817_v28, %v2461_v29  ;;  %v916_v36 = vmul.f32 %v915_v33, %v2461_v29  ;;  %v1014_v40 = vmul.f32 %v1013_v37, %v2461_v29 }
  0xcd   : > { %v1112_v45 = vmul.f32 %v1111_v41, %v2461_v29  ;;  %v832_v46 = vmul.f32 %v831_v44, %v2461_v29  ;;  %v853_v56 = vmul.f32 %v852_v48, %v2461_v29  ;;  %v874_v2 = vmul.f32 %v873_v57, %v2461_v29 }
  0xce   : > { %822 = vrot.lane.b32.xlu0 %v818_v32, %s2263_s26  ;;  %v895_v12 = vmul.f32 %v894_v3, %v2461_v29  ;;  %v930_v24 = vmul.f32 %v929_v14, %v2461_v29 }
  0xcf   : > { %v262_v34 = vpop.permute.xlu1 %261  ;;  %v258_v35 = vpop.permute.xlu0 %257  ;;  %v838_v54 = vrot.slane %v832_v46, 1  ;;  %v859_v1 = vrot.slane %v853_v56, 2  ;;  %v880_v11 = vrot.slane %v874_v2, 3 }
  0xd0   : > { %264 = vst.msk [vmem:[#allocation2 + $0xd] sm:$0x1] %vm215_vm5, %v262_v34  ;;  %260 = vst.msk [vmem:[#allocation2 + $0xc] sm:$0x1] %vm215_vm5, %v258_v35  ;;  %v901_v23 = vrot.slane %v895_v12, 4  ;;  %v936_v35 = vrot.slane %v930_v24, 1 }
  0xd2   : > { %920 = vrot.lane.b32.xlu0 %v916_v36, %s2264_s28  ;;  %v951_v36 = vmul.f32 %v950_v25, %v2461_v29 }
  0xd3   : > { %v270_v38 = vpop.permute.xlu1 %269  ;;  %v266_v39 = vpop.permute.xlu0 %265 }
  0xd4   : > { %272 = vst.msk [vmem:[#allocation2 + $0xf] sm:$0x1] %vm215_vm5, %v270_v38  ;;  %268 = vst.msk [vmem:[#allocation2 + $0xe] sm:$0x1] %vm215_vm5, %v266_v39  ;;  %v957_v46 = vrot.slane %v951_v36, 2 }
  0xd6   : > { %1018 = vrot.lane.b32.xlu0 %v1014_v40, %s2265_s15 }
  0xd7   : > { %v278_v42 = vpop.permute.xlu1 %277  ;;  %v274_v43 = vpop.permute.xlu0 %273 }
  0xd8   : > { %280 = vst.msk [vmem:[#allocation2 + $0x11] sm:$0x1] %vm215_vm5, %v278_v42  ;;  %276 = vst.msk [vmem:[#allocation2 + $0x10] sm:$0x1] %vm215_vm5, %v274_v43 }
  0xda   : > { %1116 = vrot.lane.b32.xlu0 %v1112_v45, %s2266_s5 }
  0xdb   : > { %v2487_v47 = vld [vmem:[#allocation2 + $0x8] sm:$0xff]  ;;  %v292_v49 = vpop.permute.xlu1 %291  ;;  %v287_v50 = vpop.permute.xlu0 %286 }
  0xdc   : > { %v819_v51 = vmul.f32 %v817_v28, %v2487_v47  ;;  %v2491_v52 = vmul.f32 %v831_v44, %v2487_v47  ;;  %v2494_v53 = vmul.f32 %v852_v48, %v2487_v47  ;;  %294 = vst.msk [vmem:[#allocation2 + $0x1b] sm:$0x1] %vm215_vm5, %v292_v49  ;;  %290 = vst.msk [vmem:[#allocation2 + $0x1a] sm:$0x1] %vm215_vm5, %v287_v50  ;;  %v992_v49 = vstv %s2552_s19  ;;  %s2006_s19 = sld [smem:[#allocation3 + $0x3c]] }
  0xdd   : > { %v917_v61 = vmul.f32 %v915_v33, %v2487_v47  ;;  %v2507_v63 = vmul.f32 %v873_v57, %v2487_v47  ;;  %v1015_v7 = vmul.f32 %v1013_v37, %v2487_v47  ;;  %v2524_v9 = vmul.f32 %v894_v3, %v2487_v47 }
  0xde   : > { %824 = vrot.lane.b32.xlu1 %v819_v51, %s2263_s26  ;;  %v839_v55 = vrot.slane %v2491_v52, 1  ;;  %v860_v62 = vrot.slane %v2494_v53, 2  ;;  %v1113_v18 = vmul.f32 %v1111_v41, %v2487_v47  ;;  %v2543_v20 = vmul.f32 %v929_v14, %v2487_v47 }
  0xdf   : > { %v300_v58 = vpop.permute.xlu1 %299  ;;  %v296_v59 = vpop.permute.xlu0 %295  ;;  %v2512_v0 = vld [vmem:[#allocation2 + $0x10] sm:$0xf]  ;;  %v881_v8 = vrot.slane %v2507_v63, 3  ;;  %v902_v19 = vrot.slane %v2524_v9, 4  ;;  %v2559_v31 = vmul.f32 %v950_v25, %v2487_v47  ;;  %v971_v37 = vstv %s2533_s14  ;;  %s2005_s14 = sld [smem:[#allocation3 + $0x37]] }
  0xe0   : > { %v840_v60 = vsel %vm377_vm6, %v838_v54, %v839_v55  ;;  %302 = vst.msk [vmem:[#allocation2 + $0x1d] sm:$0x1] %vm215_vm5, %v300_v58  ;;  %298 = vst.msk [vmem:[#allocation2 + $0x1c] sm:$0x1] %vm215_vm5, %v296_v59  ;;  %v861_v6 = vsel %vm397_vm7, %v859_v1, %v860_v62  ;;  %v834_v10 = vmul.f32 %v831_v44, %v2512_v0  ;;  %v937_v30 = vrot.slane %v2543_v20, 1 }
  0xe1   : > { %843 = vrot.lane.b32.xlu0 %v840_v60, %s2263_s26  ;;  %v882_v17 = vsel %vm788_vm8, %v880_v11, %v881_v8  ;;  %v855_v22 = vmul.f32 %v852_v48, %v2512_v0  ;;  %v903_v28 = vsel %vm806_vm9, %v901_v23, %v902_v19  ;;  %v876_v34 = vmul.f32 %v873_v57, %v2512_v0 }
  0xe2   : > { %922 = vrot.lane.b32.xlu1 %v917_v61, %s2264_s28  ;;  %v841_v21 = vrot.slane %v834_v10, 1  ;;  %v938_v40 = vsel %vm377_vm6, %v936_v35, %v937_v30  ;;  %v958_v41 = vrot.slane %v2559_v31, 2  ;;  %v2576_v42 = vmul.f32 %v971_v37, %v2487_v47 }
  0xe3   : > { %v308_v4 = vpop.permute.xlu1 %307  ;;  %v304_v5 = vpop.permute.xlu0 %303  ;;  %v862_v33 = vrot.slane %v855_v22, 2  ;;  %v883_v44 = vrot.slane %v876_v34, 3  ;;  %v897_v45 = vmul.f32 %v894_v3, %v2512_v0  ;;  %v972_v48 = vmul.f32 %v971_v37, %v2461_v29 }
  0xe4   : > { %310 = vst.msk [vmem:[#allocation2 + $0x1f] sm:$0x1] %vm215_vm5, %v308_v4  ;;  %306 = vst.msk [vmem:[#allocation2 + $0x1e] sm:$0x1] %vm215_vm5, %v304_v5  ;;  %v842_v32 = vsel %vm377_vm6, %v839_v55, %v841_v21  ;;  %v959_v52 = vsel %vm397_vm7, %v957_v46, %v958_v41  ;;  %v979_v53 = vrot.slane %v2576_v42, 3  ;;  %v2593_v54 = vmul.f32 %v992_v49, %v2487_v47 }
  0xe5   : > { %864 = vrot.lane.b32.xlu0 %v861_v6, %s2263_s26  ;;  %v863_v43 = vsel %vm397_vm7, %v860_v62, %v862_v33  ;;  %v884_v55 = vsel %vm788_vm8, %v881_v8, %v883_v44  ;;  %v904_v56 = vrot.slane %v897_v45, 4  ;;  %v932_v57 = vmul.f32 %v929_v14, %v2512_v0 }
  0xe6   : > { %1020 = vrot.lane.b32.xlu1 %v1015_v7, %s2265_s15  ;;  %v978_v58 = vrot.slane %v972_v48, 3  ;;  %v993_v59 = vmul.f32 %v992_v49, %v2461_v29  ;;  %v1027_v60 = vstv %s2569_s20  ;;  %v1000_v2 = vrot.slane %v2593_v54, 4  ;;  %s2007_s20 = sld [smem:[#allocation3 + $0x41]] }
  0xe7   : > { %v316_v15 = vpop.permute.xlu1 %315  ;;  %v312_v16 = vpop.permute.xlu0 %311  ;;  %v2608_v63 = vmul.f32 %v1027_v60, %v2487_v47  ;;  %v905_v3 = vsel %vm806_vm9, %v902_v19, %v904_v56  ;;  %v939_v4 = vrot.slane %v932_v57, 1  ;;  %v953_v5 = vmul.f32 %v950_v25, %v2512_v0 }
  0xe8   : > { %318 = vst.msk [vmem:[#allocation2 + $0x21] sm:$0x1] %vm215_vm5, %v316_v15  ;;  %314 = vst.msk [vmem:[#allocation2 + $0x20] sm:$0x1] %vm215_vm5, %v312_v16  ;;  %v980_v1 = vsel %vm788_vm8, %v978_v58, %v979_v53  ;;  %v999_v6 = vrot.slane %v993_v59, 4  ;;  %v1028_v7 = vmul.f32 %v1027_v60, %v2461_v29  ;;  %v1048_v8 = vstv %s2588_s21  ;;  %s2009_s21 = sld [smem:[#allocation3 + $0x33]] }
  0xe9   : > { %885 = vrot.lane.b32.xlu0 %v882_v17, %s2263_s26  ;;  %v1035_v11 = vrot.slane %v2608_v63, 1  ;;  %v2623_v12 = vmul.f32 %v1048_v8, %v2487_v47  ;;  %v940_v9 = vsel %vm377_vm6, %v937_v30, %v939_v4  ;;  %v960_v14 = vrot.slane %v953_v5, 2 }
  0xea   : > { %1118 = vrot.lane.b32.xlu1 %v1113_v18, %s2266_s5  ;;  %v1001_v10 = vsel %vm806_vm9, %v999_v6, %v1000_v2  ;;  %v974_v15 = vmul.f32 %v971_v37, %v2512_v0  ;;  %v1034_v16 = vrot.slane %v1028_v7, 1  ;;  %v1049_v17 = vmul.f32 %v1048_v8, %v2461_v29 }
  0xeb   : > { %v328_v26 = vpop.permute.xlu1 %327  ;;  %v324_v27 = vpop.permute.xlu0 %323  ;;  %v1069_v18 = vstv %s1991_s22  ;;  %v1056_v21 = vrot.slane %v2623_v12, 2  ;;  %v961_v20 = vsel %vm397_vm7, %v958_v41, %v960_v14  ;;  %v995_v24 = vmul.f32 %v992_v49, %v2512_v0  ;;  %v2696_v14 = vld [vmem:[#allocation2 + $0x18] sm:$0xff]  ;;  %s2728_s22 = sld [smem:[#allocation3 + $0x2e]] }
  0xec   : > { %330 = vst.msk [vmem:[#allocation2 + $0x23] sm:$0x1] %vm215_vm5, %v328_v26  ;;  %326 = vst.msk [vmem:[#allocation2 + $0x22] sm:$0x1] %vm215_vm5, %v324_v27  ;;  %v1036_v19 = vsel %vm377_vm6, %v1034_v16, %v1035_v11  ;;  %v2635_v22 = vmul.f32 %v1069_v18, %v2487_v47  ;;  %v981_v23 = vrot.slane %v974_v15, 3  ;;  %v1055_v25 = vrot.slane %v1049_v17, 2 }
  0xed   : > { %906 = vrot.lane.b32.xlu0 %v903_v28, %s2263_s26  ;;  %v1070_v26 = vmul.f32 %v1069_v18, %v2461_v29  ;;  %v1090_v27 = vstv %s1992_s23  ;;  %v1002_v33 = vrot.slane %v995_v24, 4  ;;  %v1030_v34 = vmul.f32 %v1027_v60, %v2512_v0  ;;  %s2010_s23 = sld [smem:[#allocation3 + $0x38]] }
  0xee   : > { %845 = vrot.lane.b32.xlu1 %v842_v32, %s2263_s26  ;;  %v1057_v28 = vsel %vm397_vm7, %v1055_v25, %v1056_v21  ;;  %v1077_v30 = vrot.slane %v2635_v22, 3  ;;  %v2645_v31 = vmul.f32 %v1090_v27, %v2487_v47  ;;  %v982_v32 = vsel %vm788_vm8, %v979_v53, %v981_v23 }
  0xef   : > { %v336_v38 = vpop.permute.xlu1 %335  ;;  %v332_v39 = vpop.permute.xlu0 %331  ;;  %v1076_v35 = vrot.slane %v1070_v26, 3  ;;  %v1091_v36 = vmul.f32 %v1090_v27, %v2461_v29  ;;  %v1125_v37 = vstv %s1994_s27  ;;  %v1003_v41 = vsel %vm806_vm9, %v1000_v2, %v1002_v33  ;;  %s2011_s27 = sld [smem:[#allocation3 + $0x3d]] }
  0xf0   : > { %338 = vst.msk [vmem:[#allocation2 + $0x25] sm:$0x1] %vm215_vm5, %v336_v38  ;;  %334 = vst.msk [vmem:[#allocation2 + $0x24] sm:$0x1] %vm215_vm5, %v332_v39  ;;  %v1098_v39 = vrot.slane %v2645_v31, 4  ;;  %v1037_v42 = vrot.slane %v1030_v34, 1  ;;  %v1126_v45 = vmul.f32 %v1125_v37, %v2461_v29  ;;  %v1146_v46 = vstv %s1995_s4 }
  0xf1   : > { %941 = vrot.lane.b32.xlu0 %v938_v40, %s2264_s28  ;;  %v1078_v38 = vsel %vm788_vm8, %v1076_v35, %v1077_v30  ;;  %v2655_v40 = vmul.f32 %v1125_v37, %v2487_v47  ;;  %v1097_v44 = vrot.slane %v1091_v36, 4  ;;  %v1072_v53 = vmul.f32 %v1069_v18, %v2512_v0  ;;  %s2012_s4 = sld [smem:[#allocation3 + $0x42]] }
  0xf2   : > { %866 = vrot.lane.b32.xlu1 %v863_v43, %s2263_s26  ;;  %v1051_v43 = vmul.f32 %v1048_v8, %v2512_v0  ;;  %v1132_v54 = vrot.slane %v1126_v45, 1  ;;  %v1167_v56 = vstv %s1996_s17  ;;  %v1188_v63 = vstv %s1997_s6  ;;  %s2014_s17 = sld [smem:[#allocation3 + $0x34]] }
  0xf3   : > { %v344_v50 = vpop.permute.xlu1 %343  ;;  %v340_v51 = vpop.permute.xlu0 %339  ;;  %v1099_v48 = vsel %vm806_vm9, %v1097_v44, %v1098_v39  ;;  %v1133_v49 = vrot.slane %v2655_v40, 1  ;;  %v2675_v59 = vmul.f32 %v1167_v56, %v2487_v47  ;;  %v1168_v2 = vmul.f32 %v1167_v56, %v2461_v29  ;;  %s2773_s6 = sld [smem:[#allocation3 + $0x2f]] }
  0xf4   : > { %346 = vst.msk [vmem:[#allocation2 + $0x27] sm:$0x1] %vm215_vm5, %v344_v50  ;;  %342 = vst.msk [vmem:[#allocation2 + $0x26] sm:$0x1] %vm215_vm5, %v340_v51  ;;  %v2665_v50 = vmul.f32 %v1146_v46, %v2487_v47  ;;  %v1038_v51 = vsel %vm377_vm6, %v1035_v11, %v1037_v42  ;;  %v2685_v5 = vmul.f32 %v1188_v63, %v2487_v47  ;;  %v1339_v31 = vstv %s2006_s19  ;;  %s1974_s19 = sld [smem:[#allocation3 + $0x18]] }
  0xf5   : > { %962 = vrot.lane.b32.xlu0 %v959_v52, %s2264_s28  ;;  %v1058_v52 = vrot.slane %v1051_v43, 2  ;;  %v1134_v57 = vsel %vm377_vm6, %v1132_v54, %v1133_v49  ;;  %v1175_v4 = vrot.slane %v2675_v59, 3  ;;  %v1128_v8 = vmul.f32 %v1125_v37, %v2512_v0 }
  0xf6   : > { %887 = vrot.lane.b32.xlu1 %v884_v55, %s2263_s26  ;;  %v1147_v55 = vmul.f32 %v1146_v46, %v2461_v29  ;;  %v1154_v58 = vrot.slane %v2665_v50, 2  ;;  %v1189_v11 = vmul.f32 %v1188_v63, %v2461_v29  ;;  %v1149_v18 = vmul.f32 %v1146_v46, %v2512_v0 }
  0xf7   : > { %v352_v61 = vpop.permute.xlu1 %351  ;;  %v348_v62 = vpop.permute.xlu0 %347  ;;  %v1059_v60 = vsel %vm397_vm7, %v1056_v21, %v1058_v52  ;;  %v1135_v17 = vrot.slane %v1128_v8, 1  ;;  %v1360_v40 = vstv %s2007_s20  ;;  %s2809_s20 = sld [smem:[#allocation3 + $0x13]] }
  0xf8   : > { %354 = vst.msk [vmem:[#allocation2 + $0x29] sm:$0x1] %vm215_vm5, %v352_v61  ;;  %350 = vst.msk [vmem:[#allocation2 + $0x28] sm:$0x1] %vm215_vm5, %v348_v62  ;;  %v1079_v61 = vrot.slane %v1072_v53, 3  ;;  %v1093_v62 = vmul.f32 %v1090_v27, %v2512_v0  ;;  %v1195_v21 = vrot.slane %v1189_v11, 4  ;;  %v1170_v27 = vmul.f32 %v1167_v56, %v2512_v0 }
  0xf9   : > { %983 = vrot.lane.b32.xlu0 %v980_v1, %s2264_s28  ;;  %v1153_v1 = vrot.slane %v1147_v55, 2  ;;  %v1136_v25 = vsel %vm377_vm6, %v1133_v49, %v1135_v17  ;;  %v1156_v26 = vrot.slane %v1149_v18, 2  ;;  %v1361_v49 = vmul.f32 %v1360_v40, %v2696_v14 }
  0xfa   : > { %908 = vrot.lane.b32.xlu1 %v905_v3, %s2263_s26  ;;  %v1080_v6 = vsel %vm788_vm8, %v1077_v30, %v1079_v61  ;;  %v1100_v7 = vrot.slane %v1093_v62, 4  ;;  %v1177_v37 = vrot.slane %v1170_v27, 3  ;;  %v1395_v62 = vstv %s2009_s21  ;;  %s2818_s21 = sld [smem:[#allocation3 + $0x1d]] }
  0xfb   : > { %v1155_v3 = vsel %vm397_vm7, %v1153_v1, %v1154_v58  ;;  %v2698_v15 = vld [vmem:[#allocation2 + $0x20] sm:$0xff]  ;;  %v1157_v36 = vsel %vm397_vm7, %v1154_v58, %v1156_v26  ;;  %v1367_v58 = vrot.slane %v1361_v49, 4  ;;  %v1381_v1 = vstv %s2728_s22  ;;  %s2826_s22 = sld [smem:[#allocation3 + $0x35]] }
  0xfc   : > { %v1101_v16 = vsel %vm806_vm9, %v1098_v39, %v1100_v7  ;;  %v1340_v39 = vmul.f32 %v1339_v31, %v2696_v14  ;;  %v1341_v44 = vmul.f32 %v1339_v31, %v2698_v15  ;;  %v1178_v45 = vsel %vm788_vm8, %v1175_v4, %v1177_v37 }
  0xfd   : > { %1004 = vrot.lane.b32.xlu0 %v1001_v10, %s2264_s28  ;;  %v1174_v10 = vrot.slane %v1168_v2, 3  ;;  %v1362_v53 = vmul.f32 %v1360_v40, %v2698_v15  ;;  %v1382_v8 = vmul.f32 %v1381_v1, %v2696_v14 }
  0xfe   : > { %943 = vrot.lane.b32.xlu1 %v940_v9, %s2264_s28  ;;  %v1196_v9 = vrot.slane %v2685_v5, 4  ;;  %v1347_v52 = vrot.slane %v1341_v44, 3 }
  0xff   : > { %v1176_v12 = vsel %vm788_vm8, %v1174_v10, %v1175_v4  ;;  %v1368_v59 = vrot.slane %v1362_v53, 4  ;;  %v1416_v4 = vstv %s2010_s23  ;;  %s2828_s23 = sld [smem:[#allocation3 + $0x22]] }
 0x100   : > { %v1197_v22 = vsel %vm806_vm9, %v1195_v21, %v1196_v9  ;;  %v1417_v10 = vmul.f32 %v1416_v4, %v2696_v14 }
 0x101   : > { %1039 = vrot.lane.b32.xlu0 %v1036_v19, %s2265_s15  ;;  %v1297_v19 = vstv %s2004_s7  ;;  %v1369_v2 = vsel %vm806_vm9, %v1367_v58, %v1368_v59  ;;  %s2015_s7 = sld [smem:[#allocation3 + $0x39]] }
 0x102   : > { %964 = vrot.lane.b32.xlu1 %v961_v20, %s2264_s28  ;;  %v1283_v20 = vstv %s2687_s8  ;;  %v1298_v23 = vmul.f32 %v1297_v19, %v2696_v14  ;;  %v1299_v24 = vmul.f32 %v1297_v19, %v2698_v15  ;;  %v1423_v21 = vrot.slane %v1417_v10, 2  ;;  %s2016_s8 = sld [smem:[#allocation3 + $0x3e]] }
 0x103   : > { %v1284_v30 = vmul.f32 %v1283_v20, %v2696_v14 }
 0x104   : > { %v1305_v33 = vrot.slane %v1299_v24, 1 }
 0x105   : > { %1060 = vrot.lane.b32.xlu0 %v1057_v28, %s2265_s15  ;;  %v1318_v28 = vstv %s2005_s14  ;;  %s2017_s14 = sld [smem:[#allocation3 + $0x43]] }
 0x106   : > { %985 = vrot.lane.b32.xlu1 %v982_v32, %s2264_s28  ;;  %v1304_v32 = vrot.slane %v1298_v23, 1  ;;  %v1319_v34 = vmul.f32 %v1318_v28, %v2696_v14  ;;  %v1320_v35 = vmul.f32 %v1318_v28, %v2698_v15 }
 0x108   : > { %v1325_v42 = vrot.slane %v1319_v34, 2  ;;  %v1326_v43 = vrot.slane %v1320_v35, 2 }
 0x109   : > { %1081 = vrot.lane.b32.xlu0 %v1078_v38, %s2265_s15  ;;  %v1191_v38 = vmul.f32 %v1188_v63, %v2512_v0  ;;  %v1396_v63 = vmul.f32 %v1395_v62, %v2696_v14 }
 0x10a   : > { %1006 = vrot.lane.b32.xlu1 %v1003_v41, %s2264_s28  ;;  %v1306_v41 = vsel %vm377_vm6, %v1304_v32, %v1305_v33  ;;  %v1327_v50 = vsel %vm397_vm7, %v1325_v42, %v1326_v43 }
 0x10b   : > { %v1198_v46 = vrot.slane %v1191_v38, 4  ;;  %v1402_v11 = vrot.slane %v1396_v63, 1 }
 0x10d   : > { %1102 = vrot.lane.b32.xlu0 %v1099_v48, %s2265_s15  ;;  %v2724_v48 = vld [vmem:[#allocation2 + $0x28] sm:$0xf]  ;;  %v1199_v54 = vsel %vm806_vm9, %v1196_v9, %v1198_v46  ;;  %v2752_v9 = vmul.f32 %v1416_v4, %v2698_v15 }
 0x10e   : > { %1041 = vrot.lane.b32.xlu1 %v1038_v51, %s2265_s15  ;;  %v1346_v51 = vrot.slane %v1340_v39, 3  ;;  %v1300_v55 = vmul.f32 %v1297_v19, %v2724_v48  ;;  %v1321_v61 = vmul.f32 %v1318_v28, %v2724_v48  ;;  %v1342_v7 = vmul.f32 %v1339_v31, %v2724_v48 }
 0x10f   : > { %v1363_v18 = vmul.f32 %v1360_v40, %v2724_v48  ;;  %v1437_v19 = vstv %s2011_s27  ;;  %v1424_v23 = vrot.slane %v2752_v9, 2  ;;  %v1398_v35 = vmul.f32 %v1395_v62, %v2724_v48  ;;  %s2837_s27 = sld [smem:[#allocation3 + $0x27]] }
 0x110   : > { %v1348_v56 = vsel %vm788_vm8, %v1346_v51, %v1347_v52  ;;  %v1349_v17 = vrot.slane %v1342_v7, 3  ;;  %v1438_v24 = vmul.f32 %v1437_v19, %v2696_v14  ;;  %v1383_v39 = vmul.f32 %v1381_v1, %v2698_v15 }
 0x111   : > { %1137 = vrot.lane.b32.xlu0 %v1134_v57, %s2266_s5  ;;  %v1285_v57 = vmul.f32 %v1283_v20, %v2698_v15  ;;  %v1370_v27 = vrot.slane %v1363_v18, 4  ;;  %v1405_v42 = vrot.slane %v1398_v35, 1  ;;  %v1440_v53 = vmul.f32 %v1437_v19, %v2724_v48 }
 0x112   : > { %1062 = vrot.lane.b32.xlu1 %v1059_v60, %s2265_s15  ;;  %v1307_v60 = vrot.slane %v1300_v55, 1  ;;  %v1350_v26 = vsel %vm788_vm8, %v1347_v52, %v1349_v17  ;;  %v1444_v31 = vrot.slane %v1438_v24, 3 }
 0x113   : > { %v1371_v34 = vsel %vm806_vm9, %v1368_v59, %v1370_v27  ;;  %v2874_v27 = vstv %s2818_s21  ;;  %s1962_s21 = sld [smem:[#allocation3 + $0x8]] }
 0x114   : > { %v1308_v5 = vsel %vm377_vm6, %v1305_v33, %v1307_v60 }
 0x115   : > { %1158 = vrot.lane.b32.xlu0 %v1155_v3, %s2266_s5  ;;  %v1397_v3 = vmul.f32 %v1395_v62, %v2698_v15  ;;  %v1447_v62 = vrot.slane %v1440_v53, 3 }
 0x116   : > { %1083 = vrot.lane.b32.xlu1 %v1080_v6, %s2265_s15  ;;  %v1328_v6 = vrot.slane %v1321_v61, 2 }
 0x119   : > { %1179 = vrot.lane.b32.xlu0 %v1176_v12, %s2266_s5  ;;  %v1403_v12 = vrot.slane %v1397_v3, 1  ;;  %v2824_v3 = vstv %s2017_s14  ;;  %s3024_s14 = sld [smem:[#allocation3 + $0x1]] }
 0x11a   : > { %1104 = vrot.lane.b32.xlu1 %v1101_v16, %s2265_s15  ;;  %v1329_v16 = vsel %vm397_vm7, %v1326_v43, %v1328_v6  ;;  %v1419_v43 = vmul.f32 %v1416_v4, %v2724_v48 }
 0x11b   : > { %v1404_v20 = vsel %vm377_vm6, %v1402_v11, %v1403_v12  ;;  %v1406_v51 = vsel %vm377_vm6, %v1403_v12, %v1405_v42  ;;  %v747_v11 = vstv %s1974_s19  ;;  %v2897_v42 = vstv %s2828_s23  ;;  %s3046_s19 = sld [smem:[#allocation3 + $0x7]] }
 0x11c   : > { %v1426_v52 = vrot.slane %v1419_v43, 2  ;;  %v2845_v12 = vmul.f32 %v747_v11, %v2487_v47  ;;  %v2900_v43 = vstv %s2837_s27  ;;  %s1968_s23 = sld [smem:[#allocation3 + $0x10]] }
 0x11d   : > { %1200 = vrot.lane.b32.xlu0 %v1197_v22, %s2266_s5  ;;  %v1458_v22 = vstv %s2012_s4  ;;  %s2842_s4 = sld [smem:[#allocation3 + $0x30]] }
 0x11e   : > { %1139 = vrot.lane.b32.xlu1 %v1136_v25, %s2266_s5  ;;  %v2762_v25 = vmul.f32 %v1437_v19, %v2698_v15  ;;  %v1459_v28 = vmul.f32 %v1458_v22, %v2696_v14  ;;  %v2771_v33 = vmul.f32 %v1458_v22, %v2698_v15  ;;  %v1427_v61 = vsel %vm397_vm7, %v1424_v23, %v1426_v52  ;;  %s1999_s27 = sld [smem:[#allocation3 + $0x31]] }
 0x11f   : > { %v1461_v1 = vmul.f32 %v1458_v22, %v2724_v48  ;;  %v2861_v22 = vmul.f32 %v2824_v3, %v2698_v15 }
 0x120   : > { %v1445_v32 = vrot.slane %v2762_v25, 3  ;;  %v1465_v40 = vrot.slane %v1459_v28, 4  ;;  %v741_v25 = vstv %s2809_s20  ;;  %s1960_s20 = sld [smem:[#allocation3 + $0x2]] }
 0x121   : > { %1288 = vrot.lane.b32.xlu0 %v1284_v30, %s2263_s26  ;;  %v1425_v30 = vsel %vm397_vm7, %v1423_v21, %v1424_v23  ;;  %v1468_v10 = vrot.slane %v1461_v1, 4  ;;  %v1564_v35 = vrot.slane %v2861_v22, 4  ;;  %v742_v53 = vmul.f32 %v741_v25, %v2461_v29 }
 0x122   : > { %1160 = vrot.lane.b32.xlu1 %v1157_v36, %s2266_s5  ;;  %v2779_v36 = vstv %s2014_s17  ;;  %v1446_v38 = vsel %vm788_vm8, %v1444_v31, %v1445_v32  ;;  %s2851_s17 = sld [smem:[#allocation3 + $0x3a]] }
 0x123   : > { %v1494_v44 = vmul.f32 %v2779_v36, %v2696_v14  ;;  %v1496_v24 = vmul.f32 %v2779_v36, %v2724_v48 }
 0x125   : > { %1309 = vrot.lane.b32.xlu0 %v1306_v41, %s2263_s26  ;;  %v1466_v41 = vrot.slane %v2771_v33, 4 }
 0x126   : > { %1181 = vrot.lane.b32.xlu1 %v1178_v45, %s2266_s5  ;;  %v2793_v45 = vmul.f32 %v2779_v36, %v2698_v15 }
 0x127   : > { %v1467_v49 = vsel %vm806_vm9, %v1465_v40, %v1466_v41  ;;  %v1469_v23 = vsel %vm806_vm9, %v1466_v41, %v1468_v10  ;;  %v765_v41 = vmul.f32 %v2874_v27, %v2461_v29 }
 0x128   : > { %v2916_v52 = vstv %s2851_s17  ;;  %s3203_s17 = sld [smem:[#allocation3 + $0x36]] }
 0x129   : > { %1330 = vrot.lane.b32.xlu0 %v1327_v50, %s2263_s26  ;;  %v1479_v50 = vstv %s2773_s6  ;;  %s2869_s6 = sld [smem:[#allocation3 + $0x3f]] }
 0x12a   : > { %1202 = vrot.lane.b32.xlu1 %v1199_v54, %s2266_s5  ;;  %v1514_v54 = vstv %s2015_s7  ;;  %v1480_v55 = vmul.f32 %v1479_v50, %v2696_v14  ;;  %v1481_v33 = vmul.f32 %v1479_v50, %v2698_v15  ;;  %s2903_s7 = sld [smem:[#allocation3 + $0x44]] }
 0x12b   : > { %v1515_v58 = vmul.f32 %v1514_v54, %v2696_v14  ;;  %v2807_v59 = vmul.f32 %v1514_v54, %v2698_v15  ;;  %v1517_v40 = vmul.f32 %v1514_v54, %v2724_v48 }
 0x12d   : > { %1351 = vrot.lane.b32.xlu0 %v1348_v56, %s2263_s26  ;;  %v1500_v56 = vrot.slane %v1494_v44, 1  ;;  %v1521_v4 = vrot.slane %v1515_v58, 2  ;;  %v1524_v1 = vrot.slane %v1517_v40, 2 }
 0x12e   : > { %1290 = vrot.lane.b32.xlu1 %v1285_v57, %s2263_s26  ;;  %v1501_v57 = vrot.slane %v2793_v45, 1  ;;  %v2948_v45 = vmul.f32 %v2900_v43, %v2487_v47 }
 0x12f   : > { %v2943_v10 = vstv %s2869_s6  ;;  %s3214_s6 = sld [smem:[#allocation3 + $0x3b]] }
 0x130   : > { %v1502_v63 = vsel %vm377_vm6, %v1500_v56, %v1501_v57  ;;  %v2976_v40 = vstv %s2903_s7  ;;  %s3227_s7 = sld [smem:[#allocation3 + $0xe]] }
 0x131   : > { %1372 = vrot.lane.b32.xlu0 %v1369_v2, %s2263_s26  ;;  %v2816_v2 = vstv %s2016_s8  ;;  %s3010_s8 = sld [smem:[#allocation3 + $0x4]] }
 0x132   : > { %1311 = vrot.lane.b32.xlu1 %v1308_v5, %s2263_s26  ;;  %v1522_v5 = vrot.slane %v2807_v59, 2  ;;  %v1536_v6 = vmul.f32 %v2816_v2, %v2696_v14  ;;  %v2835_v7 = vmul.f32 %v2816_v2, %v2698_v15  ;;  %v1634_v59 = vmul.f32 %v2943_v10, %v2696_v14 }
 0x134   : > { %v1523_v18 = vsel %vm397_vm7, %v1521_v4, %v1522_v5  ;;  %v1542_v19 = vrot.slane %v1536_v6, 3  ;;  %v1543_v21 = vrot.slane %v2835_v7, 3  ;;  %v771_v6 = vrot.slane %v765_v41, 2 }
 0x135   : > { %1386 = vrot.lane.b32.xlu0 %v1382_v8, %s2264_s28  ;;  %v1448_v8 = vsel %vm788_vm8, %v1445_v32, %v1447_v62 }
 0x136   : > { %1332 = vrot.lane.b32.xlu1 %v1329_v16, %s2263_s26  ;;  %v1557_v16 = vmul.f32 %v2824_v3, %v2696_v14  ;;  %v1544_v32 = vsel %vm788_vm8, %v1542_v19, %v1543_v21 }
 0x139   : > { %1407 = vrot.lane.b32.xlu0 %v1404_v20, %s2264_s28  ;;  %v748_v20 = vmul.f32 %v747_v11, %v2461_v29 }
 0x13a   : > { %1353 = vrot.lane.b32.xlu1 %v1350_v26, %s2263_s26  ;;  %v755_v26 = vrot.slane %v2845_v12, 1  ;;  %v3022_v12 = vmul.f32 %v2976_v40, %v2698_v15 }
 0x13b   : > { %v754_v36 = vrot.slane %v748_v20, 1 }
 0x13d   : > { %1428 = vrot.lane.b32.xlu0 %v1425_v30, %s2264_s28  ;;  %v2879_v30 = vstv %s2826_s22  ;;  %v756_v44 = vsel %vm377_vm6, %v754_v36, %v755_v26  ;;  %v1559_v36 = vmul.f32 %v2824_v3, %v2724_v48  ;;  %s1966_s22 = sld [smem:[#allocation3 + $0xa]] }
 0x13e   : > { %1374 = vrot.lane.b32.xlu1 %v1371_v34, %s2263_s26  ;;  %v1563_v34 = vrot.slane %v1557_v16, 4  ;;  %v1592_v56 = vmul.f32 %v2879_v30, %v2696_v14  ;;  %v2930_v58 = vmul.f32 %v2879_v30, %v2698_v15  ;;  %v761_v4 = vadd.f32 %v756_v44, %v742_v53 }
 0x13f   : > { %v800_v44 = vmul.f32 %v2900_v43, %v2461_v29 }
 0x140   : > { %v2781_v37 = vpop.permute.xlu0 %822  ;;  %v1598_v20 = vrot.slane %v1592_v56, 1 }
 0x141   : > { %1449 = vrot.lane.b32.xlu0 %v1446_v38, %s2264_s28  ;;  %v2890_v38 = vmul.f32 %v2874_v27, %v2487_v47 }
 0x142   : > { %1388 = vrot.lane.b32.xlu1 %v1383_v39, %s2264_s28  ;;  %v1503_v39 = vrot.slane %v1496_v24, 1  ;;  %v1613_v24 = vmul.f32 %v2916_v52, %v2696_v14 }
 0x144   : > { %v2795_v46 = vpop.permute.xlu0 %920  ;;  %v1504_v62 = vsel %vm377_vm6, %v1501_v57, %v1503_v39  ;;  %v750_v57 = vmul.f32 %v747_v11, %v2512_v0  ;;  %v1619_v56 = vrot.slane %v1613_v24, 2 }
 0x145   : > { %1470 = vrot.lane.b32.xlu0 %v1467_v49, %s2264_s28  ;;  %v2910_v49 = vmul.f32 %v2897_v42, %v2487_v47 }
 0x146   : > { %1409 = vrot.lane.b32.xlu1 %v1406_v51, %s2264_s28  ;;  %v1577_v51 = vstv %s2842_s4  ;;  %v757_v53 = vrot.slane %v750_v57, 1  ;;  %v767_v57 = vmul.f32 %v2874_v27, %v2512_v0  ;;  %s3191_s4 = sld [smem:[#allocation3 + $0x2c]] }
 0x147   : > { %v790_v16 = vrot.slane %v2910_v49, 3 }
 0x148   : > { %v2811_v60 = vpop.permute.xlu0 %1018 }
 0x149   : > { %1484 = vrot.lane.b32.xlu0 %v1480_v55, %s2265_s15  ;;  %v1565_v55 = vsel %vm806_vm9, %v1563_v34, %v1564_v35 }
 0x14a   : > { %1430 = vrot.lane.b32.xlu1 %v1427_v61, %s2264_s28  ;;  %v772_v61 = vrot.slane %v2890_v38, 2 }
 0x14c   : > { %v2847_v9 = vpop.permute.xlu0 %1116  ;;  %v773_v11 = vsel %vm397_vm7, %v771_v6, %v772_v61  ;;  %v1566_v6 = vrot.slane %v1559_v36, 4 }
 0x14d   : > { %1505 = vrot.lane.b32.xlu0 %v1502_v63, %s2265_s15  ;;  %v1538_v63 = vmul.f32 %v2816_v2, %v2724_v48  ;;  %v1578_v2 = vmul.f32 %v1577_v51, %v2696_v14  ;;  %v778_v39 = vadd.f32 %v773_v11, %v761_v4  ;;  %v1640_v11 = vrot.slane %v1634_v59, 3 }
 0x14e   : > { %1451 = vrot.lane.b32.xlu1 %v1448_v8, %s2264_s28  ;;  %v782_v8 = vmul.f32 %v2897_v42, %v2461_v29  ;;  %v1567_v36 = vsel %vm806_vm9, %v1564_v35, %v1566_v6 }
 0x14f   : > { %v1545_v34 = vrot.slane %v1538_v63, 3  ;;  %v808_v63 = vrot.slane %v2948_v45, 4 }
 0x150   : > { %v2853_v17 = vpop.permute.xlu1 %824  ;;  %v789_v41 = vrot.slane %v782_v8, 3 }
 0x151   : > { %1526 = vrot.lane.b32.xlu0 %v1523_v18, %s2265_s15  ;;  %v1546_v4 = vsel %vm788_vm8, %v1543_v21, %v1545_v34  ;;  %v743_v34 = vmul.f32 %v741_v25, %v2487_v47  ;;  %v1579_v47 = vmul.f32 %v1577_v51, %v2698_v15  ;;  %v1615_v51 = vmul.f32 %v2916_v52, %v2724_v48 }
 0x152   : > { %1472 = vrot.lane.b32.xlu1 %v1469_v23, %s2264_s28  ;;  %v1599_v23 = vrot.slane %v2930_v58, 1  ;;  %v791_v29 = vsel %vm788_vm8, %v789_v41, %v790_v16 }
 0x153   : > { %v2876_v28 = vpop.permute.xlu0 %843  ;;  %v796_v8 = vadd.f32 %v791_v29, %v778_v39  ;;  %v1594_v39 = vmul.f32 %v2879_v30, %v2724_v48 }
 0x154   : > { %v2881_v31 = vpop.permute.xlu1 %922  ;;  %v1600_v3 = vsel %vm377_vm6, %v1598_v20, %v1599_v23  ;;  %v758_v20 = vsel %vm377_vm6, %v755_v26, %v757_v53  ;;  %v784_v53 = vmul.f32 %v2897_v42, %v2512_v0  ;;  %v1662_v42 = vrot.slane %v3022_v12, 4 }
 0x155   : > { %1547 = vrot.lane.b32.xlu0 %v1544_v32, %s2265_s15  ;;  %v2963_v32 = vmul.f32 %v2916_v52, %v2698_v15  ;;  %v762_v59 = vadd.f32 %v758_v20, %v743_v34  ;;  %v410_v52 = vstv %s3024_s14  ;;  %v3091_v34 = vld [vmem:[#allocation2] sm:$0xff]  ;;  %s3252_s14 = sld [smem:[#allocation3 + $0xb]] }
 0x156   : > { %1486 = vrot.lane.b32.xlu1 %v1481_v33, %s2265_s15  ;;  %v1525_v33 = vsel %vm397_vm7, %v1522_v5, %v1524_v1  ;;  %v2992_v1 = vmul.f32 %v2943_v10, %v2698_v15  ;;  %v792_v29 = vrot.slane %v784_v53, 3 }
 0x157   : > { %v2912_v50 = vpop.permute.xlu0 %864 }
 0x158   : > { %v2921_v54 = vpop.permute.xlu1 %1020  ;;  %v1641_v27 = vrot.slane %v2992_v1, 3 }
 0x159   : > { %1568 = vrot.lane.b32.xlu0 %v1565_v55, %s2265_s15 }
 0x15a   : > { %1507 = vrot.lane.b32.xlu1 %v1504_v62, %s2265_s15  ;;  %v1620_v62 = vrot.slane %v2963_v32, 2  ;;  %v1642_v30 = vsel %vm788_vm8, %v1640_v11, %v1641_v27 }
 0x15b   : > { %v2951_v18 = vpop.permute.xlu0 %885 }
 0x15c   : > { %v2956_v19 = vpop.permute.xlu1 %1118  ;;  %v1621_v21 = vsel %vm397_vm7, %v1619_v56, %v1620_v62  ;;  %v1601_v56 = vrot.slane %v1594_v39, 1 }
 0x15d   : > { %1582 = vrot.lane.b32.xlu0 %v1578_v2, %s2266_s5  ;;  %v807_v2 = vrot.slane %v800_v44, 4  ;;  %v774_v44 = vrot.slane %v767_v57, 2 }
 0x15e   : > { %1528 = vrot.lane.b32.xlu1 %v1525_v33, %s2265_s15  ;;  %v1655_v33 = vmul.f32 %v2976_v40, %v2696_v14 }
 0x15f   : > { %v2980_v55 = vpop.permute.xlu0 %906  ;;  %v809_v26 = vsel %vm806_vm9, %v807_v2, %v808_v63  ;;  %v430_v2 = vstv %s3010_s8  ;;  %s3229_s8 = sld [smem:[#allocation3 + $0x40]] }
 0x160   : > { %v2984_v5 = vpop.permute.xlu1 %845  ;;  %v814_v41 = vadd.f32 %v809_v26, %v796_v8  ;;  %v1661_v35 = vrot.slane %v1655_v33, 4 }
 0x161   : > { %1603 = vrot.lane.b32.xlu0 %v1600_v3, %s2266_s5 }
 0x162   : > { %1549 = vrot.lane.b32.xlu1 %v1546_v4, %s2265_s15  ;;  %v828_v22 = vadd.f32 %v2781_v37, %v814_v41  ;;  %v775_v37 = vsel %vm397_vm7, %v772_v61, %v774_v44  ;;  %v802_v4 = vmul.f32 %v2900_v43, %v2512_v0  ;;  %v1663_v38 = vsel %vm806_vm9, %v1661_v35, %v1662_v42  ;;  %v3075_v61 = vld [vmem:[#allocation2 + $0x8] sm:$0xff] }
 0x163   : > { %v3008_v24 = vpop.permute.xlu0 %941  ;;  %v779_v8 = vadd.f32 %v775_v37, %v762_v59  ;;  %v3078_v0 = vmul.f32 %v3075_v61, %v430_v2  ;;  %v1622_v43 = vrot.slane %v1615_v51, 2  ;;  %v455_v41 = vstv %s3046_s19  ;;  %s3300_s19 = sld [smem:[#allocation3 + $0x11]] }
 0x164   : > { %v3012_v7 = vpop.permute.xlu1 %866  ;;  %v849_v6 = vadd.f32 %v2876_v28, %v828_v22  ;;  %v1602_v28 = vsel %vm377_vm6, %v1599_v23, %v1601_v56  ;;  %v810_v33 = vrot.slane %v802_v4, 4  ;;  %v411_v23 = vmul.f32 %v3091_v34, %v410_v52 }
 0x165   : > { %1624 = vrot.lane.b32.xlu0 %v1621_v21, %s2266_s5  ;;  %v793_v21 = vsel %vm788_vm8, %v790_v16, %v792_v29  ;;  %v438_v49 = vrot.slane %v3078_v0, 1  ;;  %v3101_v16 = vmul.f32 %v3075_v61, %v455_v41  ;;  %v1657_v59 = vmul.f32 %v2976_v40, %v2724_v48 }
 0x166   : > { %1570 = vrot.lane.b32.xlu1 %v1567_v36, %s2265_s15  ;;  %v870_v20 = vadd.f32 %v2912_v50, %v849_v6  ;;  %v1636_v50 = vmul.f32 %v2943_v10, %v2724_v48  ;;  %v431_v36 = vmul.f32 %v3091_v34, %v430_v2  ;;  %v797_v58 = vadd.f32 %v793_v21, %v779_v8  ;;  %s1961_s15 = sld [smem:[#allocation3 + $0x5]] }
 0x167   : > { %v3041_v3 = vpop.permute.xlu0 %962  ;;  %v456_v22 = vmul.f32 %v3091_v34, %v455_v41  ;;  %v463_v40 = vrot.slane %v3101_v16, 2  ;;  %v1664_v51 = vrot.slane %v1657_v59, 4  ;;  %v3152_v21 = vstv %s1960_s20  ;;  %s1955_s20 = sld [smem:[#allocation3 + $0x3]] }
 0x168   : > { %v3049_v25 = vpop.permute.xlu1 %887  ;;  %v891_v26 = vadd.f32 %v2951_v18, %v870_v20  ;;  %v1623_v18 = vsel %vm397_vm7, %v1620_v62, %v1622_v43  ;;  %v1643_v53 = vrot.slane %v1636_v50, 3  ;;  %v525_v16 = vstv %s1962_s21  ;;  %s2267_s21 = smov 1  }
 0x169   : > { %1645 = vrot.lane.b32.xlu0 %v1642_v30, %s2266_s5  ;;  %v462_v37 = vrot.slane %v456_v22, 2  ;;  %v1665_v1 = vsel %vm806_vm9, %v1662_v42, %v1664_v51  ;;  %v412_v42 = vmul.f32 %v3075_v61, %v410_v52 }
 0x16a   : > { %1584 = vrot.lane.b32.xlu1 %v1579_v47, %s2266_s5  ;;  %v912_v10 = vadd.f32 %v2980_v55, %v891_v26  ;;  %v811_v55 = vsel %vm806_vm9, %v808_v63, %v810_v33  ;;  %v437_v47 = vrot.slane %v431_v36, 1  ;;  %v1644_v63 = vsel %vm788_vm8, %v1641_v27, %v1643_v53  ;;  %v3133_v27 = vld [vmem:[#allocation2 + $0x10] sm:$0xf] }
 0x16b   : > { %v3065_v57 = vpop.permute.xlu0 %983  ;;  %v815_v30 = vadd.f32 %v811_v55, %v797_v58  ;;  %v464_v8 = vsel %vm397_vm7, %v462_v37, %v463_v40  ;;  %v3136_v20 = vmul.f32 %v3133_v27, %v430_v2  ;;  %v3165_v59 = vmul.f32 %v3133_v27, %v525_v16 }
 0x16c   : > { %v3069_v11 = vpop.permute.xlu1 %908  ;;  %v926_v32 = vadd.f32 %v2795_v46, %v912_v10  ;;  %v439_v56 = vsel %vm377_vm6, %v437_v47, %v438_v49  ;;  %v500_v0 = vstv %s1961_s15  ;;  %v527_v55 = vmul.f32 %v3075_v61, %v525_v16  ;;  %s2028_s15 = sld [smem:[#allocation3 + $0x47]] }
 0x16d   : > { %1666 = vrot.lane.b32.xlu0 %v1663_v38, %s2266_s5  ;;  %v829_v45 = vadd.f32 %v2853_v17, %v815_v30  ;;  %v3145_v43 = vmul.f32 %v3075_v61, %v500_v0 }
 0x16e   : > { %1605 = vrot.lane.b32.xlu1 %v1602_v28, %s2266_s5  ;;  %v947_v4 = vadd.f32 %v3008_v24, %v926_v32 }
 0x16f   : > { %v1005_v39 = vpop.permute.xlu0 %1004  ;;  %v850_v46 = vadd.f32 %v2984_v5, %v829_v45  ;;  %v535_v45 = vrot.slane %v3165_v59, 2 }
 0x170   : > { %v3097_v44 = vpop.permute.xlu1 %943  ;;  %v968_v5 = vadd.f32 %v3041_v3, %v947_v4  ;;  %v440_v3 = vrot.slane %v3136_v20, 1 }
 0x171   : > { %417 = vrot.lane.b32.xlu0 %v411_v23, %s2263_s26  ;;  %v871_v17 = vadd.f32 %v3012_v7, %v850_v46  ;;  %v413_v7 = vmul.f32 %v3133_v27, %v410_v52  ;;  %v482_v52 = vmul.f32 %v3075_v61, %v3152_v21 }
 0x172   : > { %1626 = vrot.lane.b32.xlu1 %v1623_v18, %s2266_s5  ;;  %v989_v12 = vadd.f32 %v3065_v57, %v968_v5  ;;  %v501_v57 = vmul.f32 %v3091_v34, %v500_v0  ;;  %v441_v58 = vsel %vm377_vm6, %v438_v49, %v440_v3 }
 0x173   : > { %v3114_v35 = vpop.permute.xlu0 %1039  ;;  %v892_v24 = vadd.f32 %v3049_v25, %v871_v17  ;;  %v458_v25 = vmul.f32 %v3133_v27, %v455_v41 }
 0x174   : > { %v965_v62 = vpop.permute.xlu1 %964  ;;  %v1010_v50 = vadd.f32 %v1005_v39, %v989_v12  ;;  %v507_v41 = vrot.slane %v501_v57, 1  ;;  %v3207_v12 = vstv %s1999_s27  ;;  %s1963_s27 = sld [smem:[#allocation3 + $0x9]] }
 0x175   : > { %442 = vrot.lane.b32.xlu0 %v439_v56, %s2263_s26  ;;  %v913_v2 = vadd.f32 %v3069_v11, %v892_v24  ;;  %v508_v11 = vrot.slane %v3145_v43, 1  ;;  %v465_v39 = vrot.slane %v458_v25, 2  ;;  %v481_v56 = vmul.f32 %v3091_v34, %v3152_v21 }
 0x176   : > { %1647 = vrot.lane.b32.xlu1 %v1644_v63, %s2266_s5  ;;  %v1024_v23 = vadd.f32 %v2811_v60, %v1010_v50  ;;  %v533_v63 = vrot.slane %v527_v55, 2  ;;  %v3248_v55 = vstv %s3203_s17  ;;  %s1972_s17 = sld [smem:[#allocation3 + $0x12]] }
 0x177   : > { %v1061_v29 = vpop.permute.xlu0 %1060  ;;  %v927_v36 = vadd.f32 %v2881_v31, %v913_v2  ;;  %v509_v53 = vsel %vm377_vm6, %v507_v41, %v508_v11  ;;  %v466_v49 = vsel %vm397_vm7, %v463_v40, %v465_v39  ;;  %v503_v40 = vmul.f32 %v3133_v27, %v500_v0 }
 0x178   : > { %v986_v6 = vpop.permute.xlu1 %985  ;;  %v1045_v60 = vadd.f32 %v3114_v35, %v1024_v23  ;;  %v3205_v0 = vstv %s1968_s23  ;;  %v483_v41 = vmul.f32 %v3133_v27, %v3152_v21  ;;  %s1964_s23 = sld [smem:[#allocation3 + $0xc]] }
 0x179   : > { %467 = vrot.lane.b32.xlu0 %v464_v8, %s2263_s26  ;;  %v948_v31 = vadd.f32 %v3097_v44, %v927_v36  ;;  %v642_v57 = vmul.f32 %v3205_v0, %v2696_v14 }
 0x17a   : > { %1668 = vrot.lane.b32.xlu1 %v1665_v1, %s2266_s5  ;;  %s1967_s5 = sld [smem:[#allocation3 + $0xd]]  ;;  %v1066_v30 = vadd.f32 %v1061_v29, %v1045_v60  ;;  %v536_v29 = vsel %vm397_vm7, %v533_v63, %v535_v45  ;;  %v526_v1 = vmul.f32 %v3091_v34, %v525_v16  ;;  %v1209_v60 = vstv %s3191_s4 }
 0x17b   : > { %v1082_v38 = vpop.permute.xlu0 %1081  ;;  %v969_v47 = vadd.f32 %v965_v62, %v948_v31  ;;  %s1965_s4 = sld [smem:[#allocation3 + $0xf]] }
 0x17c   : > { %v1007_v28 = vpop.permute.xlu1 %1006  ;;  %v1087_v35 = vadd.f32 %v1082_v38, %v1066_v30  ;;  %v3195_v38 = vstv %s1966_s22  ;;  %v532_v43 = vrot.slane %v526_v1, 2  ;;  %s361_s22 = sld [smem:[#allocation3]] }
 0x17d   : > { %421 = vrot.lane.b32.xlu0 %v413_v7, %s2263_s26  ;;  %v990_v44 = vadd.f32 %v986_v6, %v969_v47  ;;  %v510_v6 = vrot.slane %v503_v40, 1  ;;  %v598_v1 = vmul.f32 %v3195_v38, %v2698_v15 }
 0x17e   : > { %419 = vrot.lane.b32.xlu1 %v412_v42, %s2263_s26  ;;  %v597_v42 = vmul.f32 %v3195_v38, %v2696_v14 }
 0x17f   : > { %v1103_v33 = vpop.permute.xlu0 %1102  ;;  %v1011_v62 = vadd.f32 %v1007_v28, %v990_v44  ;;  %v3263_v44 = vstv %s3214_s6  ;;  %s2024_s6 = sld [smem:[#allocation3 + $0x46]] }
 0x180   : > { %v1042_v26 = vpop.permute.xlu1 %1041  ;;  %v1108_v37 = vadd.f32 %v1103_v33, %v1087_v35  ;;  %v3182_v4 = vstv %s1967_s5  ;;  %v3223_v33 = vmul.f32 %v3205_v0, %v2698_v15  ;;  %s1956_s5 = sld [smem:[#allocation3 + $0x6]] }
 0x181   : > { %489 = vrot.lane.b32.xlu0 %v482_v52, %s2264_s28  ;;  %v1025_v8 = vadd.f32 %v2921_v54, %v1011_v62  ;;  %v617_v20 = vmul.f32 %v3182_v4, %v2696_v14  ;;  %v3199_v7 = vmul.f32 %v3182_v4, %v2698_v15  ;;  %v511_v54 = vsel %vm377_vm6, %v508_v11, %v510_v6 }
 0x182   : > { %444 = vrot.lane.b32.xlu1 %v441_v58, %s2263_s26  ;;  %v1122_v5 = vadd.f32 %v2847_v9, %v1108_v37  ;;  %v1216_v58 = vmul.f32 %v3207_v12, %v2696_v14  ;;  %v649_v31 = vrot.slane %v3223_v33, 2  ;;  %v3271_v62 = vmul.f32 %v3248_v55, %v2698_v15 }
 0x183   : > { %v1138_v10 = vpop.permute.xlu0 %1137  ;;  %v1046_v9 = vadd.f32 %v1042_v26, %v1025_v8  ;;  %v623_v2 = vrot.slane %v617_v20, 1  ;;  %v624_v50 = vrot.slane %v3199_v7, 1  ;;  %v534_v26 = vsel %vm397_vm7, %v532_v43, %v533_v63 }
 0x184   : > { %v1063_v18 = vpop.permute.xlu1 %1062  ;;  %v1222_v21 = vrot.slane %v1216_v58, 1  ;;  %v3279_v37 = vstv %s3227_s7  ;;  %v644_v43 = vmul.f32 %v3205_v0, %v2724_v48  ;;  %s2031_s7 = sld [smem:[#allocation3 + $0x48]] }
 0x185   : > { %512 = vrot.lane.b32.xlu0 %v509_v53, %s2264_s28  ;;  %v1067_v52 = vadd.f32 %v1063_v18, %v1046_v9  ;;  %v625_v18 = vsel %vm377_vm6, %v623_v2, %v624_v50  ;;  %v648_v53 = vrot.slane %v642_v57, 2  ;;  %v687_v20 = vmul.f32 %v3279_v37, %v2696_v14 }
 0x186   : > { %469 = vrot.lane.b32.xlu1 %v466_v49, %s2263_s26  ;;  %v1240_v9 = vrot.slane %v3271_v62, 2 }
 0x187   : > { %v1159_v22 = vpop.permute.xlu0 %1158  ;;  %v650_v35 = vsel %vm397_vm7, %v648_v53, %v649_v31  ;;  %v693_v58 = vrot.slane %v687_v20, 1  ;;  %v1218_v53 = vmul.f32 %v3207_v12, %v2724_v48 }
 0x188   : > { %v1084_v32 = vpop.permute.xlu1 %1083 }
 0x189   : > { %471 = vrot.lane.b32.xlu0 %v465_v39, %s2263_s26  ;;  %v1088_v36 = vadd.f32 %v1084_v32, %v1067_v52  ;;  %v3236_v39 = vmul.f32 %v3207_v12, %v2698_v15  ;;  %v1210_v32 = vmul.f32 %v1209_v60, %v2696_v14 }
 0x18a   : > { %487 = vrot.lane.b32.xlu1 %v481_v56, %s2264_s28  ;;  %v1233_v56 = vmul.f32 %v3248_v55, %v2696_v14 }
 0x18b   : > { %v1180_v51 = vpop.permute.xlu0 %1179 }
 0x18c   : > { %v1105_v46 = vpop.permute.xlu1 %1104  ;;  %v1239_v59 = vrot.slane %v1233_v56, 2 }
 0x18d   : > { %539 = vrot.lane.b32.xlu0 %v536_v29, %s2264_s28  ;;  %v1109_v49 = vadd.f32 %v1105_v46, %v1088_v36  ;;  %v3282_v29 = vstv %s3229_s8  ;;  %s2268_s8 = smov 15  }
 0x18e   : > { %446 = vrot.lane.b32.xlu1 %v440_v3, %s2263_s26  ;;  %v1143_v3 = vadd.f32 %v1138_v10, %v1122_v5  ;;  %v3310_v5 = vmul.f32 %v3279_v37, %v2698_v15 }
 0x18f   : > { %v1201_v17 = vpop.permute.xlu0 %1200  ;;  %v1123_v63 = vadd.f32 %v2956_v19, %v1109_v49 }
 0x190   : > { %v3193_v24 = vpop.permute.xlu1 %1139  ;;  %v1164_v11 = vadd.f32 %v1159_v22, %v1143_v3  ;;  %v1223_v22 = vrot.slane %v3236_v39, 1  ;;  %v1267_v3 = vmul.f32 %v3282_v29, %v2696_v14 }
 0x191   : > { %516 = vrot.lane.b32.xlu0 %v510_v6, %s2264_s28  ;;  %v1250_v6 = vmul.f32 %v3263_v44, %v2696_v14  ;;  %v694_v14 = vrot.slane %v3310_v5, 1 }
 0x192   : > { %514 = vrot.lane.b32.xlu1 %v511_v54, %s2264_s28  ;;  %v1185_v10 = vadd.f32 %v1180_v51, %v1164_v11  ;;  %v3276_v51 = vmul.f32 %v3182_v4, %v2724_v48  ;;  %v1224_v19 = vsel %vm377_vm6, %v1222_v21, %v1223_v22  ;;  %v3294_v4 = vmul.f32 %v3263_v44, %v2698_v15 }
 0x193   : > { %v3210_v28 = vpop.permute.xlu0 %1288  ;;  %v1144_v54 = vadd.f32 %v3193_v24, %v1123_v63  ;;  %v3326_v24 = vmul.f32 %v3282_v29, %v2698_v15  ;;  %v1256_v0 = vrot.slane %v1250_v6, 3  ;;  %v1273_v21 = vrot.slane %v1267_v3, 4 }
 0x194   : > { %v3216_v25 = vpop.permute.xlu1 %1160  ;;  %v1206_v47 = vadd.f32 %v1201_v17, %v1185_v10  ;;  %v599_v17 = vmul.f32 %v3195_v38, %v2724_v48  ;;  %v3320_v38 = vstv %s3252_s14  ;;  %v1257_v11 = vrot.slane %v3294_v4, 3  ;;  %s2269_s14 = smov 31  }
 0x195   : > { %603 = vrot.lane.b32.xlu0 %v597_v42, %s2263_s26  ;;  %v626_v42 = vrot.slane %v3276_v51, 1  ;;  %v1165_v57 = vadd.f32 %v3216_v25, %v1144_v54  ;;  %v651_v25 = vrot.slane %v644_v43, 2  ;;  %v695_v56 = vsel %vm377_vm6, %v693_v58, %v694_v14 }
 0x196   : > { %537 = vrot.lane.b32.xlu1 %v534_v26, %s2264_s28  ;;  %v1212_v46 = vadd.f32 %v1210_v32, %v1206_v47  ;;  %v668_v26 = vmul.f32 %v3320_v38, %v2698_v15  ;;  %v1274_v12 = vrot.slane %v3326_v24, 4  ;;  %v1235_v6 = vmul.f32 %v3248_v55, %v2724_v48 }
 0x197   : > { %v3238_v23 = vpop.permute.xlu0 %1309  ;;  %v627_v15 = vsel %vm377_vm6, %v624_v50, %v626_v42  ;;  %v1258_v50 = vsel %vm788_vm8, %v1256_v0, %v1257_v11  ;;  %v652_v63 = vsel %vm397_vm7, %v649_v31, %v651_v25  ;;  %v1252_v55 = vmul.f32 %v3263_v44, %v2724_v48 }
 0x198   : > { %v1182_v16 = vpop.permute.xlu1 %1181  ;;  %v1229_v2 = vadd.f32 %v1224_v19, %v1212_v46  ;;  %v1225_v19 = vrot.slane %v1218_v53, 1  ;;  %v1275_v5 = vsel %vm806_vm9, %v1273_v21, %v1274_v12  ;;  %v689_v54 = vmul.f32 %v3279_v37, %v2724_v48  ;;  %v3399_v37 = vld [vmem:[#allocation2 + $0x28] sm:$0xf] }
 0x199   : > { %628 = vrot.lane.b32.xlu0 %v625_v18, %s2263_s26  ;;  %v1186_v10 = vadd.f32 %v1182_v16, %v1165_v57  ;;  %v711_v16 = vstv %s3300_s19  ;;  %v1242_v3 = vrot.slane %v1235_v6, 2  ;;  %v669_v4 = vmul.f32 %v3399_v37, %v3320_v38  ;;  %s2270_s19 = smov 47  }
 0x19a   : > { %491 = vrot.lane.b32.xlu1 %v483_v41, %s2264_s28  ;;  %v1241_v41 = vsel %vm397_vm7, %v1239_v59, %v1240_v9  ;;  %v3356_v7 = vmul.f32 %v711_v16, %v2724_v48  ;;  %v696_v44 = vrot.slane %v689_v54, 1 }
 0x19b   : > { %v3255_v30 = vpop.permute.xlu0 %1330  ;;  %v1246_v18 = vadd.f32 %v1241_v41, %v1229_v2  ;;  %v1226_v2 = vsel %vm377_vm6, %v1223_v22, %v1225_v19  ;;  %v1243_v39 = vsel %vm397_vm7, %v1240_v9, %v1242_v3  ;;  %v1259_v22 = vrot.slane %v1252_v55, 3 }
 0x19c   : > { %v1203_v40 = vpop.permute.xlu1 %1202  ;;  %v721_v31 = vrot.slane %v3356_v7, 2 }
 0x19d   : > { %653 = vrot.lane.b32.xlu0 %v650_v35, %s2263_s26  ;;  %v1207_v49 = vadd.f32 %v1203_v40, %v1186_v10  ;;  %v3362_v35 = vld [vmem:[#allocation2 + $0x20] sm:$0xff]  ;;  %v1263_v46 = vadd.f32 %v1258_v50, %v1246_v18  ;;  %v1269_v10 = vmul.f32 %v3399_v37, %v3282_v29  ;;  %v1260_v53 = vsel %vm788_vm8, %v1257_v11, %v1259_v22 }
 0x19e   : > { %541 = vrot.lane.b32.xlu1 %v535_v45, %s2264_s28  ;;  %v1211_v40 = vmul.f32 %v3362_v35, %v1209_v60  ;;  %v3377_v60 = vld [vmem:[#allocation2 + $0x18] sm:$0xff] }
 0x19f   : > { %v3296_v8 = vpop.permute.xlu0 %1351  ;;  %v667_v33 = vmul.f32 %v3377_v60, %v3320_v38  ;;  %v1280_v43 = vadd.f32 %v1275_v5, %v1263_v46  ;;  %v712_v41 = vmul.f32 %v3377_v60, %v711_v16 }
 0x1a0   : > { %v3302_v45 = vpop.permute.xlu1 %1290  ;;  %v1213_v59 = vadd.f32 %v1211_v40, %v1207_v49  ;;  %v1276_v49 = vrot.slane %v1269_v10, 4 }
 0x1a1   : > { %607 = vrot.lane.b32.xlu0 %v599_v17, %s2263_s26  ;;  %v713_v17 = vmul.f32 %v3362_v35, %v711_v16  ;;  %v1294_v48 = vadd.f32 %v3210_v28, %v1280_v43  ;;  %v697_v28 = vsel %vm377_vm6, %v694_v14, %v696_v44  ;;  %v718_v62 = vrot.slane %v712_v41, 2 }
 0x1a2   : > { %605 = vrot.lane.b32.xlu1 %v598_v1, %s2263_s26  ;;  %v1230_v57 = vadd.f32 %v1226_v2, %v1213_v59 }
 0x1a3   : > { %v3329_v52 = vpop.permute.xlu0 %1372  ;;  %v719_v24 = vrot.slane %v713_v17, 2  ;;  %v1315_v9 = vadd.f32 %v3238_v23, %v1294_v48 }
 0x1a4   : > { %v3334_v36 = vpop.permute.xlu1 %1311 }
 0x1a5   : > { %675 = vrot.lane.b32.xlu0 %v668_v26, %s2264_s28  ;;  %v722_v58 = vsel %vm397_vm7, %v719_v24, %v721_v31  ;;  %v720_v16 = vsel %vm397_vm7, %v718_v62, %v719_v24  ;;  %v1336_v21 = vadd.f32 %v3255_v30, %v1315_v9 }
 0x1a6   : > { %630 = vrot.lane.b32.xlu1 %v627_v15, %s2263_s26  ;;  %v1247_v15 = vadd.f32 %v1243_v39, %v1230_v57 }
 0x1a7   : > { %v3349_v47 = vpop.permute.xlu0 %1386  ;;  %v1357_v11 = vadd.f32 %v3296_v8, %v1336_v21 }
 0x1a8   : > { %v3352_v32 = vpop.permute.xlu1 %1332  ;;  %v1264_v29 = vadd.f32 %v1260_v53, %v1247_v15 }
 0x1a9   : > { %698 = vrot.lane.b32.xlu0 %v695_v56, %s2264_s28  ;;  %v1277_v56 = vsel %vm806_vm9, %v1274_v12, %v1276_v49  ;;  %v1378_v30 = vadd.f32 %v3329_v52, %v1357_v11 }
 0x1aa   : > { %655 = vrot.lane.b32.xlu1 %v652_v63, %s2263_s26  ;;  %v1281_v14 = vadd.f32 %v1277_v56, %v1264_v29 }
 0x1ab   : > { %v1408_v1 = vpop.permute.xlu0 %1407  ;;  %v1392_v19 = vadd.f32 %v3349_v47, %v1378_v30 }
 0x1ac   : > { %v3375_v20 = vpop.permute.xlu1 %1353  ;;  %v1295_v50 = vadd.f32 %v3302_v45, %v1281_v14 }
 0x1ad   : > { %657 = vrot.lane.b32.xlu0 %v651_v25, %s2263_s26  ;;  %v1413_v17 = vadd.f32 %v1408_v1, %v1392_v19 }
 0x1ae   : > { %673 = vrot.lane.b32.xlu1 %v667_v33, %s2264_s28  ;;  %v1316_v12 = vadd.f32 %v3334_v36, %v1295_v50 }
 0x1af   : > { %v1429_v26 = vpop.permute.xlu0 %1428 }
 0x1b0   : > { %v1375_v0 = vpop.permute.xlu1 %1374  ;;  %v1337_v38 = vadd.f32 %v3352_v32, %v1316_v12  ;;  %v1434_v59 = vadd.f32 %v1429_v26, %v1413_v17 }
 0x1b1   : > { %725 = vrot.lane.b32.xlu0 %v722_v58, %s2264_s28 }
 0x1b2   : > { %632 = vrot.lane.b32.xlu1 %v626_v42, %s2263_s26  ;;  %v1358_v45 = vadd.f32 %v3375_v20, %v1337_v38 }
 0x1b3   : > { %v1450_v25 = vpop.permute.xlu0 %1449 }
 0x1b4   : > { %v1389_v18 = vpop.permute.xlu1 %1388  ;;  %v1455_v5 = vadd.f32 %v1450_v25, %v1434_v59 }
 0x1b5   : > { %702 = vrot.lane.b32.xlu0 %v696_v44, %s2264_s28 }
 0x1b6   : > { %700 = vrot.lane.b32.xlu1 %v697_v28, %s2264_s28 }
 0x1b7   : > { %v1471_v51 = vpop.permute.xlu0 %1470 }
 0x1b8   : > { %v1410_v42 = vpop.permute.xlu1 %1409  ;;  %v1476_v54 = vadd.f32 %v1471_v51, %v1455_v5 }
 0x1ba   : > { %723 = vrot.lane.b32.xlu1 %v720_v16, %s2264_s28 }
 0x1bb   : > { %v1485_v23 = vpop.permute.xlu0 %1484 }
 0x1bc   : > { %v1431_v7 = vpop.permute.xlu1 %1430  ;;  %v1490_v43 = vadd.f32 %v1485_v23, %v1476_v54  ;;  %v1717_v54 = vstv %s2028_s15  ;;  %s2273_s15 = smov 95  }
 0x1be   : > { %677 = vrot.lane.b32.xlu1 %v669_v4, %s2264_s28 }
 0x1bf   : > { %v1506_v40 = vpop.permute.xlu0 %1505 }
 0x1c0   : > { %v1452_v63 = vpop.permute.xlu1 %1451  ;;  %v1511_v36 = vadd.f32 %v1506_v40, %v1490_v43 }
 0x1c2   : > { %727 = vrot.lane.b32.xlu1 %v721_v31, %s2264_s28  ;;  %v1379_v31 = vadd.f32 %v1375_v0, %v1358_v45  ;;  %s2023_s28 = sld [smem:[#allocation3 + $0x45]] }
 0x1c3   : > { %v1527_v46 = vpop.permute.xlu0 %1526 }
 0x1c4   : > { %v1473_v6 = vpop.permute.xlu1 %1472  ;;  %v1393_v24 = vadd.f32 %v1389_v18, %v1379_v31  ;;  %v1532_v47 = vadd.f32 %v1527_v46, %v1511_v36 }
 0x1c6   : > { %v1414_v57 = vadd.f32 %v1410_v42, %v1393_v24 }
 0x1c7   : > { %v1548_v8 = vpop.permute.xlu0 %1547 }
 0x1c8   : > { %v1487_v33 = vpop.permute.xlu1 %1486  ;;  %v1553_v58 = vadd.f32 %v1548_v8, %v1532_v47  ;;  %v1435_v44 = vadd.f32 %v1431_v7, %v1414_v57  ;;  %v1675_v53 = vstv %s2023_s28  ;;  %v370_v47 = vstv %s1955_s20  ;;  %s2271_s28 = smov 63   ;;  %s2274_s20 = smov 111  }
 0x1c9   : > { %v372_v57 = vmul.f32 %v3075_v61, %v370_v47 }
 0x1ca   : > { %v1456_v41 = vadd.f32 %v1452_v63, %v1435_v44 }
 0x1cb   : > { %v1569_v55 = vpop.permute.xlu0 %1568 }
 0x1cc   : > { %v1508_v52 = vpop.permute.xlu1 %1507  ;;  %v1574_v26 = vadd.f32 %v1569_v55, %v1553_v58  ;;  %v1477_v22 = vadd.f32 %v1473_v6, %v1456_v41  ;;  %v390_v41 = vstv %s1956_s5  ;;  %s171_s5 = scalar_lea.vmem [#allocation8], %s1950_s30 }
 0x1ce   : > { %v1491_v15 = vadd.f32 %v1487_v33, %v1477_v22  ;;  %v392_v22 = vmul.f32 %v3075_v61, %v390_v41 }
 0x1cf   : > { %v1583_v2 = vpop.permute.xlu0 %1582 }
 0x1d0   : > { %v1529_v3 = vpop.permute.xlu1 %1528  ;;  %v1588_v20 = vadd.f32 %v1583_v2, %v1574_v26  ;;  %v1512_v62 = vadd.f32 %v1508_v52, %v1491_v15 }
 0x1d2   : > { %v1533_v9 = vadd.f32 %v1529_v3, %v1512_v62  ;;  %v399_v62 = vrot.slane %v392_v22, 2 }
 0x1d3   : > { %v1604_v1 = vpop.permute.xlu0 %1603 }
 0x1d4   : > { %v1550_v32 = vpop.permute.xlu1 %1549  ;;  %v1609_v10 = vadd.f32 %v1604_v1, %v1588_v20  ;;  %v371_v1 = vmul.f32 %v3091_v34, %v370_v47  ;;  %v362_v20 = vstv %s361_s22  ;;  %s1859_s22 = sshll.u32 %s171_s5, 4  ;;  %s1860_s22 = int_to_ptr.vmem [resolvable:$true] %s1859_s22 }
 0x1d5   : > { %v1554_v42 = vadd.f32 %v1550_v32, %v1533_v9  ;;  %v379_v32 = vrot.slane %v372_v57, 1 }
 0x1d7   : > { %v1625_v48 = vpop.permute.xlu0 %1624 }
 0x1d8   : > { %v1571_v39 = vpop.permute.xlu1 %1570  ;;  %v1630_v25 = vadd.f32 %v1625_v48, %v1609_v10 }
 0x1d9   : > { %v1575_v21 = vadd.f32 %v1571_v39, %v1554_v42  ;;  %v378_v39 = vrot.slane %v371_v1, 1  ;;  %v373_v42 = vmul.f32 %v3133_v27, %v370_v47 }
 0x1db   : > { %v1646_v0 = vpop.permute.xlu0 %1645  ;;  %v380_v15 = vsel %vm377_vm6, %v378_v39, %v379_v32 }
 0x1dc   : > { %v1585_v28 = vpop.permute.xlu1 %1584  ;;  %v1651_v18 = vadd.f32 %v1646_v0, %v1630_v25  ;;  %v391_v0 = vmul.f32 %v3091_v34, %v390_v41  ;;  %v363_v25 = vmul.f32 %v3091_v34, %v362_v20 }
 0x1dd   : > { %v1589_v23 = vadd.f32 %v1585_v28, %v1575_v21 }
 0x1df   : > { %v1667_v49 = vpop.permute.xlu0 %1666 }
 0x1e0   : > { %v1672_v29 = vadd.f32 %v1667_v49, %v1651_v18  ;;  %v1606_v51 = vpop.permute.xlu1 %1605  ;;  %v398_v49 = vrot.slane %v391_v0, 2 }
 0x1e1   : > { %v1610_v7 = vadd.f32 %v1606_v51, %v1589_v23 }
 0x1e2   : > { %v1676_v16 = vadd.f32 %v1675_v53, %v1672_v29  ;;  %v400_v29 = vsel %vm397_vm7, %v398_v49, %v399_v62 }
 0x1e3   : > { %v418_v19 = vpop.permute.xlu0 %417 }
 0x1e4   : > { %v2029_v56 = vmul.f32 -1.442695, %v1676_v16  ;;  %v1627_v14 = vpop.permute.xlu1 %1626 }
 0x1e5   : > { %v1631_v11 = vadd.f32 %v1627_v14, %v1610_v7  ;;  %v381_v14 = vrot.slane %v373_v42, 1  ;;  %v393_v7 = vmul.f32 %v3133_v27, %v390_v41 }
 0x1e6   : > { %2117 = vpow2.f32 %v2029_v56 }
 0x1e7   : > { %v443_v8 = vpop.permute.xlu0 %442 }
 0x1e8   : > { %v1648_v4 = vpop.permute.xlu1 %1647 }
 0x1e9   : > { %v1652_v50 = vadd.f32 %v1648_v4, %v1631_v11 }
 0x1eb   : > { %v468_v33 = vpop.permute.xlu0 %467 }
 0x1ec   : > { %v1669_v40 = vpop.permute.xlu1 %1668 }
 0x1ed   : > { %v1673_v63 = vadd.f32 %v1669_v40, %v1652_v50  ;;  %v382_v40 = vsel %vm377_vm6, %v379_v32, %v381_v14 }
 0x1ef   : > { %v1677_v30 = vadd.f32 %v1675_v53, %v1673_v63  ;;  %v3434_v43 = vpop.permute.xlu0 %421  ;;  %v386_v53 = vadd.f32 %v380_v15, %v363_v25  ;;  %v364_v63 = vmul.f32 %v3075_v61, %v362_v20 }
 0x1f0   : > { %v3428_v12 = vpop.permute.xlu1 %419 }
 0x1f1   : > { %v2030_v46 = vmul.f32 -1.442695, %v1677_v30  ;;  %v406_v51 = vadd.f32 %v400_v29, %v386_v53  ;;  %v558_v30 = vstv %s1964_s23 }
 0x1f3   : > { %v2118_v6 = vpop.eup %2117  ;;  %2119 = vpow2.f32 %v2030_v46  ;;  %v3438_v3 = vpop.permute.xlu0 %489  ;;  %v426_v56 = vadd.f32 %v418_v19, %v406_v51  ;;  %v401_v46 = vrot.slane %v393_v7, 2  ;;  %v387_v19 = vadd.f32 %v382_v40, %v364_v63 }
 0x1f4   : > { %v1711_v17 = vadd.f32 1.0, %v2118_v6  ;;  %v3430_v38 = vpop.permute.xlu1 %444 }
 0x1f5   : > { %v451_v34 = vadd.f32 %v443_v8, %v426_v56 }
 0x1f6   : > { %2121 = vrcp.f32 %v1711_v17  ;;  %v3463_v17 = vstv %s1963_s27 }
 0x1f7   : > { %v513_v44 = vpop.permute.xlu0 %512  ;;  %v476_v23 = vadd.f32 %v468_v33, %v451_v34  ;;  %v559_v33 = vmul.f32 %v3377_v60, %v558_v30  ;;  %v551_v61 = vmul.f32 %v3377_v60, %v3463_v17  ;;  %v552_v34 = vmul.f32 %v3362_v35, %v3463_v17 }
 0x1f8   : > { %v3432_v59 = vpop.permute.xlu1 %469 }
 0x1fb   : > { %v3448_v18 = vpop.permute.xlu0 %471 }
 0x1fc   : > { %v488_v5 = vpop.permute.xlu1 %487 }
 0x1fd   : > { %v496_v50 = vadd.f32 %v488_v5, %v476_v23  ;;  %v402_v5 = vsel %vm397_vm7, %v399_v62, %v401_v46 }
 0x1ff   : > { %v540_v16 = vpop.permute.xlu0 %539  ;;  %v521_v6 = vadd.f32 %v513_v44, %v496_v50 }
 0x200   : > { %v2120_v45 = vpop.eup %2119  ;;  %v3436_v31 = vpop.permute.xlu1 %446 }
 0x201   : > { %v1712_v55 = vadd.f32 1.0, %v2120_v45  ;;  %v560_v45 = vmul.f32 %v3362_v35, %v558_v30 }
 0x203   : > { %v2122_v52 = vpop.eup %2121  ;;  %2123 = vrcp.f32 %v1712_v55  ;;  %v3457_v4 = vpop.permute.xlu0 %516  ;;  %v566_v47 = vrot.slane %v560_v45, 1 }
 0x204   : > { %v1718_v2 = vmul.f32 %v2122_v52, %v1717_v54  ;;  %v3440_v24 = vpop.permute.xlu1 %514  ;;  %v577_v52 = vstv %s1965_s4 }
 0x205   : > { %v578_v57 = vmul.f32 %v3377_v60, %v577_v52  ;;  %v579_v1 = vmul.f32 %v3362_v35, %v577_v52 }
 0x206   : > { %v1723_v36 = vrot.slane %v1718_v2, 7  ;;  %v407_v2 = vadd.f32 %v402_v5, %v387_v19  ;;  %v553_v5 = vmul.f32 %v3399_v37, %v3463_v17 }
 0x207   : > { %v604_v8 = vpop.permute.xlu0 %603  ;;  %v584_v22 = vrot.slane %v578_v57, 2 }
 0x208   : > { %1726 = vrot.lane.b32.xlu0 %v1723_v36, %s2267_s21  ;;  %v538_v26 = vpop.permute.xlu1 %537 }
 0x20b   : > { %v629_v44 = vpop.permute.xlu0 %628 }
 0x20c   : > { %v3450_v9 = vpop.permute.xlu1 %491 }
 0x210   : > { %v2124_v58 = vpop.eup %2123  ;;  %v3454_v21 = vpop.permute.xlu1 %541 }
 0x211   : > { %v1719_v48 = vmul.f32 %v2124_v58, %v1717_v54  ;;  %v546_v54 = vadd.f32 %v538_v26, %v521_v6  ;;  %v427_v58 = vadd.f32 %v3428_v12, %v407_v2  ;;  %v736_v2 = vstv %s1972_s17  ;;  %s1845_s17 = scalar_lea.sflag [#allocation5], %s2394_s29 }
 0x213   : > { %v1724_v10 = vrot.slane %v1719_v48, 7  ;;  %v554_v32 = vadd.f32 %v551_v61, %v546_v54  ;;  %v452_v26 = vadd.f32 %v3430_v38, %v427_v58  ;;  %v365_v48 = vmul.f32 %v3133_v27, %v362_v20 }
 0x214   : > { %v3459_v11 = vpop.permute.xlu1 %605  ;;  %v561_v20 = vmul.f32 %v3399_v37, %v558_v30 }
 0x215   : > { %1730 = vrot.lane.b32.xlu0 %v1724_v10, %s2267_s21  ;;  %v1725_v28 = vsel %vm1722_vm10, %v1723_v36, %v1724_v10  ;;  %v565_v36 = vrot.slane %v559_v33, 1  ;;  %v585_v10 = vrot.slane %v579_v1, 2  ;;  %v477_v15 = vadd.f32 %v3432_v59, %v452_v26 }
 0x216   : > { %1728 = vrot.lane.b32.xlu1 %v1725_v28, %s2267_s21  ;;  %v388_v25 = vadd.f32 %v381_v14, %v365_v48  ;;  %v654_v28 = vpop.permute.xlu0 %653  ;;  %v568_v23 = vrot.slane %v561_v20, 1  ;;  %s2038_s21 = sshll.u32 %s2312_s13, 7 }
 0x217   : > { %v567_v39 = vsel %vm377_vm6, %v565_v36, %v566_v47  ;;  %v586_v60 = vsel %vm397_vm7, %v584_v22, %v585_v10  ;;  %v497_v12 = vadd.f32 %v3438_v3, %v477_v15  ;;  %v580_v3 = vmul.f32 %v3399_v37, %v577_v52  ;;  %s1857_s4 = scalar_lea.hbm %s3539_s2, %s2038_s21 }
 0x218   : > { %v631_v55 = vpop.permute.xlu1 %630  ;;  %v573_v0 = vadd.f32 %v567_v39, %v554_v32  ;;  %v408_v38 = vadd.f32 %v401_v46, %v388_v25 }
 0x219   : > { %v522_v49 = vadd.f32 %v3440_v24, %v497_v12  ;;  %v587_v30 = vrot.slane %v580_v3, 2 }
 0x21a   : > { %v592_v53 = vadd.f32 %v586_v60, %v573_v0  ;;  %v428_v27 = vadd.f32 %v3434_v43, %v408_v38  ;;  %v608_v51 = vpop.permute.xlu0 %607  ;;  %v1697_v38 = vstv %s2024_s6  ;;  %s2182_s6 = scalar_lea.vmem %s1860_s22, 128 }
 0x21b   : > { %v547_v59 = vadd.f32 %v540_v16, %v522_v49  ;;  %v569_v16 = vsel %vm377_vm6, %v566_v47, %v568_v23  ;;  %v588_v19 = vsel %vm397_vm7, %v585_v10, %v587_v30  ;;  %p2183_p6 = scmp.ne.s32.totalorder %s1860_s22, %s2182_s6 }
 0x21c   : > { %v656_v41 = vpop.permute.xlu1 %655  ;;  %v612_v29 = vadd.f32 %v604_v8, %v592_v53  ;;  %v453_v56 = vadd.f32 %v3436_v31, %v428_v27  ;;  %v1739_v27 = vstv %s2031_s7  ;;  %s2275_s7 = smov [#allocation8]  }
 0x21d   : > { %v555_v7 = vadd.f32 %v552_v34, %v547_v59  ;;  %p2184_p7 = pnand %p2183_p6, %p3553_p8 }
 0x21e   : > { %v637_v14 = vadd.f32 %v629_v44, %v612_v29  ;;  %v478_v24 = vadd.f32 %v3448_v18, %v453_v56  ;;  %v676_v50 = vpop.permute.xlu0 %675 }
 0x21f   : > { %v574_v46 = vadd.f32 %v569_v16, %v555_v7  ;;  %p2185_p10 = pneg %p2184_p7 }
 0x220   : > { %v674_v62 = vpop.permute.xlu1 %673  ;;  %v662_v43 = vadd.f32 %v654_v28, %v637_v14  ;;  %v498_v63 = vadd.f32 %v3450_v9, %v478_v24 }
 0x221   : > { %v593_v33 = vadd.f32 %v588_v19, %v574_v46 }
 0x222   : > { %v682_v31 = vadd.f32 %v674_v62, %v662_v43  ;;  %v523_v35 = vadd.f32 %v3457_v4, %v498_v63  ;;  %v699_v6 = vpop.permute.xlu0 %698 }
 0x223   : > { %v613_v18 = vadd.f32 %v3459_v11, %v593_v33 }
 0x224   : > { %v633_v42 = vpop.permute.xlu1 %632  ;;  %v707_v45 = vadd.f32 %v699_v6, %v682_v31  ;;  %v548_v52 = vadd.f32 %v3454_v21, %v523_v35 }
 0x225   : > { %v638_v9 = vadd.f32 %v631_v55, %v613_v18 }
 0x226   : > { %v556_v47 = vadd.f32 %v553_v5, %v548_v52  ;;  %v658_v4 = vpop.permute.xlu0 %657 }
 0x227   : > { %v663_v61 = vadd.f32 %v656_v41, %v638_v9 }
 0x228   : > { %v701_v40 = vpop.permute.xlu1 %700  ;;  %v575_v58 = vadd.f32 %v568_v23, %v556_v47 }
 0x229   : > { %v683_v57 = vadd.f32 %v676_v50, %v663_v61 }
 0x22a   : > { %v594_v44 = vadd.f32 %v587_v30, %v575_v58  ;;  %v726_v26 = vpop.permute.xlu0 %725 }
 0x22b   : > { %v708_v32 = vadd.f32 %v701_v40, %v683_v57 }
 0x22c   : > { %v724_v8 = vpop.permute.xlu1 %723  ;;  %v614_v48 = vadd.f32 %v608_v51, %v594_v44 }
 0x22d   : > { %v732_v54 = vadd.f32 %v724_v8, %v707_v45  ;;  %v733_v11 = vadd.f32 %v726_v26, %v708_v32 }
 0x22e   : > { %v639_v21 = vadd.f32 %v633_v42, %v614_v48  ;;  %v703_v41 = vpop.permute.xlu0 %702 }
 0x22f   : > { %v737_v36 = vadd.f32 %v736_v2, %v732_v54  ;;  %v738_v39 = vadd.f32 %v736_v2, %v733_v11 }
 0x230   : > { %v678_v22 = vpop.permute.xlu1 %677  ;;  %v664_v10 = vadd.f32 %v658_v4, %v639_v21 }
 0x231   : > { %v2025_v1 = vmul.f32 -1.442695, %v737_v36  ;;  %v2026_v55 = vmul.f32 -1.442695, %v738_v39 }
 0x232   : > { %v684_v17 = vadd.f32 %v678_v22, %v664_v10 }
 0x233   : > { %2125 = vpow2.f32 %v2025_v1 }
 0x234   : > { %2127 = vpow2.f32 %v2026_v55  ;;  %v709_v0 = vadd.f32 %v703_v41, %v684_v17  ;;  %v728_v25 = vpop.permute.xlu1 %727 }
 0x236   : > { %v734_v60 = vadd.f32 %v728_v25, %v709_v0 }
 0x238   : > { %v739_v28 = vadd.f32 %v736_v2, %v734_v60 }
 0x23a   : > { %v2027_v12 = vmul.f32 -1.442695, %v739_v28 }
 0x240   : > { %v2126_v37 = vpop.eup %2125 }
 0x241   : > { %v1688_v15 = vadd.f32 1.0, %v2126_v37  ;;  %v2128_v62 = vpop.eup %2127 }
 0x242   : > { %v1689_v53 = vadd.f32 1.0, %v2128_v62 }
 0x243   : > { %2129 = vrcp.f32 %v1688_v15 }
 0x244   : > { %2131 = vpow2.f32 %v2027_v12 }
 0x245   : > { %2133 = vrcp.f32 %v1689_v53 }
 0x250   : > { %v2130_v49 = vpop.eup %2129 }
 0x251   : > { %v1698_v29 = vmul.f32 %v2130_v49, %v1697_v38  ;;  %v2132_v56 = vpop.eup %2131 }
 0x252   : > { %v2134_v34 = vpop.eup %2133  ;;  %v1690_v14 = vadd.f32 1.0, %v2132_v56 }
 0x253   : > { %v1699_v23 = vmul.f32 %v2134_v34, %v1697_v38 }
 0x254   : > { %2135 = vrcp.f32 %v1690_v14 }
 0x261   : > { %v2136_v46 = vpop.eup %2135 }
 0x262   : > { %v1700_v19 = vmul.f32 %v2136_v46, %v1697_v38 }
 0x27a   : > { %v1727_v20 = vpop.permute.xlu0 %1726 }
 0x27b   : > { %v1735_v51 = vadd.f32 %v1727_v20, %v1698_v29  ;;  %v1829_v29 = vld [vmem:[%s2400_s3] sm:$0xff]  ;;  %s2186_s3 = sshll.u32 %s2275_s7, 4  ;;  %s2187_s3 = int_to_ptr.vmem [resolvable:$false] %s2186_s3 }
 0x27c   : > { %s2188_s13 = scalar_lea.vmem %s2187_s3, 256  ;;  %p2189_p11 = scmp.lt.s32.totalorder %s1860_s22, %s2187_s3 }
 0x27d   : > { %v1740_v42 = vadd.f32 %v1739_v27, %v1735_v51  ;;  %p2190_p0 = scmp.lt.s32.totalorder %s2188_s13, %s2182_s6 }
 0x27f   : > { %1744 = vrot.lane.b32.xlu1 %v1740_v42, %s2263_s26  ;;  %v1747_v59 = vrot.slane %v1740_v42, 1  ;;  %v1751_v40 = vrot.slane %v1740_v42, 2  ;;  %v1755_v63 = vrot.slane %v1740_v42, 3  ;;  %v1759_v16 = vrot.slane %v1740_v42, 4  ;;  %p2191_p3 = por %p2190_p0, %p2189_p11 }
 0x280   : > { %v1763_v6 = vrot.slane %v1740_v42, 5  ;;  %v1767_v45 = vrot.slane %v1740_v42, 6 }
 0x281   : > { %1748 = vrot.lane.b32.xlu0 %v1747_v59, %s2268_s8  ;;  %p2192_p5 = pnand %p2191_p3, %p2185_p10 }
 0x287   : > { %v1731_v35 = vpop.permute.xlu0 %1730 }
 0x288   : > { %v1729_v3 = vpop.permute.xlu1 %1728  ;;  %v1737_v8 = vadd.f32 %v1731_v35, %v1700_v19 }
 0x289   : > { %v1736_v7 = vadd.f32 %v1729_v3, %v1699_v23 }
 0x28a   : > { %v1742_v18 = vadd.f32 %v1739_v27, %v1737_v8 }
 0x28b   : > { %v1741_v24 = vadd.f32 %v1739_v27, %v1736_v7 }
 0x28c   : > { %v1804_v9 = vrot.slane %v1742_v18, 7 }
 0x28d   : > { %1776 = vrot.lane.b32.xlu1 %v1741_v24, %s2263_s26  ;;  %v1779_v50 = vrot.slane %v1741_v24, 1  ;;  %v1783_v43 = vrot.slane %v1741_v24, 2  ;;  %v1787_v30 = vrot.slane %v1741_v24, 3  ;;  %v1791_v31 = vrot.slane %v1741_v24, 4  ;;  %s2272_s26 = smov 79  }
 0x28e   : > { %v1795_v33 = vrot.slane %v1741_v24, 5  ;;  %v1799_v54 = vrot.slane %v1741_v24, 6  ;;  %v1772_v52 = vrot.slane %v1741_v24, 7 }
 0x28f   : > { %1780 = vrot.lane.b32.xlu0 %v1779_v50, %s2268_s8 }
 0x291   : > { %1752 = vrot.lane.b32.xlu1 %v1751_v40, %s2269_s14 }
 0x293   : > { %1784 = vrot.lane.b32.xlu0 %v1783_v43, %s2269_s14 }
 0x295   : > { %1756 = vrot.lane.b32.xlu1 %v1755_v63, %s2270_s19 }
 0x297   : > { %1788 = vrot.lane.b32.xlu0 %v1787_v30, %s2270_s19 }
 0x299   : > { %1760 = vrot.lane.b32.xlu1 %v1759_v16, %s2271_s28 }
 0x29b   : > { %1792 = vrot.lane.b32.xlu0 %v1791_v31, %s2271_s28 }
 0x29d   : > { %1764 = vrot.lane.b32.xlu1 %v1763_v6, %s2272_s26 }
 0x29f   : > { %1796 = vrot.lane.b32.xlu0 %v1795_v33, %s2272_s26 }
 0x2a1   : > { %1768 = vrot.lane.b32.xlu1 %v1767_v45, %s2273_s15 }
 0x2a3   : > { %1800 = vrot.lane.b32.xlu0 %v1799_v54, %s2273_s15 }
 0x2a5   : > { %1773 = vrot.lane.b32.xlu1 %v1772_v52, %s2274_s20 }
 0x2a7   : > { %1805 = vrot.lane.b32.xlu0 %v1804_v9, %s2274_s20 }
 0x2f1   : > { %v1745_v5 = vpop.permute.xlu1 %1744 }
 0x2f3   : > { %v1749_v2 = vpop.permute.xlu0 %1748 }
 0x2f4   : > { %v1809_v11 = vsel %vm1808_vm11, %v1745_v5, %v1749_v2 }
 0x2ff   : > { %v1777_v61 = vpop.permute.xlu1 %1776 }
 0x301   : > { %v1781_v36 = vpop.permute.xlu0 %1780 }
 0x302   : > { %v1822_v21 = vsel %vm1808_vm11, %v1777_v61, %v1781_v36 }
 0x303   : > { %v1753_v47 = vpop.permute.xlu1 %1752 }
 0x304   : > { %v1811_v48 = vsel %vm1810_vm12, %v1809_v11, %v1753_v47 }
 0x305   : > { %v1785_v4 = vpop.permute.xlu0 %1784 }
 0x306   : > { %v1823_v22 = vsel %vm1810_vm12, %v1822_v21, %v1785_v4 }
 0x307   : > { %v1757_v57 = vpop.permute.xlu1 %1756 }
 0x308   : > { %v1813_v55 = vsel %vm1812_vm13, %v1811_v48, %v1757_v57 }
 0x309   : > { %v1789_v1 = vpop.permute.xlu0 %1788 }
 0x30a   : > { %v1824_v17 = vsel %vm1812_vm13, %v1823_v22, %v1789_v1 }
 0x30b   : > { %v1761_v58 = vpop.permute.xlu1 %1760 }
 0x30c   : > { %v1815_v10 = vsel %vm1814_vm14, %v1813_v55, %v1761_v58 }
 0x30d   : > { %v1793_v32 = vpop.permute.xlu0 %1792 }
 0x30e   : > { %v1825_v15 = vsel %vm1814_vm14, %v1824_v17, %v1793_v32 }
 0x30f   : > { %v1765_v44 = vpop.permute.xlu1 %1764 }
 0x310   : > { %v1817_v41 = vsel %vm1816_vm15, %v1815_v10, %v1765_v44 }
 0x311   : > { %v1797_v26 = vpop.permute.xlu0 %1796 }
 0x312   : > { %v1826_v60 = vsel %vm1816_vm15, %v1825_v15, %v1797_v26 }
 0x313   : > { %v1769_v39 = vpop.permute.xlu1 %1768 }
 0x314   : > { %v1819_v0 = vsel %vm1818_vm0, %v1817_v41, %v1769_v39 }
 0x315   : > { %v1801_v37 = vpop.permute.xlu0 %1800 }
 0x316   : > { %v1827_v62 = vsel %vm1818_vm0, %v1826_v60, %v1801_v37 }
 0x317   : > { %v1774_v25 = vpop.permute.xlu1 %1773 }
 0x318   : > { %v1821_v28 = vsel %vm1820_vm1, %v1819_v0, %v1774_v25 }
 0x319   : > { %v1806_v12 = vpop.permute.xlu0 %1805  ;;  %v1833_v49 = vrot.slane %v1821_v28, %v2414_v13 }
 0x31a   : > { %v1828_v53 = vsel %vm1820_vm1, %v1827_v62, %v1806_v12 }
 0x31b   : > { %v1837_v38 = vrot.slane %v1828_v53, %v2414_v13 }
 0x31d   : > { %v1840_v27 = vcombine.low %v1833_v49, %v1837_v38 }
 0x31f   : > { %v1842_v20 = vmul.f32 %v1840_v27, %v1829_v29 }
 0x321   : > { %1843 = vst [vmem:[%s171_s5] sm:$0xff] %v1842_v20 }
 0x322   : > { %2195 = shalt.err (!%p2192_p5)
}
 0x323   : > { %s2196_s30 = scalar_lea.hbm %s1857_s4, 128  ;;  %s2200_s14 = scalar_lea.hbm %s3539_s2, 256 }
 0x324   : > { %p2197_p2 = scmp.ne.s32.totalorder %s1857_s4, %s2196_s30  ;;  %p2201_p9 = scmp.lt.s32.totalorder %s1857_s4, %s3539_s2 }
 0x325   : > { %p2202_p1 = scmp.lt.s32.totalorder %s2200_s14, %s2196_s30 }
 0x326   : > { %p2198_p12 = pnand %p2197_p2, %p3553_p8 }
 0x327   : > { %p2203_p4 = por %p2202_p1, %p2201_p9 }
 0x328   : > { %p2199_p13 = pneg %p2198_p12 }
 0x32a   : > { %p2204_p6 = pnand %p2203_p4, %p2199_p13 }
 0x32c   : > { %2207 = shalt.err (!%p2204_p6)
}
 0x32d   : > { %2045 = dma.vmem_to_hbm [thread:$0]  (%p3553_p8), %s1860_s22, 128, %s1857_s4, %s1845_s17  }
 0x32e PF: > { %s1871_s26 = sand.u32 1, %s2238_s9   ;;  %p3554_p7 = scmp.ne.s32.totalorder %s3545_s16, 0 }
 0x32f   : > { %p3555_p10 = scmp.ge.s32.totalorder %s2250_s12, 2  ;;  %s1872_s15 = scalar_lea.sflag [#allocation5], %s1871_s26 }
 0x331   : > { %p2056_p11 = pnand %p3555_p10, %p3554_p7 }
 0x333   : > { %p2057_p0 = pneg %p2056_p11 }
 0x335   : > { %2233 = dma.done.wait (%p2057_p0), %s1872_s15, 128  }
 0x336   : > { %2235 = vsyncadd (%p2057_p0), %s1872_s15, 4294967168  ;;  %p16_p3 = scmp.ge.s32.totalorder %s2337_s18, 4   ;;  %s3556_s9 = smov %s2242_s10 }
 0x337   : > { %s3557_s10 = smov %s2246_s11  ;;  %s3558_s11 = smov %s2354_s24 }
 0x338   : > { %s3559_s12 = smov %s2337_s18  ;;  %18 = sbr.rel (!%p16_p3) target bundleno = 6 (0x6), region = 82 }
 0x33d   :  { %1877 = vsyncpa [#allocation4], 1 }
 0x33e   :  { %1879 = vsyncpa [#allocation4 + $0x1], 1 }
 0x33f   :  { %1880 = vsyncpa [#allocation5], 1 }
 0x340   :  { %1882 = vsyncpa [#allocation5 + $0x1], 1 }
 0x341   :  { %1883 = vsyncpa [#allocation6], 1 }
 0x342   :  { %1885 = vsyncpa [#allocation6 + $0x1], 1 }

</bundles_post_ra>
